<compile_context>
chip_gen: v7x
topology: tpu7x:2x2x1
jax: 0.10.0
libtpu: 0.0.40
codegen_flags: <defaults>
</compile_context>

<pallas_src>
import math

import jax
import jax.numpy as jnp
from jax.experimental import pallas as pl
from jax.experimental.pallas import tpu as pltpu


def _sigmoid(x):
    return 1.0 / (1.0 + jnp.exp(-x))


def _conv_relu_pool(src_ref, w_ref, b_ref, dst_ref, dst_row0):
    """Valid conv1d + bias + ReLU + MaxPool1d(k=2, floor) on a (L, B, C) VMEM ref.

    src_ref: (L_in, B, C_in) f32; w_ref: (K, C_in, C_out) bf16; b_ref: (1, C_out) f32.
    Pooled rows are stored to dst_ref[dst_row0 : dst_row0 + P, :, :] with one wide store.
    """
    K, C_in, C_out = w_ref.shape
    L_in, B, _ = src_ref.shape
    L_out = L_in - K + 1
    P = L_out // 2          # floor MaxPool1d(2)
    R = 2 * P               # conv rows actually consumed by the pool

    acc = jnp.zeros((R * B, C_out), jnp.float32)
    for k in range(K):      # conv = K shifted matmuls, batch flattened into M
        xk = src_ref[pl.ds(k, R), :, :].reshape(R * B, C_in).astype(jnp.bfloat16)
        acc = acc + jnp.dot(xk, w_ref[k], preferred_element_type=jnp.float32)
    acc = jnp.maximum(acc + b_ref[...], 0.0)          # bias + ReLU

    # MaxPool1d(2): rows (2p, 2p+1) sit in the two tile-aligned halves of each
    # 2B-sublane group (B is a multiple of 8), so this is a plain elementwise max.
    acc = acc.reshape(P, 2 * B, C_out)
    pooled = jnp.maximum(acc[:, :B, :], acc[:, B:, :])
    dst_ref[pl.ds(dst_row0, P), :, :] = pooled        # single dense store


def fused_cnn_lstm_kernel(
        x_ref,
        c1w_ref, c1b_ref, c2w_ref, c2b_ref, c3w_ref, c3b_ref,
        wih0_ref, whh0_ref, b0_ref, w1s_ref, b1_ref,
        fc1w_ref, fc1b_ref, fc2w_ref, fc2b_ref, fc3w_ref, fc3b_ref,
        out_ref,
        a1_ref, a2_ref, a3_ref, gx0_ref):
    B = out_ref.shape[0]          # batch tile (multiple of 8)
    H = whh0_ref.shape[0]         # LSTM hidden size (128)

    # ---- conv stack, all intermediates VMEM-resident --------------------------------
    # a1 is conv2's zero-padded input (padding=1): only the two pad rows are zeroed,
    # rows 1..P1 are overwritten by pool1 below.
    n_a1 = a1_ref.shape[0]
    a1_ref[0] = jnp.zeros((B, a1_ref.shape[2]), jnp.float32)
    a1_ref[n_a1 - 1] = jnp.zeros((B, a1_ref.shape[2]), jnp.float32)

    _conv_relu_pool(x_ref, c1w_ref, c1b_ref, a1_ref, 1)    # conv1 (k=5) + pool1
    _conv_relu_pool(a1_ref, c2w_ref, c2b_ref, a2_ref, 0)   # conv2 (k=3, pad=1) + pool2
    _conv_relu_pool(a2_ref, c3w_ref, c3b_ref, a3_ref, 0)   # conv3 (k=3) + pool3

    # ---- 2-layer LSTM (batch_first), layers interleaved ------------------------------
    T = a3_ref.shape[0]

    # Layer-0 input->gate contributions for ALL timesteps in one big-M MXU call,
    # with the folded (b_ih0 + b_hh0) bias; result parked in VMEM scratch.
    a3_all = a3_ref[...].reshape(T * B, a3_ref.shape[2]).astype(jnp.bfloat16)
    gx0_ref[...] = (jnp.dot(a3_all, wih0_ref[...], preferred_element_type=jnp.float32)
                    + b0_ref[...]).reshape(T, B, 4 * H)

    whh0 = whh0_ref[...]
    w1s = w1s_ref[...]                                   # [W_ih1; W_hh1] stacked, (2H, 4H)
    b1_full = jnp.broadcast_to(b1_ref[...], (B, 4 * H))  # hoisted bias broadcast

    def lstm_gates(gates, c_prev):
        # PyTorch gate order: i, f, g, o
        i = _sigmoid(gates[:, 0 * H:1 * H])
        f = _sigmoid(gates[:, 1 * H:2 * H])
        g = jnp.tanh(gates[:, 2 * H:3 * H])
        o = _sigmoid(gates[:, 3 * H:4 * H])
        c_new = f * c_prev + i * g
        return o * jnp.tanh(c_new), c_new

    h0 = jnp.zeros((B, H), jnp.float32)
    c0 = jnp.zeros((B, H), jnp.float32)
    h1 = jnp.zeros((B, H), jnp.float32)
    c1 = jnp.zeros((B, H), jnp.float32)
    # T is tiny (2 for window_size=32) -> static unroll is fine.
    # TODO(synk): switch to lax.fori_loop(..., unroll=True) with VMEM-carried state if T grows.
    for t in range(T):
        g0 = gx0_ref[t] + jnp.dot(h0.astype(jnp.bfloat16), whh0,
                                  preferred_element_type=jnp.float32)
        h0, c0 = lstm_gates(g0, c0)
        # Fused layer-1 matmul: [h0_t, h1_{t-1}] @ [W_ih1; W_hh1]  (contraction depth 2H=256)
        hcat = jnp.concatenate([h0, h1], axis=1).astype(jnp.bfloat16)
        g1 = b1_full + jnp.dot(hcat, w1s, preferred_element_type=jnp.float32)
        h1, c1 = lstm_gates(g1, c1)

    # ---- FC head on h_n[-1]; fc3 zero-padded to 128 lanes (lane-dense store) ----------
    z = jnp.dot(h1.astype(jnp.bfloat16), fc1w_ref[...],
                preferred_element_type=jnp.float32) + fc1b_ref[...]
    z = jnp.maximum(z, 0.0)
    z = jnp.dot(z.astype(jnp.bfloat16), fc2w_ref[...],
                preferred_element_type=jnp.float32) + fc2b_ref[...]
    z = jnp.maximum(z, 0.0)
    z = jnp.dot(z.astype(jnp.bfloat16), fc3w_ref[...],
                preferred_element_type=jnp.float32) + fc3b_ref[...]
    out_ref[...] = _sigmoid(z)    # (B, 128); column 0 is the model output


def cnn_lstm_forward(x, params, *, batch_tile=128):
    """x: (B, window_size, num_features) f32 -> (B, 1) sigmoid outputs."""
    B, W, F = x.shape

    # Batch tiling: keep the tile a multiple of 8 (batch lives on sublanes); prefer
    # >=2 grid steps when the padded batch allows so the "parallel" axis can use both
    # TensorCores on v7x (no effect on v5e/v6e).
    Bp = ((B + 7) // 8) * 8
    TB = min(((batch_tile + 7) // 8) * 8, Bp)
    if Bp == TB and Bp >= 16 and (Bp // 2) % 8 == 0:
        TB = Bp // 2
    Bp = ((Bp + TB - 1) // TB) * TB

    xt = jnp.transpose(x, (1, 0, 2))            # (W, B, F): batch -> sublanes
    if Bp != B:
        xt = jnp.concatenate([xt, jnp.zeros((W, Bp - B, F), x.dtype)], axis=1)

    # Static activation sizes (mirror the PyTorch model's arithmetic).
    L1 = W - 5 + 1
    P1 = L1 // 2
    L2 = (P1 + 2) - 3 + 1                       # conv2 has padding=1
    P2 = L2 // 2
    L3 = P2 - 3 + 1
    P3 = L3 // 2                                # LSTM sequence length

    w_order = ("c1w", "c1b", "c2w", "c2b", "c3w", "c3b",
               "wih0", "whh0", "b0", "w1s", "b1",
               "fc1w", "fc1b", "fc2w", "fc2b", "fc3w", "fc3b")
    weights = [params[k] for k in w_order]

    in_specs = [pl.BlockSpec((W, TB, F), lambda i: (0, i, 0))]
    # Weights use constant index maps, so they stay VMEM-resident across the grid.
    in_specs += [pl.BlockSpec(w.shape, lambda i, nd=w.ndim: (0,) * nd)
                 for w in weights]
    out_spec = pl.BlockSpec((TB, 128), lambda i: (i, 0))

    out = pl.pallas_call(
        fused_cnn_lstm_kernel,
        out_shape=jax.ShapeDtypeStruct((Bp, 128), jnp.float32),
        grid_spec=pltpu.PrefetchScalarGridSpec(
            num_scalar_prefetch=0,
            grid=(Bp // TB,),
            in_specs=in_specs,
            out_specs=out_spec,
            scratch_shapes=[
                pltpu.VMEM((P1 + 2, TB, 128), jnp.float32),   # pool1 (+conv2 pad) rows
                pltpu.VMEM((P2, TB, 128), jnp.float32),       # pool2 -> conv3 input
                pltpu.VMEM((P3, TB, 256), jnp.float32),       # pool3 -> LSTM input
                pltpu.VMEM((P3, TB, 512), jnp.float32),       # precomputed layer-0 gates
            ]),
        compiler_params=pltpu.CompilerParams(
            dimension_semantics=("parallel",)),
    )(xt, *weights)
    return out[:B, :1]


# --------------------------------------------------------------------------------------
# Deterministic parameter init (PyTorch-like uniform fan-in scaling), kernel-layout weights
# --------------------------------------------------------------------------------------
def init_params(key, num_features, hidden=128):
    ks = iter(jax.random.split(key, 24))

    def u(shape, fan_in):
        s = 1.0 / math.sqrt(fan_in)
        return jax.random.uniform(next(ks), shape, jnp.float32, -s, s)

    bf16 = jnp.bfloat16
    p = {}
    # Conv weights as (K, C_in, C_out) bf16 (PyTorch layout is (C_out, C_in, K)).
    # conv1 output / conv2 input channels zero-padded 64 -> 128 so a1 is lane-dense.
    c1w = jnp.transpose(u((64, num_features, 5), num_features * 5), (2, 1, 0))   # (5, F, 64)
    p["c1w"] = jnp.pad(c1w, ((0, 0), (0, 0), (0, 64))).astype(bf16)              # (5, F, 128)
    p["c1b"] = jnp.pad(u((1, 64), num_features * 5), ((0, 0), (0, 64)))          # (1, 128)
    c2w = jnp.transpose(u((128, 64, 3), 64 * 3), (2, 1, 0))                      # (3, 64, 128)
    p["c2w"] = jnp.pad(c2w, ((0, 0), (0, 64), (0, 0))).astype(bf16)              # (3, 128, 128)
    p["c2b"] = u((1, 128), 64 * 3)
    p["c3w"] = jnp.transpose(u((256, 128, 3), 128 * 3), (2, 1, 0)).astype(bf16)  # (3, 128, 256)
    p["c3b"] = u((1, 256), 128 * 3)

    H = hidden
    # LSTM (gate order i, f, g, o); weights stored transposed (in, 4H) bf16,
    # biases folded (b_ih + b_hh) in f32; layer-1 W_ih/W_hh stacked for one K=256 matmul.
    p["wih0"] = jnp.transpose(u((4 * H, 256), H), (1, 0)).astype(bf16)   # (256, 4H)
    p["whh0"] = jnp.transpose(u((4 * H, H), H), (1, 0)).astype(bf16)     # (H, 4H)
    p["b0"] = u((1, 4 * H), H) + u((1, 4 * H), H)
    wih1 = jnp.transpose(u((4 * H, H), H), (1, 0))                       # (H, 4H)
    whh1 = jnp.transpose(u((4 * H, H), H), (1, 0))                       # (H, 4H)
    p["w1s"] = jnp.concatenate([wih1, whh1], axis=0).astype(bf16)        # (2H, 4H)
    p["b1"] = u((1, 4 * H), H) + u((1, 4 * H), H)

    # FC weights as (in, out) bf16; fc3 zero-padded to 128 outputs (lane-dense final store).
    p["fc1w"] = jnp.transpose(u((64, H), H), (1, 0)).astype(bf16)        # (128, 64)
    p["fc1b"] = u((1, 64), H)
    p["fc2w"] = jnp.transpose(u((10, 64), 64), (1, 0)).astype(bf16)      # (64, 10)
    p["fc2b"] = u((1, 10), 64)
    fc3w = jnp.transpose(u((1, 10), 10), (1, 0))                         # (10, 1)
    fc3b = u((1, 1), 10)
    p["fc3w"] = jnp.pad(fc3w, ((0, 0), (0, 127))).astype(bf16)           # (10, 128)
    p["fc3b"] = jnp.pad(fc3b, ((0, 0), (0, 127)))                        # (1, 128)
    return p


if __name__ == "__main__":
    B, window_size, num_features = 2, 32, 4
    # window=32: conv1->28, pool->14, conv2(pad=1)->14, pool->7, conv3->5, pool->2
    key = jax.random.PRNGKey(0)
    kx, kp = jax.random.split(key)
    x = jax.random.normal(kx, (B, window_size, num_features), jnp.float32)
    params = init_params(kp, num_features)

    out = jax.block_until_ready(jax.jit(cnn_lstm_forward)(x, params))
    assert out.shape == (B, 1) and out.dtype == jnp.float32
    assert bool(jnp.all(jnp.isfinite(out)))
    assert bool(jnp.all((out >= 0.0) & (out <= 1.0)))
    print("KERNEL_OK")
</pallas_src>

<mosaic_0001>
module attributes {stable_mosaic.version = 11 : i64} {
  func.func @fused_cnn_lstm_kernel(%arg0: i32, %arg1: memref<32x8x4xf32, #tpu.memory_space<vmem>>, %arg2: memref<5x4x128xbf16, #tpu.memory_space<vmem>>, %arg3: memref<1x128xf32, #tpu.memory_space<vmem>>, %arg4: memref<3x128x128xbf16, #tpu.memory_space<vmem>>, %arg5: memref<1x128xf32, #tpu.memory_space<vmem>>, %arg6: memref<3x128x256xbf16, #tpu.memory_space<vmem>>, %arg7: memref<1x256xf32, #tpu.memory_space<vmem>>, %arg8: memref<256x512xbf16, #tpu.memory_space<vmem>>, %arg9: memref<128x512xbf16, #tpu.memory_space<vmem>>, %arg10: memref<1x512xf32, #tpu.memory_space<vmem>>, %arg11: memref<256x512xbf16, #tpu.memory_space<vmem>>, %arg12: memref<1x512xf32, #tpu.memory_space<vmem>>, %arg13: memref<128x64xbf16, #tpu.memory_space<vmem>>, %arg14: memref<1x64xf32, #tpu.memory_space<vmem>>, %arg15: memref<64x10xbf16, #tpu.memory_space<vmem>>, %arg16: memref<1x10xf32, #tpu.memory_space<vmem>>, %arg17: memref<10x128xbf16, #tpu.memory_space<vmem>>, %arg18: memref<1x128xf32, #tpu.memory_space<vmem>>, %arg19: memref<8x128xf32, #tpu.memory_space<vmem>>, %arg20: memref<16x8x128xf32, #tpu.memory_space<vmem>>, %arg21: memref<7x8x128xf32, #tpu.memory_space<vmem>>, %arg22: memref<2x8x256xf32, #tpu.memory_space<vmem>>, %arg23: memref<2x8x512xf32, #tpu.memory_space<vmem>>) attributes {dimension_semantics = [#tpu.dimension_semantics<parallel>], iteration_bounds = array<i64: 1>, scalar_prefetch = 0 : i64, scratch_operands = 4 : i64, tpu.core_type = #tpu.core_type<tc>, window_params = [{transform_indices = @transform_0, window_bounds = array<i64: 32, 8, 4>}, {pipeline_mode = #tpu.pipeline_mode<synchronous>, transform_indices = @transform_1, window_bounds = array<i64: 5, 4, 128>}, {pipeline_mode = #tpu.pipeline_mode<synchronous>, transform_indices = @transform_2, window_bounds = array<i64: 1, 128>}, {pipeline_mode = #tpu.pipeline_mode<synchronous>, transform_indices = @transform_3, window_bounds = array<i64: 3, 128, 128>}, {pipeline_mode = #tpu.pipeline_mode<synchronous>, transform_indices = @transform_4, window_bounds = array<i64: 1, 128>}, {pipeline_mode = #tpu.pipeline_mode<synchronous>, transform_indices = @transform_5, window_bounds = array<i64: 3, 128, 256>}, {pipeline_mode = #tpu.pipeline_mode<synchronous>, transform_indices = @transform_6, window_bounds = array<i64: 1, 256>}, {pipeline_mode = #tpu.pipeline_mode<synchronous>, transform_indices = @transform_7, window_bounds = array<i64: 256, 512>}, {pipeline_mode = #tpu.pipeline_mode<synchronous>, transform_indices = @transform_8, window_bounds = array<i64: 128, 512>}, {pipeline_mode = #tpu.pipeline_mode<synchronous>, transform_indices = @transform_9, window_bounds = array<i64: 1, 512>}, {pipeline_mode = #tpu.pipeline_mode<synchronous>, transform_indices = @transform_10, window_bounds = array<i64: 256, 512>}, {pipeline_mode = #tpu.pipeline_mode<synchronous>, transform_indices = @transform_11, window_bounds = array<i64: 1, 512>}, {pipeline_mode = #tpu.pipeline_mode<synchronous>, transform_indices = @transform_12, window_bounds = array<i64: 128, 64>}, {pipeline_mode = #tpu.pipeline_mode<synchronous>, transform_indices = @transform_13, window_bounds = array<i64: 1, 64>}, {pipeline_mode = #tpu.pipeline_mode<synchronous>, transform_indices = @transform_14, window_bounds = array<i64: 64, 10>}, {pipeline_mode = #tpu.pipeline_mode<synchronous>, transform_indices = @transform_15, window_bounds = array<i64: 1, 10>}, {pipeline_mode = #tpu.pipeline_mode<synchronous>, transform_indices = @transform_16, window_bounds = array<i64: 10, 128>}, {pipeline_mode = #tpu.pipeline_mode<synchronous>, transform_indices = @transform_17, window_bounds = array<i64: 1, 128>}, {transform_indices = @transform_18, window_bounds = array<i64: 8, 128>}]} {
    %cst = arith.constant 0.000000e+00 : f32
    %0 = vector.broadcast %cst : f32 to vector<8x128xf32>
    %c0 = arith.constant 0 : index
    %c0_0 = arith.constant 0 : index
    %c0_1 = arith.constant 0 : index
    %1 = vector.load %arg20[%c0, %c0_0, %c0_1] : memref<16x8x128xf32, #tpu.memory_space<vmem>>, vector<1x8x128xf32>
    %2 = vector.shape_cast %1 : vector<1x8x128xf32> to vector<8x128xf32>
    %3 = vector.shape_cast %0 : vector<8x128xf32> to vector<1x8x128xf32>
    tpu.vector_store %arg20[%c0, %c0_0, %c0_1], %3 {strides = array<i32>} : memref<16x8x128xf32, #tpu.memory_space<vmem>>, vector<1x8x128xf32>,
    %cst_2 = arith.constant 0.000000e+00 : f32
    %4 = vector.broadcast %cst_2 : f32 to vector<8x128xf32>
    %c15 = arith.constant 15 : index
    %c0_3 = arith.constant 0 : index
    %c0_4 = arith.constant 0 : index
    %5 = vector.load %arg20[%c15, %c0_3, %c0_4] : memref<16x8x128xf32, #tpu.memory_space<vmem>>, vector<1x8x128xf32>
    %6 = vector.shape_cast %5 : vector<1x8x128xf32> to vector<8x128xf32>
    %7 = vector.shape_cast %4 : vector<8x128xf32> to vector<1x8x128xf32>
    tpu.vector_store %arg20[%c15, %c0_3, %c0_4], %7 {strides = array<i32>} : memref<16x8x128xf32, #tpu.memory_space<vmem>>, vector<1x8x128xf32>,
    %cst_5 = arith.constant 0.000000e+00 : f32
    %8 = vector.broadcast %cst_5 : f32 to vector<224x128xf32>
    %c0_6 = arith.constant 0 : index
    %c0_7 = arith.constant 0 : index
    %c0_8 = arith.constant 0 : index
    %9 = vector.load %arg1[%c0_6, %c0_7, %c0_8] : memref<32x8x4xf32, #tpu.memory_space<vmem>>, vector<28x8x4xf32>
    %10 = vector.shape_cast %9 : vector<28x8x4xf32> to vector<224x4xf32>
    %11 = arith.truncf %10 : vector<224x4xf32> to vector<224x4xbf16>
    %c0_9 = arith.constant 0 : index
    %c0_10 = arith.constant 0 : index
    %c0_11 = arith.constant 0 : index
    %12 = vector.load %arg2[%c0_9, %c0_10, %c0_11] : memref<5x4x128xbf16, #tpu.memory_space<vmem>>, vector<1x4x128xbf16>
    %13 = vector.shape_cast %12 : vector<1x4x128xbf16> to vector<4x128xbf16>
    %cst_12 = arith.constant dense<0.000000e+00> : vector<224x128xf32>
    %14 = tpu.matmul %11, %13, %cst_12 {dimension_numbers = #tpu.dot_dimension_numbers<[1], [0], [0], [1], [0, 0, 1, 1], [], []>} : vector<224x4xbf16>, vector<4x128xbf16>, vector<224x128xf32> -> vector<224x128xf32>
    %15 = arith.addf %8, %14 : vector<224x128xf32>
    %c1 = arith.constant 1 : index
    %c0_13 = arith.constant 0 : index
    %c0_14 = arith.constant 0 : index
    %16 = vector.load %arg1[%c1, %c0_13, %c0_14] : memref<32x8x4xf32, #tpu.memory_space<vmem>>, vector<28x8x4xf32>
    %17 = vector.shape_cast %16 : vector<28x8x4xf32> to vector<224x4xf32>
    %18 = arith.truncf %17 : vector<224x4xf32> to vector<224x4xbf16>
    %c1_15 = arith.constant 1 : index
    %c0_16 = arith.constant 0 : index
    %c0_17 = arith.constant 0 : index
    %19 = vector.load %arg2[%c1_15, %c0_16, %c0_17] : memref<5x4x128xbf16, #tpu.memory_space<vmem>>, vector<1x4x128xbf16>
    %20 = vector.shape_cast %19 : vector<1x4x128xbf16> to vector<4x128xbf16>
    %cst_18 = arith.constant dense<0.000000e+00> : vector<224x128xf32>
    %21 = tpu.matmul %18, %20, %cst_18 {dimension_numbers = #tpu.dot_dimension_numbers<[1], [0], [0], [1], [0, 0, 1, 1], [], []>} : vector<224x4xbf16>, vector<4x128xbf16>, vector<224x128xf32> -> vector<224x128xf32>
    %22 = arith.addf %15, %21 : vector<224x128xf32>
    %c2 = arith.constant 2 : index
    %c0_19 = arith.constant 0 : index
    %c0_20 = arith.constant 0 : index
    %23 = vector.load %arg1[%c2, %c0_19, %c0_20] : memref<32x8x4xf32, #tpu.memory_space<vmem>>, vector<28x8x4xf32>
    %24 = vector.shape_cast %23 : vector<28x8x4xf32> to vector<224x4xf32>
    %25 = arith.truncf %24 : vector<224x4xf32> to vector<224x4xbf16>
    %c2_21 = arith.constant 2 : index
    %c0_22 = arith.constant 0 : index
    %c0_23 = arith.constant 0 : index
    %26 = vector.load %arg2[%c2_21, %c0_22, %c0_23] : memref<5x4x128xbf16, #tpu.memory_space<vmem>>, vector<1x4x128xbf16>
    %27 = vector.shape_cast %26 : vector<1x4x128xbf16> to vector<4x128xbf16>
    %cst_24 = arith.constant dense<0.000000e+00> : vector<224x128xf32>
    %28 = tpu.matmul %25, %27, %cst_24 {dimension_numbers = #tpu.dot_dimension_numbers<[1], [0], [0], [1], [0, 0, 1, 1], [], []>} : vector<224x4xbf16>, vector<4x128xbf16>, vector<224x128xf32> -> vector<224x128xf32>
    %29 = arith.addf %22, %28 : vector<224x128xf32>
    %c3 = arith.constant 3 : index
    %c0_25 = arith.constant 0 : index
    %c0_26 = arith.constant 0 : index
    %30 = vector.load %arg1[%c3, %c0_25, %c0_26] : memref<32x8x4xf32, #tpu.memory_space<vmem>>, vector<28x8x4xf32>
    %31 = vector.shape_cast %30 : vector<28x8x4xf32> to vector<224x4xf32>
    %32 = arith.truncf %31 : vector<224x4xf32> to vector<224x4xbf16>
    %c3_27 = arith.constant 3 : index
    %c0_28 = arith.constant 0 : index
    %c0_29 = arith.constant 0 : index
    %33 = vector.load %arg2[%c3_27, %c0_28, %c0_29] : memref<5x4x128xbf16, #tpu.memory_space<vmem>>, vector<1x4x128xbf16>
    %34 = vector.shape_cast %33 : vector<1x4x128xbf16> to vector<4x128xbf16>
    %cst_30 = arith.constant dense<0.000000e+00> : vector<224x128xf32>
    %35 = tpu.matmul %32, %34, %cst_30 {dimension_numbers = #tpu.dot_dimension_numbers<[1], [0], [0], [1], [0, 0, 1, 1], [], []>} : vector<224x4xbf16>, vector<4x128xbf16>, vector<224x128xf32> -> vector<224x128xf32>
    %36 = arith.addf %29, %35 : vector<224x128xf32>
    %c4 = arith.constant 4 : index
    %c0_31 = arith.constant 0 : index
    %c0_32 = arith.constant 0 : index
    %37 = vector.load %arg1[%c4, %c0_31, %c0_32] : memref<32x8x4xf32, #tpu.memory_space<vmem>>, vector<28x8x4xf32>
    %38 = vector.shape_cast %37 : vector<28x8x4xf32> to vector<224x4xf32>
    %39 = arith.truncf %38 : vector<224x4xf32> to vector<224x4xbf16>
    %c4_33 = arith.constant 4 : index
    %c0_34 = arith.constant 0 : index
    %c0_35 = arith.constant 0 : index
    %40 = vector.load %arg2[%c4_33, %c0_34, %c0_35] : memref<5x4x128xbf16, #tpu.memory_space<vmem>>, vector<1x4x128xbf16>
    %41 = vector.shape_cast %40 : vector<1x4x128xbf16> to vector<4x128xbf16>
    %cst_36 = arith.constant dense<0.000000e+00> : vector<224x128xf32>
    %42 = tpu.matmul %39, %41, %cst_36 {dimension_numbers = #tpu.dot_dimension_numbers<[1], [0], [0], [1], [0, 0, 1, 1], [], []>} : vector<224x4xbf16>, vector<4x128xbf16>, vector<224x128xf32> -> vector<224x128xf32>
    %43 = arith.addf %36, %42 : vector<224x128xf32>
    %c0_37 = arith.constant 0 : index
    %c0_38 = arith.constant 0 : index
    %44 = vector.load %arg3[%c0_37, %c0_38] : memref<1x128xf32, #tpu.memory_space<vmem>>, vector<1x128xf32>
    %45 = vector.broadcast %44 : vector<1x128xf32> to vector<224x128xf32>
    %46 = arith.addf %43, %45 : vector<224x128xf32>
    %cst_39 = arith.constant 0.000000e+00 : f32
    %47 = vector.broadcast %cst_39 : f32 to vector<224x128xf32>
    %48 = arith.maximumf %46, %47 : vector<224x128xf32>
    %49 = vector.shape_cast %48 : vector<224x128xf32> to vector<14x16x128xf32>
    %50 = vector.extract_strided_slice %49 {offsets = [0, 0, 0], sizes = [14, 8, 128], strides = [1, 1, 1]} : vector<14x16x128xf32> to vector<14x8x128xf32>
    %51 = vector.extract_strided_slice %49 {offsets = [0, 8, 0], sizes = [14, 8, 128], strides = [1, 1, 1]} : vector<14x16x128xf32> to vector<14x8x128xf32>
    %52 = arith.maximumf %50, %51 : vector<14x8x128xf32>
    %c1_40 = arith.constant 1 : index
    %c0_41 = arith.constant 0 : index
    %c0_42 = arith.constant 0 : index
    %53 = vector.load %arg20[%c1_40, %c0_41, %c0_42] : memref<16x8x128xf32, #tpu.memory_space<vmem>>, vector<14x8x128xf32>
    tpu.vector_store %arg20[%c1_40, %c0_41, %c0_42], %52 {strides = array<i32>} : memref<16x8x128xf32, #tpu.memory_space<vmem>>, vector<14x8x128xf32>,
    %cst_43 = arith.constant 0.000000e+00 : f32
    %54 = vector.broadcast %cst_43 : f32 to vector<112x128xf32>
    %c0_44 = arith.constant 0 : index
    %c0_45 = arith.constant 0 : index
    %c0_46 = arith.constant 0 : index
    %55 = vector.load %arg20[%c0_44, %c0_45, %c0_46] : memref<16x8x128xf32, #tpu.memory_space<vmem>>, vector<14x8x128xf32>
    %56 = vector.shape_cast %55 : vector<14x8x128xf32> to vector<112x128xf32>
    %57 = arith.truncf %56 : vector<112x128xf32> to vector<112x128xbf16>
    %c0_47 = arith.constant 0 : index
    %c0_48 = arith.constant 0 : index
    %c0_49 = arith.constant 0 : index
    %58 = vector.load %arg4[%c0_47, %c0_48, %c0_49] : memref<3x128x128xbf16, #tpu.memory_space<vmem>>, vector<1x128x128xbf16>
    %59 = vector.shape_cast %58 : vector<1x128x128xbf16> to vector<128x128xbf16>
    %cst_50 = arith.constant dense<0.000000e+00> : vector<112x128xf32>
    %60 = tpu.matmul %57, %59, %cst_50 {dimension_numbers = #tpu.dot_dimension_numbers<[1], [0], [0], [1], [0, 0, 1, 1], [], []>} : vector<112x128xbf16>, vector<128x128xbf16>, vector<112x128xf32> -> vector<112x128xf32>
    %61 = arith.addf %54, %60 : vector<112x128xf32>
    %c1_51 = arith.constant 1 : index
    %c0_52 = arith.constant 0 : index
    %c0_53 = arith.constant 0 : index
    %62 = vector.load %arg20[%c1_51, %c0_52, %c0_53] : memref<16x8x128xf32, #tpu.memory_space<vmem>>, vector<14x8x128xf32>
    %63 = vector.shape_cast %62 : vector<14x8x128xf32> to vector<112x128xf32>
    %64 = arith.truncf %63 : vector<112x128xf32> to vector<112x128xbf16>
    %c1_54 = arith.constant 1 : index
    %c0_55 = arith.constant 0 : index
    %c0_56 = arith.constant 0 : index
    %65 = vector.load %arg4[%c1_54, %c0_55, %c0_56] : memref<3x128x128xbf16, #tpu.memory_space<vmem>>, vector<1x128x128xbf16>
    %66 = vector.shape_cast %65 : vector<1x128x128xbf16> to vector<128x128xbf16>
    %cst_57 = arith.constant dense<0.000000e+00> : vector<112x128xf32>
    %67 = tpu.matmul %64, %66, %cst_57 {dimension_numbers = #tpu.dot_dimension_numbers<[1], [0], [0], [1], [0, 0, 1, 1], [], []>} : vector<112x128xbf16>, vector<128x128xbf16>, vector<112x128xf32> -> vector<112x128xf32>
    %68 = arith.addf %61, %67 : vector<112x128xf32>
    %c2_58 = arith.constant 2 : index
    %c0_59 = arith.constant 0 : index
    %c0_60 = arith.constant 0 : index
    %69 = vector.load %arg20[%c2_58, %c0_59, %c0_60] : memref<16x8x128xf32, #tpu.memory_space<vmem>>, vector<14x8x128xf32>
    %70 = vector.shape_cast %69 : vector<14x8x128xf32> to vector<112x128xf32>
    %71 = arith.truncf %70 : vector<112x128xf32> to vector<112x128xbf16>
    %c2_61 = arith.constant 2 : index
    %c0_62 = arith.constant 0 : index
    %c0_63 = arith.constant 0 : index
    %72 = vector.load %arg4[%c2_61, %c0_62, %c0_63] : memref<3x128x128xbf16, #tpu.memory_space<vmem>>, vector<1x128x128xbf16>
    %73 = vector.shape_cast %72 : vector<1x128x128xbf16> to vector<128x128xbf16>
    %cst_64 = arith.constant dense<0.000000e+00> : vector<112x128xf32>
    %74 = tpu.matmul %71, %73, %cst_64 {dimension_numbers = #tpu.dot_dimension_numbers<[1], [0], [0], [1], [0, 0, 1, 1], [], []>} : vector<112x128xbf16>, vector<128x128xbf16>, vector<112x128xf32> -> vector<112x128xf32>
    %75 = arith.addf %68, %74 : vector<112x128xf32>
    %c0_65 = arith.constant 0 : index
    %c0_66 = arith.constant 0 : index
    %76 = vector.load %arg5[%c0_65, %c0_66] : memref<1x128xf32, #tpu.memory_space<vmem>>, vector<1x128xf32>
    %77 = vector.broadcast %76 : vector<1x128xf32> to vector<112x128xf32>
    %78 = arith.addf %75, %77 : vector<112x128xf32>
    %cst_67 = arith.constant 0.000000e+00 : f32
    %79 = vector.broadcast %cst_67 : f32 to vector<112x128xf32>
    %80 = arith.maximumf %78, %79 : vector<112x128xf32>
    %81 = vector.shape_cast %80 : vector<112x128xf32> to vector<7x16x128xf32>
    %82 = vector.extract_strided_slice %81 {offsets = [0, 0, 0], sizes = [7, 8, 128], strides = [1, 1, 1]} : vector<7x16x128xf32> to vector<7x8x128xf32>
    %83 = vector.extract_strided_slice %81 {offsets = [0, 8, 0], sizes = [7, 8, 128], strides = [1, 1, 1]} : vector<7x16x128xf32> to vector<7x8x128xf32>
    %84 = arith.maximumf %82, %83 : vector<7x8x128xf32>
    %c0_68 = arith.constant 0 : index
    %c0_69 = arith.constant 0 : index
    %c0_70 = arith.constant 0 : index
    %85 = vector.load %arg21[%c0_68, %c0_69, %c0_70] : memref<7x8x128xf32, #tpu.memory_space<vmem>>, vector<7x8x128xf32>
    tpu.vector_store %arg21[%c0_68, %c0_69, %c0_70], %84 {strides = array<i32>} : memref<7x8x128xf32, #tpu.memory_space<vmem>>, vector<7x8x128xf32>,
    %cst_71 = arith.constant 0.000000e+00 : f32
    %86 = vector.broadcast %cst_71 : f32 to vector<32x256xf32>
    %c0_72 = arith.constant 0 : index
    %c0_73 = arith.constant 0 : index
    %c0_74 = arith.constant 0 : index
    %87 = vector.load %arg21[%c0_72, %c0_73, %c0_74] : memref<7x8x128xf32, #tpu.memory_space<vmem>>, vector<4x8x128xf32>
    %88 = vector.shape_cast %87 : vector<4x8x128xf32> to vector<32x128xf32>
    %89 = arith.truncf %88 : vector<32x128xf32> to vector<32x128xbf16>
    %c0_75 = arith.constant 0 : index
    %c0_76 = arith.constant 0 : index
    %c0_77 = arith.constant 0 : index
    %90 = vector.load %arg6[%c0_75, %c0_76, %c0_77] : memref<3x128x256xbf16, #tpu.memory_space<vmem>>, vector<1x128x256xbf16>
    %91 = vector.shape_cast %90 : vector<1x128x256xbf16> to vector<128x256xbf16>
    %cst_78 = arith.constant dense<0.000000e+00> : vector<32x256xf32>
    %92 = tpu.matmul %89, %91, %cst_78 {dimension_numbers = #tpu.dot_dimension_numbers<[1], [0], [0], [1], [0, 0, 1, 1], [], []>} : vector<32x128xbf16>, vector<128x256xbf16>, vector<32x256xf32> -> vector<32x256xf32>
    %93 = arith.addf %86, %92 : vector<32x256xf32>
    %c1_79 = arith.constant 1 : index
    %c0_80 = arith.constant 0 : index
    %c0_81 = arith.constant 0 : index
    %94 = vector.load %arg21[%c1_79, %c0_80, %c0_81] : memref<7x8x128xf32, #tpu.memory_space<vmem>>, vector<4x8x128xf32>
    %95 = vector.shape_cast %94 : vector<4x8x128xf32> to vector<32x128xf32>
    %96 = arith.truncf %95 : vector<32x128xf32> to vector<32x128xbf16>
    %c1_82 = arith.constant 1 : index
    %c0_83 = arith.constant 0 : index
    %c0_84 = arith.constant 0 : index
    %97 = vector.load %arg6[%c1_82, %c0_83, %c0_84] : memref<3x128x256xbf16, #tpu.memory_space<vmem>>, vector<1x128x256xbf16>
    %98 = vector.shape_cast %97 : vector<1x128x256xbf16> to vector<128x256xbf16>
    %cst_85 = arith.constant dense<0.000000e+00> : vector<32x256xf32>
    %99 = tpu.matmul %96, %98, %cst_85 {dimension_numbers = #tpu.dot_dimension_numbers<[1], [0], [0], [1], [0, 0, 1, 1], [], []>} : vector<32x128xbf16>, vector<128x256xbf16>, vector<32x256xf32> -> vector<32x256xf32>
    %100 = arith.addf %93, %99 : vector<32x256xf32>
    %c2_86 = arith.constant 2 : index
    %c0_87 = arith.constant 0 : index
    %c0_88 = arith.constant 0 : index
    %101 = vector.load %arg21[%c2_86, %c0_87, %c0_88] : memref<7x8x128xf32, #tpu.memory_space<vmem>>, vector<4x8x128xf32>
    %102 = vector.shape_cast %101 : vector<4x8x128xf32> to vector<32x128xf32>
    %103 = arith.truncf %102 : vector<32x128xf32> to vector<32x128xbf16>
    %c2_89 = arith.constant 2 : index
    %c0_90 = arith.constant 0 : index
    %c0_91 = arith.constant 0 : index
    %104 = vector.load %arg6[%c2_89, %c0_90, %c0_91] : memref<3x128x256xbf16, #tpu.memory_space<vmem>>, vector<1x128x256xbf16>
    %105 = vector.shape_cast %104 : vector<1x128x256xbf16> to vector<128x256xbf16>
    %cst_92 = arith.constant dense<0.000000e+00> : vector<32x256xf32>
    %106 = tpu.matmul %103, %105, %cst_92 {dimension_numbers = #tpu.dot_dimension_numbers<[1], [0], [0], [1], [0, 0, 1, 1], [], []>} : vector<32x128xbf16>, vector<128x256xbf16>, vector<32x256xf32> -> vector<32x256xf32>
    %107 = arith.addf %100, %106 : vector<32x256xf32>
    %c0_93 = arith.constant 0 : index
    %c0_94 = arith.constant 0 : index
    %108 = vector.load %arg7[%c0_93, %c0_94] : memref<1x256xf32, #tpu.memory_space<vmem>>, vector<1x256xf32>
    %109 = vector.broadcast %108 : vector<1x256xf32> to vector<32x256xf32>
    %110 = arith.addf %107, %109 : vector<32x256xf32>
    %cst_95 = arith.constant 0.000000e+00 : f32
    %111 = vector.broadcast %cst_95 : f32 to vector<32x256xf32>
    %112 = arith.maximumf %110, %111 : vector<32x256xf32>
    %113 = vector.shape_cast %112 : vector<32x256xf32> to vector<2x16x256xf32>
    %114 = vector.extract_strided_slice %113 {offsets = [0, 0, 0], sizes = [2, 8, 256], strides = [1, 1, 1]} : vector<2x16x256xf32> to vector<2x8x256xf32>
    %115 = vector.extract_strided_slice %113 {offsets = [0, 8, 0], sizes = [2, 8, 256], strides = [1, 1, 1]} : vector<2x16x256xf32> to vector<2x8x256xf32>
    %116 = arith.maximumf %114, %115 : vector<2x8x256xf32>
    %c0_96 = arith.constant 0 : index
    %c0_97 = arith.constant 0 : index
    %c0_98 = arith.constant 0 : index
    %117 = vector.load %arg22[%c0_96, %c0_97, %c0_98] : memref<2x8x256xf32, #tpu.memory_space<vmem>>, vector<2x8x256xf32>
    tpu.vector_store %arg22[%c0_96, %c0_97, %c0_98], %116 {strides = array<i32>} : memref<2x8x256xf32, #tpu.memory_space<vmem>>, vector<2x8x256xf32>,
    %c0_99 = arith.constant 0 : index
    %c0_100 = arith.constant 0 : index
    %c0_101 = arith.constant 0 : index
    %118 = vector.load %arg22[%c0_99, %c0_100, %c0_101] : memref<2x8x256xf32, #tpu.memory_space<vmem>>, vector<2x8x256xf32>
    %119 = vector.shape_cast %118 : vector<2x8x256xf32> to vector<16x256xf32>
    %120 = arith.truncf %119 : vector<16x256xf32> to vector<16x256xbf16>
    %c0_102 = arith.constant 0 : index
    %c0_103 = arith.constant 0 : index
    %121 = vector.load %arg8[%c0_102, %c0_103] : memref<256x512xbf16, #tpu.memory_space<vmem>>, vector<256x512xbf16>
    %cst_104 = arith.constant dense<0.000000e+00> : vector<16x512xf32>
    %122 = tpu.matmul %120, %121, %cst_104 {dimension_numbers = #tpu.dot_dimension_numbers<[1], [0], [0], [1], [0, 0, 1, 1], [], []>} : vector<16x256xbf16>, vector<256x512xbf16>, vector<16x512xf32> -> vector<16x512xf32>
    %c0_105 = arith.constant 0 : index
    %c0_106 = arith.constant 0 : index
    %123 = vector.load %arg10[%c0_105, %c0_106] : memref<1x512xf32, #tpu.memory_space<vmem>>, vector<1x512xf32>
    %124 = vector.broadcast %123 : vector<1x512xf32> to vector<16x512xf32>
    %125 = arith.addf %122, %124 : vector<16x512xf32>
    %126 = vector.shape_cast %125 : vector<16x512xf32> to vector<2x8x512xf32>
    %c0_107 = arith.constant 0 : index
    %c0_108 = arith.constant 0 : index
    %c0_109 = arith.constant 0 : index
    %127 = vector.load %arg23[%c0_107, %c0_108, %c0_109] : memref<2x8x512xf32, #tpu.memory_space<vmem>>, vector<2x8x512xf32>
    tpu.vector_store %arg23[%c0_107, %c0_108, %c0_109], %126 {strides = array<i32>} : memref<2x8x512xf32, #tpu.memory_space<vmem>>, vector<2x8x512xf32>,
    %c0_110 = arith.constant 0 : index
    %c0_111 = arith.constant 0 : index
    %128 = vector.load %arg9[%c0_110, %c0_111] : memref<128x512xbf16, #tpu.memory_space<vmem>>, vector<128x512xbf16>
    %c0_112 = arith.constant 0 : index
    %c0_113 = arith.constant 0 : index
    %129 = vector.load %arg11[%c0_112, %c0_113] : memref<256x512xbf16, #tpu.memory_space<vmem>>, vector<256x512xbf16>
    %c0_114 = arith.constant 0 : index
    %c0_115 = arith.constant 0 : index
    %130 = vector.load %arg12[%c0_114, %c0_115] : memref<1x512xf32, #tpu.memory_space<vmem>>, vector<1x512xf32>
    %131 = vector.shape_cast %130 : vector<1x512xf32> to vector<1x512xf32>
    %132 = vector.broadcast %131 : vector<1x512xf32> to vector<8x512xf32>
    %cst_116 = arith.constant 0.000000e+00 : f32
    %133 = vector.broadcast %cst_116 : f32 to vector<8x128xf32>
    %cst_117 = arith.constant 0.000000e+00 : f32
    %134 = vector.broadcast %cst_117 : f32 to vector<8x128xf32>
    %cst_118 = arith.constant 0.000000e+00 : f32
    %135 = vector.broadcast %cst_118 : f32 to vector<8x128xf32>
    %cst_119 = arith.constant 0.000000e+00 : f32
    %136 = vector.broadcast %cst_119 : f32 to vector<8x128xf32>
    %c0_120 = arith.constant 0 : index
    %c0_121 = arith.constant 0 : index
    %c0_122 = arith.constant 0 : index
    %137 = vector.load %arg23[%c0_120, %c0_121, %c0_122] : memref<2x8x512xf32, #tpu.memory_space<vmem>>, vector<1x8x512xf32>
    %138 = vector.shape_cast %137 : vector<1x8x512xf32> to vector<8x512xf32>
    %139 = arith.truncf %133 : vector<8x128xf32> to vector<8x128xbf16>
    %cst_123 = arith.constant dense<0.000000e+00> : vector<8x512xf32>
    %140 = tpu.matmul %139, %128, %cst_123 {dimension_numbers = #tpu.dot_dimension_numbers<[1], [0], [0], [1], [0, 0, 1, 1], [], []>} : vector<8x128xbf16>, vector<128x512xbf16>, vector<8x512xf32> -> vector<8x512xf32>
    %141 = arith.addf %138, %140 : vector<8x512xf32>
    %142 = vector.extract_strided_slice %141 {offsets = [0, 0], sizes = [8, 128], strides = [1, 1]} : vector<8x512xf32> to vector<8x128xf32>
    %cst_124 = arith.constant 0.000000e+00 : f32
    %143 = vector.broadcast %cst_124 : f32 to vector<8x128xf32>
    %144 = arith.subf %143, %142 : vector<8x128xf32>
    %145 = math.exp %144 : vector<8x128xf32>
    %cst_125 = arith.constant 1.000000e+00 : f32
    %146 = vector.broadcast %cst_125 : f32 to vector<8x128xf32>
    %147 = arith.addf %146, %145 : vector<8x128xf32>
    %cst_126 = arith.constant 1.000000e+00 : f32
    %148 = vector.broadcast %cst_126 : f32 to vector<8x128xf32>
    %149 = arith.divf %148, %147 : vector<8x128xf32>
    %150 = vector.extract_strided_slice %141 {offsets = [0, 128], sizes = [8, 128], strides = [1, 1]} : vector<8x512xf32> to vector<8x128xf32>
    %cst_127 = arith.constant 0.000000e+00 : f32
    %151 = vector.broadcast %cst_127 : f32 to vector<8x128xf32>
    %152 = arith.subf %151, %150 : vector<8x128xf32>
    %153 = math.exp %152 : vector<8x128xf32>
    %cst_128 = arith.constant 1.000000e+00 : f32
    %154 = vector.broadcast %cst_128 : f32 to vector<8x128xf32>
    %155 = arith.addf %154, %153 : vector<8x128xf32>
    %cst_129 = arith.constant 1.000000e+00 : f32
    %156 = vector.broadcast %cst_129 : f32 to vector<8x128xf32>
    %157 = arith.divf %156, %155 : vector<8x128xf32>
    %158 = vector.extract_strided_slice %141 {offsets = [0, 256], sizes = [8, 128], strides = [1, 1]} : vector<8x512xf32> to vector<8x128xf32>
    %159 = math.tanh %158 : vector<8x128xf32>
    %160 = vector.extract_strided_slice %141 {offsets = [0, 384], sizes = [8, 128], strides = [1, 1]} : vector<8x512xf32> to vector<8x128xf32>
    %cst_130 = arith.constant 0.000000e+00 : f32
    %161 = vector.broadcast %cst_130 : f32 to vector<8x128xf32>
    %162 = arith.subf %161, %160 : vector<8x128xf32>
    %163 = math.exp %162 : vector<8x128xf32>
    %cst_131 = arith.constant 1.000000e+00 : f32
    %164 = vector.broadcast %cst_131 : f32 to vector<8x128xf32>
    %165 = arith.addf %164, %163 : vector<8x128xf32>
    %cst_132 = arith.constant 1.000000e+00 : f32
    %166 = vector.broadcast %cst_132 : f32 to vector<8x128xf32>
    %167 = arith.divf %166, %165 : vector<8x128xf32>
    %168 = arith.mulf %157, %134 : vector<8x128xf32>
    %169 = arith.mulf %149, %159 : vector<8x128xf32>
    %170 = arith.addf %168, %169 : vector<8x128xf32>
    %171 = math.tanh %170 : vector<8x128xf32>
    %172 = arith.mulf %167, %171 : vector<8x128xf32>
    %173 = tpu.concatenate %172, %135 in 1 : vector<8x128xf32>, vector<8x128xf32> -> vector<8x256xf32>
    %174 = arith.truncf %173 : vector<8x256xf32> to vector<8x256xbf16>
    %cst_133 = arith.constant dense<0.000000e+00> : vector<8x512xf32>
    %175 = tpu.matmul %174, %129, %cst_133 {dimension_numbers = #tpu.dot_dimension_numbers<[1], [0], [0], [1], [0, 0, 1, 1], [], []>} : vector<8x256xbf16>, vector<256x512xbf16>, vector<8x512xf32> -> vector<8x512xf32>
    %176 = arith.addf %132, %175 : vector<8x512xf32>
    %177 = vector.extract_strided_slice %176 {offsets = [0, 0], sizes = [8, 128], strides = [1, 1]} : vector<8x512xf32> to vector<8x128xf32>
    %cst_134 = arith.constant 0.000000e+00 : f32
    %178 = vector.broadcast %cst_134 : f32 to vector<8x128xf32>
    %179 = arith.subf %178, %177 : vector<8x128xf32>
    %180 = math.exp %179 : vector<8x128xf32>
    %cst_135 = arith.constant 1.000000e+00 : f32
    %181 = vector.broadcast %cst_135 : f32 to vector<8x128xf32>
    %182 = arith.addf %181, %180 : vector<8x128xf32>
    %cst_136 = arith.constant 1.000000e+00 : f32
    %183 = vector.broadcast %cst_136 : f32 to vector<8x128xf32>
    %184 = arith.divf %183, %182 : vector<8x128xf32>
    %185 = vector.extract_strided_slice %176 {offsets = [0, 128], sizes = [8, 128], strides = [1, 1]} : vector<8x512xf32> to vector<8x128xf32>
    %cst_137 = arith.constant 0.000000e+00 : f32
    %186 = vector.broadcast %cst_137 : f32 to vector<8x128xf32>
    %187 = arith.subf %186, %185 : vector<8x128xf32>
    %188 = math.exp %187 : vector<8x128xf32>
    %cst_138 = arith.constant 1.000000e+00 : f32
    %189 = vector.broadcast %cst_138 : f32 to vector<8x128xf32>
    %190 = arith.addf %189, %188 : vector<8x128xf32>
    %cst_139 = arith.constant 1.000000e+00 : f32
    %191 = vector.broadcast %cst_139 : f32 to vector<8x128xf32>
    %192 = arith.divf %191, %190 : vector<8x128xf32>
    %193 = vector.extract_strided_slice %176 {offsets = [0, 256], sizes = [8, 128], strides = [1, 1]} : vector<8x512xf32> to vector<8x128xf32>
    %194 = math.tanh %193 : vector<8x128xf32>
    %195 = vector.extract_strided_slice %176 {offsets = [0, 384], sizes = [8, 128], strides = [1, 1]} : vector<8x512xf32> to vector<8x128xf32>
    %cst_140 = arith.constant 0.000000e+00 : f32
    %196 = vector.broadcast %cst_140 : f32 to vector<8x128xf32>
    %197 = arith.subf %196, %195 : vector<8x128xf32>
    %198 = math.exp %197 : vector<8x128xf32>
    %cst_141 = arith.constant 1.000000e+00 : f32
    %199 = vector.broadcast %cst_141 : f32 to vector<8x128xf32>
    %200 = arith.addf %199, %198 : vector<8x128xf32>
    %cst_142 = arith.constant 1.000000e+00 : f32
    %201 = vector.broadcast %cst_142 : f32 to vector<8x128xf32>
    %202 = arith.divf %201, %200 : vector<8x128xf32>
    %203 = arith.mulf %192, %136 : vector<8x128xf32>
    %204 = arith.mulf %184, %194 : vector<8x128xf32>
    %205 = arith.addf %203, %204 : vector<8x128xf32>
    %206 = math.tanh %205 : vector<8x128xf32>
    %207 = arith.mulf %202, %206 : vector<8x128xf32>
    %c1_143 = arith.constant 1 : index
    %c0_144 = arith.constant 0 : index
    %c0_145 = arith.constant 0 : index
    %208 = vector.load %arg23[%c1_143, %c0_144, %c0_145] : memref<2x8x512xf32, #tpu.memory_space<vmem>>, vector<1x8x512xf32>
    %209 = vector.shape_cast %208 : vector<1x8x512xf32> to vector<8x512xf32>
    %210 = arith.truncf %172 : vector<8x128xf32> to vector<8x128xbf16>
    %cst_146 = arith.constant dense<0.000000e+00> : vector<8x512xf32>
    %211 = tpu.matmul %210, %128, %cst_146 {dimension_numbers = #tpu.dot_dimension_numbers<[1], [0], [0], [1], [0, 0, 1, 1], [], []>} : vector<8x128xbf16>, vector<128x512xbf16>, vector<8x512xf32> -> vector<8x512xf32>
    %212 = arith.addf %209, %211 : vector<8x512xf32>
    %213 = vector.extract_strided_slice %212 {offsets = [0, 0], sizes = [8, 128], strides = [1, 1]} : vector<8x512xf32> to vector<8x128xf32>
    %cst_147 = arith.constant 0.000000e+00 : f32
    %214 = vector.broadcast %cst_147 : f32 to vector<8x128xf32>
    %215 = arith.subf %214, %213 : vector<8x128xf32>
    %216 = math.exp %215 : vector<8x128xf32>
    %cst_148 = arith.constant 1.000000e+00 : f32
    %217 = vector.broadcast %cst_148 : f32 to vector<8x128xf32>
    %218 = arith.addf %217, %216 : vector<8x128xf32>
    %cst_149 = arith.constant 1.000000e+00 : f32
    %219 = vector.broadcast %cst_149 : f32 to vector<8x128xf32>
    %220 = arith.divf %219, %218 : vector<8x128xf32>
    %221 = vector.extract_strided_slice %212 {offsets = [0, 128], sizes = [8, 128], strides = [1, 1]} : vector<8x512xf32> to vector<8x128xf32>
    %cst_150 = arith.constant 0.000000e+00 : f32
    %222 = vector.broadcast %cst_150 : f32 to vector<8x128xf32>
    %223 = arith.subf %222, %221 : vector<8x128xf32>
    %224 = math.exp %223 : vector<8x128xf32>
    %cst_151 = arith.constant 1.000000e+00 : f32
    %225 = vector.broadcast %cst_151 : f32 to vector<8x128xf32>
    %226 = arith.addf %225, %224 : vector<8x128xf32>
    %cst_152 = arith.constant 1.000000e+00 : f32
    %227 = vector.broadcast %cst_152 : f32 to vector<8x128xf32>
    %228 = arith.divf %227, %226 : vector<8x128xf32>
    %229 = vector.extract_strided_slice %212 {offsets = [0, 256], sizes = [8, 128], strides = [1, 1]} : vector<8x512xf32> to vector<8x128xf32>
    %230 = math.tanh %229 : vector<8x128xf32>
    %231 = vector.extract_strided_slice %212 {offsets = [0, 384], sizes = [8, 128], strides = [1, 1]} : vector<8x512xf32> to vector<8x128xf32>
    %cst_153 = arith.constant 0.000000e+00 : f32
    %232 = vector.broadcast %cst_153 : f32 to vector<8x128xf32>
    %233 = arith.subf %232, %231 : vector<8x128xf32>
    %234 = math.exp %233 : vector<8x128xf32>
    %cst_154 = arith.constant 1.000000e+00 : f32
    %235 = vector.broadcast %cst_154 : f32 to vector<8x128xf32>
    %236 = arith.addf %235, %234 : vector<8x128xf32>
    %cst_155 = arith.constant 1.000000e+00 : f32
    %237 = vector.broadcast %cst_155 : f32 to vector<8x128xf32>
    %238 = arith.divf %237, %236 : vector<8x128xf32>
    %239 = arith.mulf %228, %170 : vector<8x128xf32>
    %240 = arith.mulf %220, %230 : vector<8x128xf32>
    %241 = arith.addf %239, %240 : vector<8x128xf32>
    %242 = math.tanh %241 : vector<8x128xf32>
    %243 = arith.mulf %238, %242 : vector<8x128xf32>
    %244 = tpu.concatenate %243, %207 in 1 : vector<8x128xf32>, vector<8x128xf32> -> vector<8x256xf32>
    %245 = arith.truncf %244 : vector<8x256xf32> to vector<8x256xbf16>
    %cst_156 = arith.constant dense<0.000000e+00> : vector<8x512xf32>
    %246 = tpu.matmul %245, %129, %cst_156 {dimension_numbers = #tpu.dot_dimension_numbers<[1], [0], [0], [1], [0, 0, 1, 1], [], []>} : vector<8x256xbf16>, vector<256x512xbf16>, vector<8x512xf32> -> vector<8x512xf32>
    %247 = arith.addf %132, %246 : vector<8x512xf32>
    %248 = vector.extract_strided_slice %247 {offsets = [0, 0], sizes = [8, 128], strides = [1, 1]} : vector<8x512xf32> to vector<8x128xf32>
    %cst_157 = arith.constant 0.000000e+00 : f32
    %249 = vector.broadcast %cst_157 : f32 to vector<8x128xf32>
    %250 = arith.subf %249, %248 : vector<8x128xf32>
    %251 = math.exp %250 : vector<8x128xf32>
    %cst_158 = arith.constant 1.000000e+00 : f32
    %252 = vector.broadcast %cst_158 : f32 to vector<8x128xf32>
    %253 = arith.addf %252, %251 : vector<8x128xf32>
    %cst_159 = arith.constant 1.000000e+00 : f32
    %254 = vector.broadcast %cst_159 : f32 to vector<8x128xf32>
    %255 = arith.divf %254, %253 : vector<8x128xf32>
    %256 = vector.extract_strided_slice %247 {offsets = [0, 128], sizes = [8, 128], strides = [1, 1]} : vector<8x512xf32> to vector<8x128xf32>
    %cst_160 = arith.constant 0.000000e+00 : f32
    %257 = vector.broadcast %cst_160 : f32 to vector<8x128xf32>
    %258 = arith.subf %257, %256 : vector<8x128xf32>
    %259 = math.exp %258 : vector<8x128xf32>
    %cst_161 = arith.constant 1.000000e+00 : f32
    %260 = vector.broadcast %cst_161 : f32 to vector<8x128xf32>
    %261 = arith.addf %260, %259 : vector<8x128xf32>
    %cst_162 = arith.constant 1.000000e+00 : f32
    %262 = vector.broadcast %cst_162 : f32 to vector<8x128xf32>
    %263 = arith.divf %262, %261 : vector<8x128xf32>
    %264 = vector.extract_strided_slice %247 {offsets = [0, 256], sizes = [8, 128], strides = [1, 1]} : vector<8x512xf32> to vector<8x128xf32>
    %265 = math.tanh %264 : vector<8x128xf32>
    %266 = vector.extract_strided_slice %247 {offsets = [0, 384], sizes = [8, 128], strides = [1, 1]} : vector<8x512xf32> to vector<8x128xf32>
    %cst_163 = arith.constant 0.000000e+00 : f32
    %267 = vector.broadcast %cst_163 : f32 to vector<8x128xf32>
    %268 = arith.subf %267, %266 : vector<8x128xf32>
    %269 = math.exp %268 : vector<8x128xf32>
    %cst_164 = arith.constant 1.000000e+00 : f32
    %270 = vector.broadcast %cst_164 : f32 to vector<8x128xf32>
    %271 = arith.addf %270, %269 : vector<8x128xf32>
    %cst_165 = arith.constant 1.000000e+00 : f32
    %272 = vector.broadcast %cst_165 : f32 to vector<8x128xf32>
    %273 = arith.divf %272, %271 : vector<8x128xf32>
    %274 = arith.mulf %263, %205 : vector<8x128xf32>
    %275 = arith.mulf %255, %265 : vector<8x128xf32>
    %276 = arith.addf %274, %275 : vector<8x128xf32>
    %277 = math.tanh %276 : vector<8x128xf32>
    %278 = arith.mulf %273, %277 : vector<8x128xf32>
    %279 = arith.truncf %278 : vector<8x128xf32> to vector<8x128xbf16>
    %c0_166 = arith.constant 0 : index
    %c0_167 = arith.constant 0 : index
    %280 = vector.load %arg13[%c0_166, %c0_167] : memref<128x64xbf16, #tpu.memory_space<vmem>>, vector<128x64xbf16>
    %cst_168 = arith.constant dense<0.000000e+00> : vector<8x64xf32>
    %281 = tpu.matmul %279, %280, %cst_168 {dimension_numbers = #tpu.dot_dimension_numbers<[1], [0], [0], [1], [0, 0, 1, 1], [], []>} : vector<8x128xbf16>, vector<128x64xbf16>, vector<8x64xf32> -> vector<8x64xf32>
    %c0_169 = arith.constant 0 : index
    %c0_170 = arith.constant 0 : index
    %282 = vector.load %arg14[%c0_169, %c0_170] : memref<1x64xf32, #tpu.memory_space<vmem>>, vector<1x64xf32>
    %283 = vector.broadcast %282 : vector<1x64xf32> to vector<8x64xf32>
    %284 = arith.addf %281, %283 : vector<8x64xf32>
    %cst_171 = arith.constant 0.000000e+00 : f32
    %285 = vector.broadcast %cst_171 : f32 to vector<8x64xf32>
    %286 = arith.maximumf %284, %285 : vector<8x64xf32>
    %287 = arith.truncf %286 : vector<8x64xf32> to vector<8x64xbf16>
    %c0_172 = arith.constant 0 : index
    %c0_173 = arith.constant 0 : index
    %288 = vector.load %arg15[%c0_172, %c0_173] : memref<64x10xbf16, #tpu.memory_space<vmem>>, vector<64x10xbf16>
    %cst_174 = arith.constant dense<0.000000e+00> : vector<8x10xf32>
    %289 = tpu.matmul %287, %288, %cst_174 {dimension_numbers = #tpu.dot_dimension_numbers<[1], [0], [0], [1], [0, 0, 1, 1], [], []>} : vector<8x64xbf16>, vector<64x10xbf16>, vector<8x10xf32> -> vector<8x10xf32>
    %c0_175 = arith.constant 0 : index
    %c0_176 = arith.constant 0 : index
    %290 = vector.load %arg16[%c0_175, %c0_176] : memref<1x10xf32, #tpu.memory_space<vmem>>, vector<1x10xf32>
    %291 = vector.broadcast %290 : vector<1x10xf32> to vector<8x10xf32>
    %292 = arith.addf %289, %291 : vector<8x10xf32>
    %cst_177 = arith.constant 0.000000e+00 : f32
    %293 = vector.broadcast %cst_177 : f32 to vector<8x10xf32>
    %294 = arith.maximumf %292, %293 : vector<8x10xf32>
    %295 = arith.truncf %294 : vector<8x10xf32> to vector<8x10xbf16>
    %c0_178 = arith.constant 0 : index
    %c0_179 = arith.constant 0 : index
    %296 = vector.load %arg17[%c0_178, %c0_179] : memref<10x128xbf16, #tpu.memory_space<vmem>>, vector<10x128xbf16>
    %cst_180 = arith.constant dense<0.000000e+00> : vector<8x128xf32>
    %297 = tpu.matmul %295, %296, %cst_180 {dimension_numbers = #tpu.dot_dimension_numbers<[1], [0], [0], [1], [0, 0, 1, 1], [], []>} : vector<8x10xbf16>, vector<10x128xbf16>, vector<8x128xf32> -> vector<8x128xf32>
    %c0_181 = arith.constant 0 : index
    %c0_182 = arith.constant 0 : index
    %298 = vector.load %arg18[%c0_181, %c0_182] : memref<1x128xf32, #tpu.memory_space<vmem>>, vector<1x128xf32>
    %299 = vector.broadcast %298 : vector<1x128xf32> to vector<8x128xf32>
    %300 = arith.addf %297, %299 : vector<8x128xf32>
    %cst_183 = arith.constant 0.000000e+00 : f32
    %301 = vector.broadcast %cst_183 : f32 to vector<8x128xf32>
    %302 = arith.subf %301, %300 : vector<8x128xf32>
    %303 = math.exp %302 : vector<8x128xf32>
    %cst_184 = arith.constant 1.000000e+00 : f32
    %304 = vector.broadcast %cst_184 : f32 to vector<8x128xf32>
    %305 = arith.addf %304, %303 : vector<8x128xf32>
    %cst_185 = arith.constant 1.000000e+00 : f32
    %306 = vector.broadcast %cst_185 : f32 to vector<8x128xf32>
    %307 = arith.divf %306, %305 : vector<8x128xf32>
    %c0_186 = arith.constant 0 : index
    %c0_187 = arith.constant 0 : index
    %308 = vector.load %arg19[%c0_186, %c0_187] : memref<8x128xf32, #tpu.memory_space<vmem>>, vector<8x128xf32>
    tpu.vector_store %arg19[%c0_186, %c0_187], %307 {strides = array<i32>} : memref<8x128xf32, #tpu.memory_space<vmem>>, vector<8x128xf32>,
    return
  }
  func.func @transform_0(%arg0: i32) -> (i32, i32, i32) {
    %c0_i32 = arith.constant 0 : i32
    %c0_i32_0 = arith.constant 0 : i32
    %c0_i32_1 = arith.constant 0 : i32
    return %c0_i32, %arg0, %c0_i32_0 : i32, i32, i32
  }
  func.func @transform_1(%arg0: i32) -> (i32, i32, i32) {
    %c0_i32 = arith.constant 0 : i32
    %c0_i32_0 = arith.constant 0 : i32
    %c0_i32_1 = arith.constant 0 : i32
    %c0_i32_2 = arith.constant 0 : i32
    return %c0_i32, %c0_i32_0, %c0_i32_1 : i32, i32, i32
  }
  func.func @transform_2(%arg0: i32) -> (i32, i32) {
    %c0_i32 = arith.constant 0 : i32
    %c0_i32_0 = arith.constant 0 : i32
    %c0_i32_1 = arith.constant 0 : i32
    return %c0_i32, %c0_i32_0 : i32, i32
  }
  func.func @transform_3(%arg0: i32) -> (i32, i32, i32) {
    %c0_i32 = arith.constant 0 : i32
    %c0_i32_0 = arith.constant 0 : i32
    %c0_i32_1 = arith.constant 0 : i32
    %c0_i32_2 = arith.constant 0 : i32
    return %c0_i32, %c0_i32_0, %c0_i32_1 : i32, i32, i32
  }
  func.func @transform_4(%arg0: i32) -> (i32, i32) {
    %c0_i32 = arith.constant 0 : i32
    %c0_i32_0 = arith.constant 0 : i32
    %c0_i32_1 = arith.constant 0 : i32
    return %c0_i32, %c0_i32_0 : i32, i32
  }
  func.func @transform_5(%arg0: i32) -> (i32, i32, i32) {
    %c0_i32 = arith.constant 0 : i32
    %c0_i32_0 = arith.constant 0 : i32
    %c0_i32_1 = arith.constant 0 : i32
    %c0_i32_2 = arith.constant 0 : i32
    return %c0_i32, %c0_i32_0, %c0_i32_1 : i32, i32, i32
  }
  func.func @transform_6(%arg0: i32) -> (i32, i32) {
    %c0_i32 = arith.constant 0 : i32
    %c0_i32_0 = arith.constant 0 : i32
    %c0_i32_1 = arith.constant 0 : i32
    return %c0_i32, %c0_i32_0 : i32, i32
  }
  func.func @transform_7(%arg0: i32) -> (i32, i32) {
    %c0_i32 = arith.constant 0 : i32
    %c0_i32_0 = arith.constant 0 : i32
    %c0_i32_1 = arith.constant 0 : i32
    return %c0_i32, %c0_i32_0 : i32, i32
  }
  func.func @transform_8(%arg0: i32) -> (i32, i32) {
    %c0_i32 = arith.constant 0 : i32
    %c0_i32_0 = arith.constant 0 : i32
    %c0_i32_1 = arith.constant 0 : i32
    return %c0_i32, %c0_i32_0 : i32, i32
  }
  func.func @transform_9(%arg0: i32) -> (i32, i32) {
    %c0_i32 = arith.constant 0 : i32
    %c0_i32_0 = arith.constant 0 : i32
    %c0_i32_1 = arith.constant 0 : i32
    return %c0_i32, %c0_i32_0 : i32, i32
  }
  func.func @transform_10(%arg0: i32) -> (i32, i32) {
    %c0_i32 = arith.constant 0 : i32
    %c0_i32_0 = arith.constant 0 : i32
    %c0_i32_1 = arith.constant 0 : i32
    return %c0_i32, %c0_i32_0 : i32, i32
  }
  func.func @transform_11(%arg0: i32) -> (i32, i32) {
    %c0_i32 = arith.constant 0 : i32
    %c0_i32_0 = arith.constant 0 : i32
    %c0_i32_1 = arith.constant 0 : i32
    return %c0_i32, %c0_i32_0 : i32, i32
  }
  func.func @transform_12(%arg0: i32) -> (i32, i32) {
    %c0_i32 = arith.constant 0 : i32
    %c0_i32_0 = arith.constant 0 : i32
    %c0_i32_1 = arith.constant 0 : i32
    return %c0_i32, %c0_i32_0 : i32, i32
  }
  func.func @transform_13(%arg0: i32) -> (i32, i32) {
    %c0_i32 = arith.constant 0 : i32
    %c0_i32_0 = arith.constant 0 : i32
    %c0_i32_1 = arith.constant 0 : i32
    return %c0_i32, %c0_i32_0 : i32, i32
  }
  func.func @transform_14(%arg0: i32) -> (i32, i32) {
    %c0_i32 = arith.constant 0 : i32
    %c0_i32_0 = arith.constant 0 : i32
    %c0_i32_1 = arith.constant 0 : i32
    return %c0_i32, %c0_i32_0 : i32, i32
  }
  func.func @transform_15(%arg0: i32) -> (i32, i32) {
    %c0_i32 = arith.constant 0 : i32
    %c0_i32_0 = arith.constant 0 : i32
    %c0_i32_1 = arith.constant 0 : i32
    return %c0_i32, %c0_i32_0 : i32, i32
  }
  func.func @transform_16(%arg0: i32) -> (i32, i32) {
    %c0_i32 = arith.constant 0 : i32
    %c0_i32_0 = arith.constant 0 : i32
    %c0_i32_1 = arith.constant 0 : i32
    return %c0_i32, %c0_i32_0 : i32, i32
  }
  func.func @transform_17(%arg0: i32) -> (i32, i32) {
    %c0_i32 = arith.constant 0 : i32
    %c0_i32_0 = arith.constant 0 : i32
    %c0_i32_1 = arith.constant 0 : i32
    return %c0_i32, %c0_i32_0 : i32, i32
  }
  func.func @transform_18(%arg0: i32) -> (i32, i32) {
    %c0_i32 = arith.constant 0 : i32
    %c0_i32_0 = arith.constant 0 : i32
    return %arg0, %c0_i32 : i32, i32
  }
}

</mosaic_0001>

<bundles_post_ra>
// kernel: cnn_lstm_forward.1
= control target key start
LH: loop header
LB: loop body
LE: loop exit
PB: predicated region body
PF: predicated region fallthrough
CT: control target
= control target key end

     0   :  { %s7694_s0 = inlined_call_operand.vmem [shape: f32[32,8,4], index: 0, kind: input, shape index: {}]   ;;  %s7695_s1 = inlined_call_operand.vmem [shape: bf16[5,4,128], index: 1, kind: input, shape index: {}]   ;;  %s7696_s2 = inlined_call_operand.hbm [shape: f32[1,128], index: 2, kind: input, shape index: {}]   ;;  %s7697_s3 = inlined_call_operand.hbm [shape: bf16[3,128,128], index: 3, kind: input, shape index: {}]   ;;  %s7698_s4 = inlined_call_operand.hbm [shape: f32[1,128], index: 4, kind: input, shape index: {}]   ;;  %s7699_s5 = inlined_call_operand.hbm [shape: bf16[3,128,256], index: 5, kind: input, shape index: {}]   ;;  %s7700_s6 = inlined_call_operand.hbm [shape: f32[1,256], index: 6, kind: input, shape index: {}]   ;;  %s7701_s7 = inlined_call_operand.vmem [shape: bf16[256,512], index: 7, kind: input, shape index: {}]   ;;  %s7702_s8 = inlined_call_operand.hbm [shape: bf16[128,512], index: 8, kind: input, shape index: {}]   ;;  %s7703_s9 = inlined_call_operand.vmem [shape: f32[1,512], index: 9, kind: input, shape index: {}]   ;;  %s7704_s10 = inlined_call_operand.hbm [shape: bf16[256,512], index: 10, kind: input, shape index: {}]   ;;  %s7705_s11 = inlined_call_operand.vmem [shape: f32[1,512], index: 11, kind: input, shape index: {}]   ;;  %s7706_s12 = inlined_call_operand.vmem [shape: bf16[128,64], index: 12, kind: input, shape index: {}]   ;;  %s7707_s13 = inlined_call_operand.hbm [shape: f32[1,64], index: 13, kind: input, shape index: {}]   ;;  %s7708_s14 = inlined_call_operand.vmem [shape: bf16[64,10], index: 14, kind: input, shape index: {}]   ;;  %s7709_s15 = inlined_call_operand.hbm [shape: f32[1,10], index: 15, kind: input, shape index: {}]   ;;  %s7710_s16 = inlined_call_operand.hbm [shape: bf16[10,128], index: 16, kind: input, shape index: {}]   ;;  %s7711_s17 = inlined_call_operand.hbm [shape: f32[1,128], index: 17, kind: input, shape index: {}]   ;;  %s7712_s18 = inlined_call_operand.vmem [shape: f32[8,128], index: 18, kind: output, shape index: {}]  }
   0x1   :  { %7783 = sst [smem:[#allocation92_spill]] %s7694_s0 }
   0x2   :  { %7784 = sst [smem:[#allocation93_spill]] %s7695_s1 }
   0x3   :  { %7785 = sst [smem:[#allocation94_spill]] %s7696_s2 }
   0x4   :  { %23 = vsyncpa [#allocation7], 0 }
   0x5   :  { %24 = vsyncpa [#allocation9], 0 }
   0x6   :  { %25 = vsyncpa [#allocation12], 0 }
   0x7   :  { %26 = vsyncpa [#allocation15], 0 }
   0x8   :  { %27 = vsyncpa [#allocation18], 0 }
   0x9   :  { %28 = vsyncpa [#allocation21], 0  ;;  %s6206_s27 = smov [#allocation8]   ;;  %s5952_s0 = scalar_lea.hbm %s7697_s3, 3072 }
   0xa   :  { %s48_s28 = sshll.u32 %s6206_s27, 4  ;;  %p5953_p0 = scmp.ne.s32.totalorder %s7697_s3, %s5952_s0  ;;  %s49_s28 = int_to_ptr.vmem [resolvable:$true] %s48_s28 }
   0xb   :  { %p5956_p1 = scmp.lt.u32.totalorder %s5952_s0, %s7697_s3 }
   0xd   :  { %p5958_p2 = pnand %p5956_p1, %p5953_p0 }
   0xf   :  { %5961 = shalt.err (!%p5958_p2)
}
  0x10   :  { %s5962_s22 = scalar_lea.vmem %s49_s28, 3072  ;;  %p5967_p4 = scmp.lt.s32.totalorder %s49_s28, %s49_s28 }
  0x11   :  { %p5963_p3 = scmp.ne.s32.totalorder %s49_s28, %s5962_s22  ;;  %p5968_p5 = scmp.lt.s32.totalorder %s5962_s22, %s5962_s22 }
  0x13   :  { %p5969_p6 = por %p5968_p5, %p5967_p4 }
  0x15   :  { %p5970_p7 = pnand %p5969_p6, %p5963_p3 }
  0x17   :  { %5973 = shalt.err (!%p5970_p7)
}
  0x18   :  { %s7716_s2 = smov 64   ;;  %s6208_s23 = smov 4  }
  0x19   :  { %54 = dma.hbm_to_vmem [thread:$0]  %s7697_s3, 3072, %s49_s28, [#allocation9], %s7716_s2, %s7716_s2, %s6208_s23  }
  0x1a   :  { %s6209_s26 = smov [#allocation11]   ;;  %s5974_s0 = scalar_lea.hbm %s7699_s5, 6144 }
  0x1b   :  { %s70_s27 = sshll.u32 %s6209_s26, 4  ;;  %p5975_p8 = scmp.ne.s32.totalorder %s7699_s5, %s5974_s0  ;;  %s71_s27 = int_to_ptr.vmem [resolvable:$true] %s70_s27 }
  0x1c   :  { %p5978_p9 = scmp.lt.u32.totalorder %s5974_s0, %s7699_s5 }
  0x1e   :  { %p5980_p10 = pnand %p5978_p9, %p5975_p8 }
  0x20   :  { %5983 = shalt.err (!%p5980_p10)
}
  0x21   :  { %s5984_s22 = scalar_lea.vmem %s71_s27, 6144  ;;  %p5989_p12 = scmp.lt.s32.totalorder %s71_s27, %s71_s27 }
  0x22   :  { %p5985_p11 = scmp.ne.s32.totalorder %s71_s27, %s5984_s22  ;;  %p5990_p13 = scmp.lt.s32.totalorder %s5984_s22, %s5984_s22 }
  0x24   :  { %p5991_p0 = por %p5990_p13, %p5989_p12 }
  0x26   :  { %p5992_p1 = pnand %p5991_p0, %p5985_p11 }
  0x28   :  { %5995 = shalt.err (!%p5992_p1)
}
  0x29   :  { %s6210_s3 = smov 128   ;;  %s6211_s28 = smov 8  }
  0x2a   :  { %76 = dma.hbm_to_vmem [thread:$0]  %s7699_s5, 6144, %s71_s27, [#allocation12], %s6210_s3, %s6210_s3, %s6211_s28  }
  0x2b   :  { %s6212_s26 = smov [#allocation14]   ;;  %s5996_s19 = scalar_lea.hbm %s7702_s8, 4096 }
  0x2c   :  { %s94_s29 = sshll.u32 %s6212_s26, 4  ;;  %p5997_p2 = scmp.ne.s32.totalorder %s7702_s8, %s5996_s19  ;;  %s95_s29 = int_to_ptr.vmem [resolvable:$true] %s94_s29 }
  0x2d   :  { %p6000_p3 = scmp.lt.u32.totalorder %s5996_s19, %s7702_s8 }
  0x2f   :  { %p6002_p4 = pnand %p6000_p3, %p5997_p2 }
  0x31   :  { %6005 = shalt.err (!%p6002_p4)
}
  0x32   :  { %s6006_s2 = scalar_lea.vmem %s95_s29, 4096  ;;  %p6011_p6 = scmp.lt.s32.totalorder %s95_s29, %s95_s29 }
  0x33   :  { %p6007_p5 = scmp.ne.s32.totalorder %s95_s29, %s6006_s2  ;;  %p6012_p7 = scmp.lt.s32.totalorder %s6006_s2, %s6006_s2 }
  0x35   :  { %p6013_p8 = por %p6012_p7, %p6011_p6 }
  0x37   :  { %p6014_p9 = pnand %p6013_p8, %p6007_p5 }
  0x39   :  { %6017 = shalt.err (!%p6014_p9)
}
  0x3a   :  { %s6213_s5 = smov 256   ;;  %s6214_s27 = smov 16  }
  0x3b   :  { %100 = dma.hbm_to_vmem [thread:$0]  %s7702_s8, 4096, %s95_s29, [#allocation15], %s6213_s5, %s6213_s5, %s6214_s27  }
  0x3c   :  { %s6215_s24 = smov [#allocation17]   ;;  %s6216_s26 = smov [#allocation20]  }
  0x3d   :  { %s125_s25 = sshll.u32 %s6215_s24, 4  ;;  %s146_s30 = sshll.u32 %s6216_s26, 4  ;;  %s126_s25 = int_to_ptr.vmem [resolvable:$true] %s125_s25  ;;  %s147_s30 = int_to_ptr.vmem [resolvable:$true] %s146_s30 }
  0x3e   :  { %s6018_s2 = scalar_lea.hbm %s7707_s13, 16 }
  0x3f   :  { %p6019_p10 = scmp.ne.s32.totalorder %s7707_s13, %s6018_s2  ;;  %p6022_p11 = scmp.lt.u32.totalorder %s6018_s2, %s7707_s13 }
  0x41   :  { %p6024_p12 = pnand %p6022_p11, %p6019_p10 }
  0x43   :  { %6027 = shalt.err (!%p6024_p12)
}
  0x44   :  { %s6028_s8 = scalar_lea.vmem %s126_s25, 16  ;;  %s6032_s29 = scalar_lea.vmem %s126_s25, 32 }
  0x45   :  { %p6029_p13 = scmp.ne.s32.totalorder %s126_s25, %s6028_s8  ;;  %p6033_p0 = scmp.lt.s32.totalorder %s126_s25, %s126_s25 }
  0x46   :  { %p6034_p1 = scmp.lt.s32.totalorder %s6032_s29, %s6028_s8 }
  0x48   :  { %p6035_p2 = por %p6034_p1, %p6033_p0 }
  0x4a   :  { %p6036_p3 = pnand %p6035_p2, %p6029_p13 }
  0x4c   :  { %6039 = shalt.err (!%p6036_p3)
}
  0x4d   :  { %128 = dma.hbm_to_vmem [thread:$0]  %s7707_s13, 16, %s126_s25, [#allocation18]  }
  0x4e   :  { %s6040_s0 = scalar_lea.hbm %s7710_s16, 128 }
  0x4f   :  { %p6041_p4 = scmp.ne.s32.totalorder %s7710_s16, %s6040_s0  ;;  %p6044_p5 = scmp.lt.u32.totalorder %s6040_s0, %s7710_s16 }
  0x51   :  { %p6046_p6 = pnand %p6044_p5, %p6041_p4 }
  0x53   :  { %6049 = shalt.err (!%p6046_p6)
}
  0x54   :  { %s6050_s21 = scalar_lea.vmem %s147_s30, 128  ;;  %p6055_p8 = scmp.lt.s32.totalorder %s147_s30, %s147_s30 }
  0x55   :  { %p6051_p7 = scmp.ne.s32.totalorder %s147_s30, %s6050_s21  ;;  %p6056_p9 = scmp.lt.s32.totalorder %s6050_s21, %s6050_s21 }
  0x57   :  { %p6057_p10 = por %p6056_p9, %p6055_p8 }
  0x59   :  { %p6058_p11 = pnand %p6057_p10, %p6051_p7 }
  0x5b   :  { %6061 = shalt.err (!%p6058_p11)
}
  0x5c   :  { %s7786_s13 = smov 64   ;;  %s6217_s8 = smov [#allocation6]  }
  0x5d   :  { %152 = dma.hbm_to_vmem [thread:$0]  %s7710_s16, 128, %s147_s30, [#allocation21], %s7786_s13, %s7786_s13, %s6208_s23  }
  0x5e   :  { %s39_s29 = sshll.u32 %s6217_s8, 4  ;;  %s6218_s3 = smov [#allocation10]   ;;  %s40_s29 = int_to_ptr.vmem [resolvable:$true] %s39_s29 }
  0x5f   :  { %s61_s28 = sshll.u32 %s6218_s3, 4  ;;  %s7787_s0 = sld [smem:[#allocation94_spill]]  ;;  %s62_s28 = int_to_ptr.vmem [resolvable:$true] %s61_s28 }
  0x65   :  { %s6062_s19 = scalar_lea.hbm %s7787_s0, 16 }
  0x66   :  { %p6063_p12 = scmp.ne.s32.totalorder %s7787_s0, %s6062_s19  ;;  %p6066_p13 = scmp.lt.u32.totalorder %s6062_s19, %s7787_s0 }
  0x68   :  { %p6068_p0 = pnand %p6066_p13, %p6063_p12 }
  0x6a   :  { %6071 = shalt.err (!%p6068_p0)
}
  0x6b   :  { %s6072_s16 = scalar_lea.vmem %s40_s29, 16  ;;  %s6076_s23 = scalar_lea.vmem %s40_s29, 32 }
  0x6c   :  { %p6073_p1 = scmp.ne.s32.totalorder %s40_s29, %s6072_s16  ;;  %p6077_p2 = scmp.lt.s32.totalorder %s40_s29, %s40_s29 }
  0x6d   :  { %p6078_p3 = scmp.lt.s32.totalorder %s6076_s23, %s6072_s16 }
  0x6f   :  { %p6079_p4 = por %p6078_p3, %p6077_p2 }
  0x71   :  { %p6080_p5 = pnand %p6079_p4, %p6073_p1 }
  0x73   :  { %6083 = shalt.err (!%p6080_p5)
}
  0x74   :  { %42 = dma.hbm_to_vmem [thread:$0]  %s7787_s0, 16, %s40_s29, [#allocation7]  }
  0x75   :  { %s6084_s8 = scalar_lea.hbm %s7698_s4, 16 }
  0x76   :  { %p6085_p6 = scmp.ne.s32.totalorder %s7698_s4, %s6084_s8  ;;  %p6088_p7 = scmp.lt.u32.totalorder %s6084_s8, %s7698_s4 }
  0x78   :  { %p6090_p8 = pnand %p6088_p7, %p6085_p6 }
  0x7a   :  { %6093 = shalt.err (!%p6090_p8)
}
  0x7b   :  { %s6094_s2 = scalar_lea.vmem %s62_s28, 16  ;;  %s6098_s1 = scalar_lea.vmem %s62_s28, 32 }
  0x7c   :  { %p6095_p9 = scmp.ne.s32.totalorder %s62_s28, %s6094_s2  ;;  %p6099_p10 = scmp.lt.s32.totalorder %s62_s28, %s62_s28 }
  0x7d   :  { %p6100_p11 = scmp.lt.s32.totalorder %s6098_s1, %s6094_s2 }
  0x7f   :  { %p6101_p12 = por %p6100_p11, %p6099_p10 }
  0x81   :  { %p6102_p13 = pnand %p6101_p12, %p6095_p9 }
  0x83   :  { %6105 = shalt.err (!%p6102_p13)
}
  0x84   :  { %64 = dma.hbm_to_vmem [thread:$0]  %s7698_s4, 16, %s62_s28, [#allocation9]  }
  0x85   :  { %s6219_s20 = smov [#allocation13]   ;;  %s6220_s16 = smov [#allocation16]  }
  0x86   :  { %s83_s21 = sshll.u32 %s6219_s20, 4  ;;  %s108_s23 = sshll.u32 %s6220_s16, 4  ;;  %s84_s21 = int_to_ptr.vmem [resolvable:$true] %s83_s21  ;;  %s109_s23 = int_to_ptr.vmem [resolvable:$true] %s108_s23 }
  0x87   :  { %s6106_s25 = scalar_lea.hbm %s7700_s6, 32 }
  0x88   :  { %p6107_p0 = scmp.ne.s32.totalorder %s7700_s6, %s6106_s25  ;;  %p6110_p1 = scmp.lt.u32.totalorder %s6106_s25, %s7700_s6 }
  0x8a   :  { %p6112_p2 = pnand %p6110_p1, %p6107_p0 }
  0x8c   :  { %6115 = shalt.err (!%p6112_p2)
}
  0x8d   :  { %s6116_s4 = scalar_lea.vmem %s84_s21, 32  ;;  %p6121_p4 = scmp.lt.s32.totalorder %s84_s21, %s84_s21 }
  0x8e   :  { %p6117_p3 = scmp.ne.s32.totalorder %s84_s21, %s6116_s4  ;;  %p6122_p5 = scmp.lt.s32.totalorder %s6116_s4, %s6116_s4 }
  0x90   :  { %p6123_p6 = por %p6122_p5, %p6121_p4 }
  0x92   :  { %p6124_p7 = pnand %p6123_p6, %p6117_p3 }
  0x94   :  { %6127 = shalt.err (!%p6124_p7)
}
  0x95   :  { %86 = dma.hbm_to_vmem [thread:$0]  %s7700_s6, 32, %s84_s21, [#allocation12]  }
  0x96   :  { %s6128_s1 = scalar_lea.hbm %s7704_s10, 8192 }
  0x97   :  { %p6129_p8 = scmp.ne.s32.totalorder %s7704_s10, %s6128_s1  ;;  %p6132_p9 = scmp.lt.u32.totalorder %s6128_s1, %s7704_s10 }
  0x99   :  { %p6134_p10 = pnand %p6132_p9, %p6129_p8 }
  0x9b   :  { %6137 = shalt.err (!%p6134_p10)
}
  0x9c   :  { %s6138_s30 = scalar_lea.vmem %s109_s23, 8192  ;;  %p6143_p12 = scmp.lt.s32.totalorder %s109_s23, %s109_s23 }
  0x9d   :  { %p6139_p11 = scmp.ne.s32.totalorder %s109_s23, %s6138_s30  ;;  %p6144_p13 = scmp.lt.s32.totalorder %s6138_s30, %s6138_s30 }
  0x9f   :  { %p6145_p0 = por %p6144_p13, %p6143_p12 }
  0xa1   :  { %p6146_p1 = pnand %p6145_p0, %p6139_p11 }
  0xa3   :  { %6149 = shalt.err (!%p6146_p1)
}
  0xa4   :  { %114 = dma.hbm_to_vmem [thread:$0]  %s7704_s10, 8192, %s109_s23, [#allocation15], %s6213_s5, %s6213_s5, %s6214_s27  }
  0xa5   :  { %s6221_s13 = smov [#allocation19]   ;;  %s6222_s22 = smov [#allocation22]  }
  0xa6   :  { %s137_s25 = sshll.u32 %s6221_s13, 4  ;;  %s159_s8 = sshll.u32 %s6222_s22, 4  ;;  %s138_s25 = int_to_ptr.vmem [resolvable:$true] %s137_s25  ;;  %s160_s8 = int_to_ptr.vmem [resolvable:$true] %s159_s8 }
  0xa7   :  { %s6150_s4 = scalar_lea.hbm %s7709_s15, 16 }
  0xa8   :  { %p6151_p2 = scmp.ne.s32.totalorder %s7709_s15, %s6150_s4  ;;  %p6154_p3 = scmp.lt.u32.totalorder %s6150_s4, %s7709_s15 }
  0xaa   :  { %p6156_p4 = pnand %p6154_p3, %p6151_p2 }
  0xac   :  { %6159 = shalt.err (!%p6156_p4)
}
  0xad   :  { %s6160_s10 = scalar_lea.vmem %s138_s25, 16  ;;  %s6164_s5 = scalar_lea.vmem %s138_s25, 32 }
  0xae   :  { %p6161_p5 = scmp.ne.s32.totalorder %s138_s25, %s6160_s10  ;;  %p6165_p6 = scmp.lt.s32.totalorder %s138_s25, %s138_s25 }
  0xaf   :  { %p6166_p7 = scmp.lt.s32.totalorder %s6164_s5, %s6160_s10 }
  0xb1   :  { %p6167_p8 = por %p6166_p7, %p6165_p6 }
  0xb3   :  { %p6168_p9 = pnand %p6167_p8, %p6161_p5 }
  0xb5   :  { %6171 = shalt.err (!%p6168_p9)
}
  0xb6   :  { %140 = dma.hbm_to_vmem [thread:$0]  %s7709_s15, 16, %s138_s25, [#allocation18]  }
  0xb7   :  { %s6172_s0 = scalar_lea.hbm %s7711_s17, 16 }
  0xb8   :  { %p6173_p10 = scmp.ne.s32.totalorder %s7711_s17, %s6172_s0  ;;  %p6176_p11 = scmp.lt.u32.totalorder %s6172_s0, %s7711_s17 }
  0xba   :  { %p6178_p12 = pnand %p6176_p11, %p6173_p10 }
  0xbc   :  { %6181 = shalt.err (!%p6178_p12)
}
  0xbd   :  { %s6182_s21 = scalar_lea.vmem %s160_s8, 16  ;;  %s6186_s13 = scalar_lea.vmem %s160_s8, 32 }
  0xbe   :  { %p6183_p13 = scmp.ne.s32.totalorder %s160_s8, %s6182_s21  ;;  %p6187_p0 = scmp.lt.s32.totalorder %s160_s8, %s160_s8 }
  0xbf   :  { %p6188_p1 = scmp.lt.s32.totalorder %s6186_s13, %s6182_s21 }
  0xc1   :  { %p6189_p2 = por %p6188_p1, %p6187_p0 }
  0xc3   :  { %p6190_p3 = pnand %p6189_p2, %p6183_p13 }
  0xc5   :  { %6193 = shalt.err (!%p6190_p3)
}
  0xc6   :  { %162 = dma.hbm_to_vmem [thread:$0]  %s7711_s17, 16, %s160_s8, [#allocation21]  }
  0xc7   :  { %6194 = dma.done.wait [#allocation7], 16  }
  0xc8   :  { %6195 = vsyncadd [#allocation7], 4294967280 }
  0xc9   :  { %6196 = dma.done.wait [#allocation9], 3088  }
  0xca   :  { %6197 = vsyncadd [#allocation9], 4294964208 }
  0xcb   :  { %6198 = dma.done.wait [#allocation12], 6176  }
  0xcc   :  { %6199 = vsyncadd [#allocation12], 4294961120 }
  0xcd   :  { %6200 = dma.done.wait [#allocation15], 12288  }
  0xce   :  { %6201 = vsyncadd [#allocation15], 4294955008 }
  0xcf   :  { %6202 = dma.done.wait [#allocation18], 32  }
  0xd0   :  { %6203 = vsyncadd [#allocation18], 4294967264 }
  0xd1   :  { %6204 = dma.done.wait [#allocation21], 144  }
  0xd2   :  { %6205 = vsyncadd [#allocation21], 4294967152  ;;  %vm331_vm0 = vcmask 1041408   ;;  %s7788_s24 = sld [smem:[#allocation93_spill]]  ;;  %s7789_s17 = sld [smem:[#allocation92_spill]]  ;;  %vm288_vm1 = vcmask 31744  }
  0xd3   :  { %vm6224_vm2 = vmmov 0   ;;  %vm4362_vm3 = vcmask 523264   ;;  %vm4426_vm4 = vcmask 1044480   ;;  %vm4422_vm5 = vcmask 80896  }
  0xd8   :  { %v4515_v0 = vld [vmem:[%s7788_s24 + $0x2] sm:$0x3]  ;;  %v6472_v1 = vld [vmem:[%s7789_s17 + $0x8] sm:$0xff]  ;;  %v6477_v2 = vld [vmem:[%s7789_s17 + $0x10] sm:$0xff] }
  0xd9   :  { %5509 = vmatprep.subr.msk.bf16.mxu0 %vm331_vm0, %v4515_v0  ;;  %v333_v3 = vsel %vm331_vm0, %v4515_v0, 0  ;;  %v272_v4 = vpack.c.bf16 %v6477_v2, %v6472_v1  ;;  %v6486_v5 = vld [vmem:[%s7789_s17 + $0x18] sm:$0xff]  ;;  %v6491_v6 = vld [vmem:[%s7789_s17 + $0x20] sm:$0xff]  ;;  %v4491_v9 = vld [vmem:[%s7789_s17 + $0x28] sm:$0xff] }
  0xda   :  { %v242_v7 = vld [vmem:[%s7788_s24] sm:$0x3]  ;;  %5062 = vmatpush3.bf16.msra.mxu0 %v333_v3  ;;  %v6498_v8 = vpack.c.bf16 %v6491_v6, %v6486_v5  ;;  %v6506_v10 = vld [vmem:[%s7789_s17 + $0x30] sm:$0xff]  ;;  %v4493_v13 = vld [vmem:[%s7789_s17 + $0x38] sm:$0xff]  ;;  %v229_v49 = vpack.c.bf16 %v6486_v5, %v6477_v2  ;;  %v6643_v50 = vpack.c.bf16 %v4491_v9, %v6491_v6  ;;  %v7717_v3 = vmov 0.0  }
  0xdb   :  { %5063 = vmatprep.mubr.msk.bf16.mxu0 %vm288_vm1, %v272_v4  ;;  %5510 = vmatprep.subr.msk.bf16.mxu0 %vm331_vm0, %v242_v7  ;;  %v523_v11 = vsel %vm331_vm0, %v242_v7, 0  ;;  %v6512_v12 = vpack.c.bf16 %v6506_v10, %v4491_v9  ;;  %v4494_v14 = vld [vmem:[%s7789_s17 + $0x40] sm:$0xff]  ;;  %v4495_v15 = vld [vmem:[%s7789_s17 + $0x48] sm:$0xff]  ;;  %v4496_v16 = vld [vmem:[%s7789_s17 + $0x50] sm:$0xff]  ;;  %v6654_v53 = vpack.c.bf16 %v4493_v13, %v6506_v10 }
  0xdc   :  { %v6530_v17 = vpack.c.bf16 %v4494_v14, %v4493_v13  ;;  %v6532_v18 = vpack.c.bf16 %v4496_v16, %v4495_v15  ;;  %v4572_v19 = vld [vmem:[%s7788_s24 + $0x4] sm:$0x3]  ;;  %v4497_v20 = vld [vmem:[%s7789_s17 + $0x58] sm:$0xff]  ;;  %v4499_v22 = vld [vmem:[%s7789_s17 + $0x68] sm:$0xff]  ;;  %v6656_v54 = vpack.c.bf16 %v4495_v15, %v4494_v14  ;;  %5211 = vmatprep.subr.bf16.mxu1 %v7717_v3  ;;  %5227 = vmatprep.mubr.msk.bf16.mxu1 %vm6224_vm2, %v7717_v3 }
  0xdd   :  { %5064 = vmatmul.mubr.msk.bf16.vlgmr.msra.gmra.mrb[0].mxu0 %vm288_vm1, %v6498_v8  ;;  %v4498_v21 = vld [vmem:[%s7789_s17 + $0x60] sm:$0xff]  ;;  %v4500_v23 = vld [vmem:[%s7789_s17 + $0x70] sm:$0xff]  ;;  %v4501_v26 = vld [vmem:[%s7789_s17 + $0x78] sm:$0xff]  ;;  %v758_v52 = vsel %vm331_vm0, %v4572_v19, 0  ;;  %v6662_v55 = vpack.c.bf16 %v4497_v20, %v4496_v16 }
  0xde   :  { %5092 = vmatpush3.bf16.msra.mxu0 %v523_v11  ;;  %5067 = vmatprep.mubr.msk.bf16.mxu0 %vm288_vm1, %v6512_v12  ;;  %v6554_v24 = vpack.c.bf16 %v4498_v21, %v4497_v20  ;;  %v6556_v25 = vpack.c.bf16 %v4500_v23, %v4499_v22  ;;  %v4502_v27 = vld [vmem:[%s7789_s17 + $0x80] sm:$0xff]  ;;  %v4503_v28 = vld [vmem:[%s7789_s17 + $0x88] sm:$0xff]  ;;  %v4504_v29 = vld [vmem:[%s7789_s17 + $0x90] sm:$0xff]  ;;  %v6664_v56 = vpack.c.bf16 %v4499_v22, %v4498_v21 }
  0xdf   :  { %5511 = vmatprep.subr.msk.bf16.mxu0 %vm331_vm0, %v4572_v19  ;;  %v6574_v30 = vpack.c.bf16 %v4502_v27, %v4501_v26  ;;  %v6576_v31 = vpack.c.bf16 %v4504_v29, %v4503_v28  ;;  %v4505_v32 = vld [vmem:[%s7789_s17 + $0x98] sm:$0xff]  ;;  %v4506_v33 = vld [vmem:[%s7789_s17 + $0xa0] sm:$0xff]  ;;  %v4507_v34 = vld [vmem:[%s7789_s17 + $0xa8] sm:$0xff]  ;;  %v6670_v57 = vpack.c.bf16 %v4501_v26, %v4500_v23  ;;  %v6672_v58 = vpack.c.bf16 %v4503_v28, %v4502_v27 }
  0xe0   :  { %v4508_v35 = vld [vmem:[%s7789_s17 + $0xb0] sm:$0xff]  ;;  %v6594_v36 = vpack.c.bf16 %v4506_v33, %v4505_v32  ;;  %v4509_v38 = vld [vmem:[%s7789_s17 + $0xb8] sm:$0xff]  ;;  %v4510_v39 = vld [vmem:[%s7789_s17 + $0xc0] sm:$0xff]  ;;  %v6678_v59 = vpack.c.bf16 %v4505_v32, %v4504_v29  ;;  %v6680_v60 = vpack.c.bf16 %v4507_v34, %v4506_v33 }
  0xe1   :  { %v6596_v37 = vpack.c.bf16 %v4508_v35, %v4507_v34  ;;  %v4511_v40 = vld [vmem:[%s7789_s17 + $0xc8] sm:$0xff]  ;;  %v4512_v41 = vld [vmem:[%s7789_s17 + $0xd0] sm:$0xff]  ;;  %v6614_v42 = vpack.c.bf16 %v4510_v39, %v4509_v38  ;;  %v4513_v44 = vld [vmem:[%s7789_s17 + $0xd8] sm:$0xff]  ;;  %v6686_v61 = vpack.c.bf16 %v4509_v38, %v4508_v35 }
  0xe2   :  { %v6616_v43 = vpack.c.bf16 %v4512_v41, %v4511_v40  ;;  %v6624_v45 = vld [vmem:[%s7789_s17 + $0xe0] sm:$0xff]  ;;  %v6688_v62 = vpack.c.bf16 %v4511_v40, %v4510_v39  ;;  %v6694_v63 = vpack.c.bf16 %v4513_v44, %v4512_v41  ;;  %v5536_v4 = vld [vmem:[#allocation8 + $0x48] sm:$0xff]   ;;  %v5537_v5 = vld [vmem:[#allocation8 + $0x50] sm:$0xff]  }
  0xe3   :  { %v200_v46 = vld [vmem:[%s7789_s17] sm:$0xff]  ;;  %v6634_v47 = vpack.c.bf16 %v6624_v45, %v4513_v44  ;;  %v4571_v6 = vld [vmem:[%s7789_s17 + $0xe8] sm:$0xff]  ;;  %v4657_v13 = vld [vmem:[%s7789_s17 + $0xf8] sm:$0xff] }
  0xe4   :  { %v228_v48 = vpack.c.bf16 %v6472_v1, %v200_v46  ;;  %v4615_v51 = vld [vmem:[%s7788_s24 + $0x6] sm:$0x3]  ;;  %v4658_v1 = vld [vmem:[%s7788_s24 + $0x8] sm:$0x3]  ;;  %v5538_v7 = vld [vmem:[#allocation8 + $0x58] sm:$0xff]   ;;  %v712_v9 = vpack.c.bf16 %v4571_v6, %v6624_v45 }
  0xe5   :  { %5068 = vmatmul.mubr.msk.bf16.gmra.mrb[4].mxu0 %vm288_vm1, %v6530_v17  ;;  %v1021_v0 = vsel %vm331_vm0, %v4615_v51, 0  ;;  %v5535_v2 = vld [vmem:[#allocation8 + $0x40] sm:$0xff]   ;;  %v1284_v11 = vsel %vm331_vm0, %v4658_v1, 0  ;;  %v5540_v15 = vld [vmem:[#allocation8 + $0x68] sm:$0xff]   ;;  %v5541_v16 = vld [vmem:[#allocation8 + $0x70] sm:$0xff]  }
  0xe6   :  { %5071 = vmatprep.mubr.msk.bf16.mxu0 %vm288_vm1, %v6532_v18  ;;  %5212 = vmatpush3.bf16.msra.mxu1 %v5535_v2  ;;  %v5539_v10 = vld [vmem:[#allocation8 + $0x60] sm:$0xff]   ;;  %v5544_v45 = vld [vmem:[#allocation8 + $0x8] sm:$0xff]  }
  0xe7   :  { %5213 = vmatprep.subr.bf16.mxu1 %v7717_v3 }
  0xea   :  { %5214 = vmatpush3.bf16.msra.mxu1 %v5536_v4 }
  0xeb   :  { %5215 = vmatprep.subr.bf16.mxu1 %v7717_v3 }
  0xed   :  { %5072 = vmatmul.mubr.msk.bf16.gmra.mrb[8].mxu0 %vm288_vm1, %v6554_v24 }
  0xee   :  { %5075 = vmatprep.mubr.msk.bf16.mxu0 %vm288_vm1, %v6556_v25  ;;  %5216 = vmatpush3.bf16.msra.mxu1 %v5537_v5 }
  0xef   :  { %5217 = vmatprep.subr.bf16.mxu1 %v7717_v3 }
  0xf2   :  { %5218 = vmatpush3.bf16.msra.mxu1 %v5538_v7 }
  0xf3   :  { %5219 = vmatprep.subr.bf16.mxu1 %v7717_v3 }
  0xf5   :  { %5076 = vmatmul.mubr.msk.bf16.gmra.mrb[12].mxu0 %vm288_vm1, %v6574_v30 }
  0xf6   :  { %5079 = vmatprep.mubr.msk.bf16.mxu0 %vm288_vm1, %v6576_v31  ;;  %5220 = vmatpush3.bf16.msra.mxu1 %v5539_v10 }
  0xf7   :  { %5221 = vmatprep.subr.bf16.mxu1 %v7717_v3 }
  0xfa   :  { %5222 = vmatpush3.bf16.msra.mxu1 %v5540_v15 }
  0xfb   :  { %5223 = vmatprep.subr.bf16.mxu1 %v7717_v3 }
  0xfd   :  { %5080 = vmatmul.mubr.msk.bf16.gmra.mrb[16].mxu0 %vm288_vm1, %v6594_v36 }
  0xfe   :  { %5083 = vmatprep.mubr.msk.bf16.mxu0 %vm288_vm1, %v6596_v37  ;;  %5224 = vmatpush3.bf16.msra.mxu1 %v5541_v16 }
  0xff   :  { %5225 = vmatprep.subr.bf16.mxu1 %v7717_v3 }
 0x105   :  { %5084 = vmatmul.mubr.msk.bf16.gmra.mrb[20].mxu0 %vm288_vm1, %v6614_v42 }
 0x106   :  { %5087 = vmatprep.mubr.msk.bf16.mxu0 %vm288_vm1, %v6616_v43 }
 0x10d   :  { %5088 = vmatmul.mubr.msk.bf16.gmra.mrb[24].mxu0 %vm288_vm1, %v6634_v47 }
 0x10e   :  { %5093 = vmatprep.mubr.msk.bf16.mxu0 %vm288_vm1, %v228_v48 }
 0x115   :  { %5094 = vmatmul.mubr.msk.bf16.vlgmr.msra.gmra.mrb[0].mxu0 %vm288_vm1, %v229_v49 }
 0x116   :  { %5122 = vmatpush3.bf16.msra.mxu0 %v758_v52  ;;  %5097 = vmatprep.mubr.msk.bf16.mxu0 %vm288_vm1, %v6643_v50 }
 0x117   :  { %5512 = vmatprep.subr.msk.bf16.mxu0 %vm331_vm0, %v4615_v51 }
 0x11d   :  { %5098 = vmatmul.mubr.msk.bf16.gmra.mrb[4].mxu0 %vm288_vm1, %v6654_v53 }
 0x11e   :  { %5101 = vmatprep.mubr.msk.bf16.mxu0 %vm288_vm1, %v6656_v54 }
 0x125   :  { %5102 = vmatmul.mubr.msk.bf16.gmra.mrb[8].mxu0 %vm288_vm1, %v6662_v55 }
 0x126   :  { %5105 = vmatprep.mubr.msk.bf16.mxu0 %vm288_vm1, %v6664_v56 }
 0x12d   :  { %5106 = vmatmul.mubr.msk.bf16.gmra.mrb[12].mxu0 %vm288_vm1, %v6670_v57 }
 0x12e   :  { %5109 = vmatprep.mubr.msk.bf16.mxu0 %vm288_vm1, %v6672_v58 }
 0x135   :  { %5110 = vmatmul.mubr.msk.bf16.gmra.mrb[16].mxu0 %vm288_vm1, %v6678_v59 }
 0x136   :  { %5113 = vmatprep.mubr.msk.bf16.mxu0 %vm288_vm1, %v6680_v60 }
 0x13d   :  { %5114 = vmatmul.mubr.msk.bf16.gmra.mrb[20].mxu0 %vm288_vm1, %v6686_v61 }
 0x13e   :  { %5117 = vmatprep.mubr.msk.bf16.mxu0 %vm288_vm1, %v6688_v62 }
 0x145   :  { %5118 = vmatmul.mubr.msk.bf16.gmra.mrb[24].mxu0 %vm288_vm1, %v6694_v63 }
 0x146   :  { %5123 = vmatprep.mubr.msk.bf16.mxu0 %vm288_vm1, %v229_v49 }
 0x14d   :  { %5124 = vmatmul.mubr.msk.bf16.vlgmr.msra.gmra.mrb[0].mxu0 %vm288_vm1, %v6643_v50 }
 0x14e   :  { %5152 = vmatpush3.bf16.msra.mxu0 %v1021_v0  ;;  %5127 = vmatprep.mubr.msk.bf16.mxu0 %vm288_vm1, %v6654_v53 }
 0x14f   :  { %5513 = vmatprep.subr.msk.bf16.mxu0 %vm331_vm0, %v4658_v1 }
 0x155   :  { %5128 = vmatmul.mubr.msk.bf16.gmra.mrb[4].mxu0 %vm288_vm1, %v6656_v54 }
 0x156   :  { %5131 = vmatprep.mubr.msk.bf16.mxu0 %vm288_vm1, %v6662_v55 }
 0x15d   :  { %5132 = vmatmul.mubr.msk.bf16.gmra.mrb[8].mxu0 %vm288_vm1, %v6664_v56 }
 0x15e   :  { %5135 = vmatprep.mubr.msk.bf16.mxu0 %vm288_vm1, %v6670_v57 }
 0x165   :  { %5136 = vmatmul.mubr.msk.bf16.gmra.mrb[12].mxu0 %vm288_vm1, %v6672_v58 }
 0x166   :  { %5139 = vmatprep.mubr.msk.bf16.mxu0 %vm288_vm1, %v6678_v59 }
 0x16d   :  { %5140 = vmatmul.mubr.msk.bf16.gmra.mrb[16].mxu0 %vm288_vm1, %v6680_v60 }
 0x16e   :  { %5143 = vmatprep.mubr.msk.bf16.mxu0 %vm288_vm1, %v6686_v61 }
 0x175   :  { %5144 = vmatmul.mubr.msk.bf16.gmra.mrb[20].mxu0 %vm288_vm1, %v6688_v62 }
 0x176   :  { %5147 = vmatprep.mubr.msk.bf16.mxu0 %vm288_vm1, %v6694_v63 }
 0x17d   :  { %5148 = vmatmul.mubr.msk.bf16.gmra.mrb[24].mxu0 %vm288_vm1, %v712_v9 }
 0x17e   :  { %5153 = vmatprep.mubr.msk.bf16.mxu0 %vm288_vm1, %v6498_v8  ;;  %v4614_v8 = vld [vmem:[%s7789_s17 + $0xf0] sm:$0xff] }
 0x17f   :  { %v1238_v14 = vpack.c.bf16 %v4657_v13, %v4614_v8 }
 0x185   :  { %5154 = vmatmul.mubr.msk.bf16.vlgmr.msra.gmra.mrb[0].mxu0 %vm288_vm1, %v6512_v12  ;;  %v975_v12 = vpack.c.bf16 %v4614_v8, %v4571_v6 }
 0x186   :  { %5182 = vmatpush3.bf16.msra.mxu0 %v1284_v11  ;;  %5157 = vmatprep.mubr.msk.bf16.mxu0 %vm288_vm1, %v6530_v17  ;;  %v5542_v17 = vld [vmem:[#allocation8 + $0x78] sm:$0xff]  }
 0x187   :  { %5226 = vmatpush3.bf16.msra.mxu1 %v5542_v17 }
 0x188   :  { %5255 = vmatprep.subr.bf16.mxu1 %v7717_v3 }
 0x18d   :  { %5158 = vmatmul.mubr.msk.bf16.gmra.mrb[4].mxu0 %vm288_vm1, %v6532_v18  ;;  %v6804_v18 = vld [vmem:[#allocation6] ss:$0 sm:$0xff] }
 0x18e   :  { %5161 = vmatprep.mubr.msk.bf16.mxu0 %vm288_vm1, %v6554_v24 }
 0x195   :  { %5162 = vmatmul.mubr.msk.bf16.gmra.mrb[8].mxu0 %vm288_vm1, %v6556_v25 }
 0x196   :  { %5165 = vmatprep.mubr.msk.bf16.mxu0 %vm288_vm1, %v6574_v30 }
 0x19d   :  { %5166 = vmatmul.mubr.msk.bf16.gmra.mrb[12].mxu0 %vm288_vm1, %v6576_v31 }
 0x19e   :  { %5169 = vmatprep.mubr.msk.bf16.mxu0 %vm288_vm1, %v6594_v36  ;;  %v5543_v36 = vld [vmem:[#allocation8] sm:$0xff]  }
 0x1a5   :  { %5170 = vmatmul.mubr.msk.bf16.gmra.mrb[16].mxu0 %vm288_vm1, %v6596_v37 }
 0x1a6   :  { %5173 = vmatprep.mubr.msk.bf16.mxu0 %vm288_vm1, %v6614_v42 }
 0x1ad   :  { %5174 = vmatmul.mubr.msk.bf16.gmra.mrb[20].mxu0 %vm288_vm1, %v6616_v43 }
 0x1ae   :  { %5177 = vmatprep.mubr.msk.bf16.mxu0 %vm288_vm1, %v6634_v47 }
 0x1b5   :  { %5178 = vmatmul.mubr.msk.bf16.gmra.mrb[24].mxu0 %vm288_vm1, %v975_v12 }
 0x1b6   :  { %5183 = vmatprep.mubr.msk.bf16.mxu0 %vm288_vm1, %v6643_v50 }
 0x1bd   :  { %5184 = vmatmul.mubr.msk.bf16.vlgmr.msra.gmra.mrb[0].mxu0 %vm288_vm1, %v6654_v53  ;;  %v5545_v53 = vld [vmem:[#allocation8 + $0x10] sm:$0xff]  }
 0x1be   :  { %5187 = vmatprep.mubr.msk.bf16.mxu0 %vm288_vm1, %v6656_v54 }
 0x1c5   :  { %5188 = vmatmul.mubr.msk.bf16.gmra.mrb[4].mxu0 %vm288_vm1, %v6662_v55 }
 0x1c6   :  { %5191 = vmatprep.mubr.msk.bf16.mxu0 %vm288_vm1, %v6664_v56 }
 0x1cd   :  { %5192 = vmatmul.mubr.msk.bf16.gmra.mrb[8].mxu0 %vm288_vm1, %v6670_v57 }
 0x1ce   :  { %5195 = vmatprep.mubr.msk.bf16.mxu0 %vm288_vm1, %v6672_v58 }
 0x1d5   :  { %5196 = vmatmul.mubr.msk.bf16.gmra.mrb[12].mxu0 %vm288_vm1, %v6678_v59 }
 0x1d6   :  { %5199 = vmatprep.mubr.msk.bf16.mxu0 %vm288_vm1, %v6680_v60 }
 0x1dd   :  { %5200 = vmatmul.mubr.msk.bf16.gmra.mrb[16].mxu0 %vm288_vm1, %v6686_v61 }
 0x1de   :  { %5203 = vmatprep.mubr.msk.bf16.mxu0 %vm288_vm1, %v6688_v62 }
 0x1e5   :  { %5204 = vmatmul.mubr.msk.bf16.gmra.mrb[20].mxu0 %vm288_vm1, %v6694_v63  ;;  %v5546_v63 = vld [vmem:[#allocation8 + $0x18] sm:$0xff]  }
 0x1e6   :  { %5207 = vmatprep.mubr.msk.bf16.mxu0 %vm288_vm1, %v712_v9  ;;  %v5547_v9 = vld [vmem:[#allocation8 + $0x20] sm:$0xff]  }
 0x1ed   :  { %5208 = vmatmul.mubr.msk.bf16.gmra.mrb[24].mxu0 %vm288_vm1, %v1238_v14 }
 0x290   :  { %v5185_v19 = vpop.f32.mrb[0].mxu0 }
 0x291   :  { %v1468_v20 = vadd.f32 %v5185_v19, %v6804_v18  ;;  %v1320_v21 = vpop.f32.mrb[1].mxu0  ;;  %v5548_v19 = vld [vmem:[#allocation8 + $0x28] sm:$0xff]  }
 0x292   :  { %v1466_v22 = vadd.f32 %v6804_v18, %v1320_v21  ;;  %v5186_v23 = vpop.f32.mrb[2].mxu0 }
 0x293   :  { %v1469_v24 = vadd.f32 %v5186_v23, %v6804_v18  ;;  %v1323_v25 = vpop.f32.mrb[3].mxu0  ;;  %v1496_v27 = vmax.f32 %v1468_v20, 0.0 }
 0x294   :  { %v1467_v26 = vadd.f32 %v6804_v18, %v1323_v25  ;;  %v1494_v29 = vmax.f32 %v1466_v22, 0.0 }
 0x295   :  { %v1497_v28 = vmax.f32 %v1469_v24, 0.0 }
 0x296   :  { %v1495_v30 = vmax.f32 %v1467_v26, 0.0 }
 0x297   :  { %v1523_v31 = vmax.f32 %v1496_v27, %v1497_v28  ;;  %v5549_v27 = vld [vmem:[#allocation8 + $0x30] sm:$0xff]  }
 0x298   :  { %v6810_v32 = vmax.f32 %v1494_v29, %v1495_v30  ;;  %v5189_v33 = vpop.f32.mrb[4].mxu0 }
 0x299   :  { %v1472_v34 = vadd.f32 %v5189_v33, %v6804_v18  ;;  %v1336_v35 = vpop.f32.mrb[5].mxu0 }
 0x29a   :  { %v1470_v37 = vadd.f32 %v6804_v18, %v1336_v35  ;;  %v5190_v38 = vpop.f32.mrb[6].mxu0  ;;  %v1602_v39 = vpack.c.bf16 %v1523_v31, %v6810_v32 }
 0x29b   :  { %v1473_v40 = vadd.f32 %v5190_v38, %v6804_v18  ;;  %v1339_v41 = vpop.f32.mrb[7].mxu0  ;;  %v1500_v43 = vmax.f32 %v1472_v34, 0.0  ;;  %v5550_v38 = vld [vmem:[#allocation8 + $0x38] sm:$0xff]  }
 0x29c   :  { %v1471_v42 = vadd.f32 %v6804_v18, %v1339_v41  ;;  %5228 = vmatmul.mubr.bf16.vlgmr.msra.gmra.mrb[0].mxu1 %v1602_v39  ;;  %v1498_v46 = vmax.f32 %v1470_v37, 0.0 }
 0x29d   :  { %v1501_v44 = vmax.f32 %v1473_v40, 0.0  ;;  %5256 = vmatpush3.bf16.msra.mxu1 %v5543_v36  ;;  %5231 = vmatprep.mubr.msk.bf16.mxu1 %vm6224_vm2, %v7717_v3 }
 0x29e   :  { %v1499_v47 = vmax.f32 %v1471_v42, 0.0  ;;  %5257 = vmatprep.subr.bf16.mxu1 %v7717_v3 }
 0x29f   :  { %v1525_v48 = vmax.f32 %v1500_v43, %v1501_v44 }
 0x2a0   :  { %v1524_v49 = vmax.f32 %v1498_v46, %v1499_v47  ;;  %v5193_v50 = vpop.f32.mrb[8].mxu0 }
 0x2a1   :  { %v1476_v51 = vadd.f32 %v5193_v50, %v6804_v18  ;;  %v1352_v52 = vpop.f32.mrb[9].mxu0  ;;  %5258 = vmatpush3.bf16.msra.mxu1 %v5544_v45 }
 0x2a2   :  { %v1474_v54 = vadd.f32 %v6804_v18, %v1352_v52  ;;  %v5194_v55 = vpop.f32.mrb[10].mxu0  ;;  %v1603_v56 = vpack.c.bf16 %v1525_v48, %v1524_v49  ;;  %5259 = vmatprep.subr.bf16.mxu1 %v7717_v3  ;;  %v6823_v57 = vpack.c.bf16 %v1524_v49, %v1523_v31 }
 0x2a3   :  { %v1477_v58 = vadd.f32 %v5194_v55, %v6804_v18  ;;  %v1355_v59 = vpop.f32.mrb[11].mxu0  ;;  %v1504_v61 = vmax.f32 %v1476_v51, 0.0 }
 0x2a4   :  { %v1475_v60 = vadd.f32 %v6804_v18, %v1355_v59  ;;  %5232 = vmatmul.mubr.bf16.gmra.mrb[4].mxu1 %v1603_v56  ;;  %v1502_v0 = vmax.f32 %v1474_v54, 0.0 }
 0x2a5   :  { %v1505_v62 = vmax.f32 %v1477_v58, 0.0  ;;  %5235 = vmatprep.mubr.msk.bf16.mxu1 %vm6224_vm2, %v7717_v3  ;;  %5260 = vmatpush3.bf16.msra.mxu1 %v5545_v53 }
 0x2a6   :  { %v1503_v1 = vmax.f32 %v1475_v60, 0.0  ;;  %5261 = vmatprep.subr.bf16.mxu1 %v7717_v3 }
 0x2a7   :  { %v1527_v2 = vmax.f32 %v1504_v61, %v1505_v62 }
 0x2a8   :  { %v1526_v4 = vmax.f32 %v1502_v0, %v1503_v1  ;;  %v5197_v5 = vpop.f32.mrb[12].mxu0 }
 0x2a9   :  { %v1480_v6 = vadd.f32 %v5197_v5, %v6804_v18  ;;  %v1368_v7 = vpop.f32.mrb[13].mxu0  ;;  %5262 = vmatpush3.bf16.msra.mxu1 %v5546_v63 }
 0x2aa   :  { %v1478_v10 = vadd.f32 %v6804_v18, %v1368_v7  ;;  %v5198_v11 = vpop.f32.mrb[14].mxu0  ;;  %v1604_v8 = vpack.c.bf16 %v1527_v2, %v1526_v4  ;;  %5263 = vmatprep.subr.bf16.mxu1 %v7717_v3  ;;  %v6833_v12 = vpack.c.bf16 %v1526_v4, %v1525_v48 }
 0x2ab   :  { %v1481_v13 = vadd.f32 %v5198_v11, %v6804_v18  ;;  %v1371_v14 = vpop.f32.mrb[15].mxu0  ;;  %v1508_v16 = vmax.f32 %v1480_v6, 0.0 }
 0x2ac   :  { %v1479_v15 = vadd.f32 %v6804_v18, %v1371_v14  ;;  %5236 = vmatmul.mubr.bf16.gmra.mrb[8].mxu1 %v1604_v8  ;;  %v1506_v20 = vmax.f32 %v1478_v10, 0.0 }
 0x2ad   :  { %v1509_v17 = vmax.f32 %v1481_v13, 0.0  ;;  %5239 = vmatprep.mubr.msk.bf16.mxu1 %vm6224_vm2, %v7717_v3  ;;  %5264 = vmatpush3.bf16.msra.mxu1 %v5547_v9 }
 0x2ae   :  { %v1507_v21 = vmax.f32 %v1479_v15, 0.0  ;;  %5265 = vmatprep.subr.bf16.mxu1 %v7717_v3 }
 0x2af   :  { %v1529_v22 = vmax.f32 %v1508_v16, %v1509_v17  ;;  %v5551_v16 = vld [vmem:[#allocation8 + $0x80] sm:$0xff]   ;;  %v5552_v17 = vld [vmem:[#allocation8 + $0x88] sm:$0xff]  }
 0x2b0   :  { %v1528_v23 = vmax.f32 %v1506_v20, %v1507_v21  ;;  %v5201_v24 = vpop.f32.mrb[16].mxu0  ;;  %v5554_v20 = vld [vmem:[#allocation8 + $0x98] sm:$0xff]   ;;  %v5556_v21 = vld [vmem:[#allocation8 + $0xa8] sm:$0xff]  }
 0x2b1   :  { %v1484_v25 = vadd.f32 %v5201_v24, %v6804_v18  ;;  %v1384_v26 = vpop.f32.mrb[17].mxu0  ;;  %5266 = vmatpush3.bf16.msra.mxu1 %v5548_v19  ;;  %v5553_v19 = vld [vmem:[#allocation8 + $0x90] sm:$0xff]  }
 0x2b2   :  { %v1482_v28 = vadd.f32 %v6804_v18, %v1384_v26  ;;  %v5202_v29 = vpop.f32.mrb[18].mxu0  ;;  %v1605_v30 = vpack.c.bf16 %v1529_v22, %v1528_v23  ;;  %5267 = vmatprep.subr.bf16.mxu1 %v7717_v3  ;;  %v6843_v31 = vpack.c.bf16 %v1528_v23, %v1527_v2  ;;  %v5558_v23 = vld [vmem:[#allocation8 + $0xb8] sm:$0xff]   ;;  %v5561_v24 = vld [vmem:[#allocation11 + $0x84] ss:$8 sps:$4 sm:$0xff]  }
 0x2b3   :  { %v1485_v33 = vadd.f32 %v5202_v29, %v6804_v18  ;;  %v1387_v34 = vpop.f32.mrb[19].mxu0  ;;  %v1512_v36 = vmax.f32 %v1484_v25, 0.0  ;;  %v5562_v25 = vld [vmem:[#allocation11 + $0x90] ss:$8 sps:$4 sm:$0xff]   ;;  %v5564_v26 = vld [vmem:[#allocation11 + $0x94] ss:$8 sps:$4 sm:$0xff]  }
 0x2b4   :  { %v1483_v35 = vadd.f32 %v6804_v18, %v1387_v34  ;;  %5240 = vmatmul.mubr.bf16.gmra.mrb[12].mxu1 %v1605_v30  ;;  %v1510_v39 = vmax.f32 %v1482_v28, 0.0  ;;  %v5567_v28 = vld [vmem:[#allocation11 + $0xa4] ss:$8 sps:$4 sm:$0xff]   ;;  %v5568_v29 = vld [vmem:[#allocation11 + $0xb0] ss:$8 sps:$4 sm:$0xff]  }
 0x2b5   :  { %v1513_v37 = vmax.f32 %v1485_v33, 0.0  ;;  %5243 = vmatprep.mubr.msk.bf16.mxu1 %vm6224_vm2, %v7717_v3  ;;  %5268 = vmatpush3.bf16.msra.mxu1 %v5549_v27  ;;  %v5565_v27 = vld [vmem:[#allocation11 + $0xa0] ss:$8 sps:$4 sm:$0xff]   ;;  %v5570_v30 = vld [vmem:[#allocation11 + $0xb4] ss:$8 sps:$4 sm:$0xff]  }
 0x2b6   :  { %v1511_v40 = vmax.f32 %v1483_v35, 0.0  ;;  %5269 = vmatprep.subr.bf16.mxu1 %v7717_v3  ;;  %v5573_v33 = vld [vmem:[#allocation11 + $0xc4] ss:$8 sps:$4 sm:$0xff]   ;;  %v5574_v34 = vld [vmem:[#allocation11 + $0xd0] ss:$8 sps:$4 sm:$0xff]  }
 0x2b7   :  { %v1531_v41 = vmax.f32 %v1512_v36, %v1513_v37  ;;  %v5576_v35 = vld [vmem:[#allocation11 + $0xd4] ss:$8 sps:$4 sm:$0xff]  }
 0x2b8   :  { %v1530_v42 = vmax.f32 %v1510_v39, %v1511_v40  ;;  %v5205_v43 = vpop.f32.mrb[20].mxu0  ;;  %v5579_v39 = vld [vmem:[#allocation11 + $0xe4] ss:$8 sps:$4 sm:$0xff]  }
 0x2b9   :  { %v1488_v44 = vadd.f32 %v5205_v43, %v6804_v18  ;;  %v1400_v45 = vpop.f32.mrb[21].mxu0  ;;  %5270 = vmatpush3.bf16.msra.mxu1 %v5550_v38  ;;  %v5580_v43 = vld [vmem:[#allocation11 + $0xf0] ss:$8 sps:$4 sm:$0xff]  }
 0x2ba   :  { %v1486_v46 = vadd.f32 %v6804_v18, %v1400_v45  ;;  %v5206_v47 = vpop.f32.mrb[22].mxu0  ;;  %v1606_v48 = vpack.c.bf16 %v1531_v41, %v1530_v42  ;;  %5299 = vmatprep.subr.bf16.mxu1 %v7717_v3  ;;  %v6853_v49 = vpack.c.bf16 %v1530_v42, %v1529_v22  ;;  %v5557_v22 = vld [vmem:[#allocation8 + $0xb0] sm:$0xff]  }
 0x2bb   :  { %v1489_v50 = vadd.f32 %v5206_v47, %v6804_v18  ;;  %v1403_v51 = vpop.f32.mrb[23].mxu0  ;;  %v1516_v53 = vmax.f32 %v1488_v44, 0.0  ;;  %v5582_v42 = vld [vmem:[#allocation11 + $0xf4] ss:$8 sps:$4 sm:$0xff]   ;;  %v5585_v47 = vld [vmem:[#allocation11 + $0x4] ss:$8 sps:$4 sm:$0xff]  }
 0x2bc   :  { %v1487_v52 = vadd.f32 %v6804_v18, %v1403_v51  ;;  %5244 = vmatmul.mubr.bf16.gmra.mrb[16].mxu1 %v1606_v48  ;;  %v1514_v55 = vmax.f32 %v1486_v46, 0.0 }
 0x2bd   :  { %v1517_v54 = vmax.f32 %v1489_v50, 0.0  ;;  %5247 = vmatprep.mubr.msk.bf16.mxu1 %vm6224_vm2, %v7717_v3 }
 0x2be   :  { %v1515_v56 = vmax.f32 %v1487_v52, 0.0 }
 0x2bf   :  { %v1533_v58 = vmax.f32 %v1516_v53, %v1517_v54 }
 0x2c0   :  { %v1532_v59 = vmax.f32 %v1514_v55, %v1515_v56  ;;  %v5209_v60 = vpop.f32.mrb[24].mxu0 }
 0x2c1   :  { %v1492_v61 = vadd.f32 %v5209_v60, %v6804_v18  ;;  %v1416_v62 = vpop.f32.mrb[25].mxu0 }
 0x2c2   :  { %v1490_v63 = vadd.f32 %v6804_v18, %v1416_v62  ;;  %v5210_v0 = vpop.f32.mrb[26].mxu0  ;;  %v1607_v1 = vpack.c.bf16 %v1533_v58, %v1532_v59  ;;  %v1570_v2 = vpack.c.bf16 %v1532_v59, %v1531_v41  ;;  %v5577_v41 = vld [vmem:[#allocation11 + $0xe0] ss:$8 sps:$4 sm:$0xff]  }
 0x2c3   :  { %v1493_v4 = vadd.f32 %v5210_v0, %v6804_v18  ;;  %v1419_v5 = vpop.f32.mrb[27].mxu0  ;;  %v1520_v7 = vmax.f32 %v1492_v61, 0.0 }
 0x2c4   :  { %v1491_v6 = vadd.f32 %v6804_v18, %v1419_v5  ;;  %5248 = vmatmul.mubr.bf16.gmra.mrb[20].mxu1 %v1607_v1  ;;  %v1518_v10 = vmax.f32 %v1490_v63, 0.0  ;;  %v1565_v18 = vpack.c.bf16 %v6810_v32, %v7717_v3  ;;  %v5555_v32 = vld [vmem:[#allocation8 + $0xa0] sm:$0xff]  }
 0x2c5   :  { %v1521_v9 = vmax.f32 %v1493_v4, 0.0  ;;  %5251 = vmatprep.mubr.msk.bf16.mxu1 %vm6224_vm2, %v7717_v3 }
 0x2c6   :  { %v1519_v11 = vmax.f32 %v1491_v6, 0.0 }
 0x2c7   :  { %v1535_v8 = vmax.f32 %v1520_v7, %v1521_v9 }
 0x2c8   :  { %v1534_v13 = vmax.f32 %v1518_v10, %v1519_v11 }
 0x2ca   :  { %v1608_v14 = vpack.c.bf16 %v1535_v8, %v1534_v13  ;;  %v1571_v15 = vpack.c.bf16 %v1534_v13, %v1533_v58 }
 0x2cc   :  { %5252 = vmatmul.mubr.bf16.gmra.mrb[24].mxu1 %v1608_v14 }
 0x2cd   :  { %5271 = vmatprep.mubr.msk.bf16.mxu1 %vm6224_vm2, %v7717_v3 }
 0x2d4   :  { %5272 = vmatmul.mubr.bf16.vlgmr.msra.gmra.mrb[28].mxu1 %v1565_v18 }
 0x2d5   :  { %5300 = vmatpush3.bf16.msra.mxu1 %v5551_v16  ;;  %5275 = vmatprep.mubr.msk.bf16.mxu1 %vm6224_vm2, %v7717_v3 }
 0x2d6   :  { %5301 = vmatprep.subr.bf16.mxu1 %v7717_v3 }
 0x2d9   :  { %5302 = vmatpush3.bf16.msra.mxu1 %v5552_v17 }
 0x2da   :  { %5303 = vmatprep.subr.bf16.mxu1 %v7717_v3 }
 0x2dc   :  { %5276 = vmatmul.mubr.bf16.gmra.mrb[32].mxu1 %v6823_v57 }
 0x2dd   :  { %5279 = vmatprep.mubr.msk.bf16.mxu1 %vm6224_vm2, %v7717_v3  ;;  %5304 = vmatpush3.bf16.msra.mxu1 %v5553_v19 }
 0x2de   :  { %5305 = vmatprep.subr.bf16.mxu1 %v7717_v3 }
 0x2e1   :  { %5306 = vmatpush3.bf16.msra.mxu1 %v5554_v20 }
 0x2e2   :  { %5307 = vmatprep.subr.bf16.mxu1 %v7717_v3 }
 0x2e4   :  { %5280 = vmatmul.mubr.bf16.gmra.mrb[36].mxu1 %v6833_v12 }
 0x2e5   :  { %5283 = vmatprep.mubr.msk.bf16.mxu1 %vm6224_vm2, %v7717_v3  ;;  %5308 = vmatpush3.bf16.msra.mxu1 %v5555_v32 }
 0x2e6   :  { %5309 = vmatprep.subr.bf16.mxu1 %v7717_v3 }
 0x2e9   :  { %5310 = vmatpush3.bf16.msra.mxu1 %v5556_v21 }
 0x2ea   :  { %5311 = vmatprep.subr.bf16.mxu1 %v7717_v3 }
 0x2ec   :  { %5284 = vmatmul.mubr.bf16.gmra.mrb[40].mxu1 %v6843_v31 }
 0x2ed   :  { %5287 = vmatprep.mubr.msk.bf16.mxu1 %vm6224_vm2, %v7717_v3  ;;  %5312 = vmatpush3.bf16.msra.mxu1 %v5557_v22 }
 0x2ee   :  { %5313 = vmatprep.subr.bf16.mxu1 %v7717_v3 }
 0x2f1   :  { %5314 = vmatpush3.bf16.msra.mxu1 %v5558_v23 }
 0x2f2   :  { %2265 = vmatprep.subr.bf16.mxu1 %v5561_v24 }
 0x2f4   :  { %5288 = vmatmul.mubr.bf16.gmra.mrb[44].mxu1 %v6853_v49 }
 0x2f5   :  { %5291 = vmatprep.mubr.msk.bf16.mxu1 %vm6224_vm2, %v7717_v3 }
 0x2fc   :  { %5292 = vmatmul.mubr.bf16.gmra.mrb[48].mxu1 %v1570_v2 }
 0x2fd   :  { %5295 = vmatprep.mubr.msk.bf16.mxu1 %vm6224_vm2, %v7717_v3 }
 0x304   :  { %5296 = vmatmul.mubr.bf16.gmra.mrb[52].mxu1 %v1571_v15 }
 0x305   :  { %5315 = vmatprep.mubr.msk.bf16.mxu1 %vm6224_vm2, %v7717_v3 }
 0x30c   :  { %5316 = vmatmul.mubr.bf16.vlgmr.msra.gmra.mrb[56].mxu1 %v6823_v57  ;;  %v1921_v57 = vpack.c.bf16 %v7717_v3, %v1535_v8 }
 0x30d   :  { %5319 = vmatprep.mubr.msk.bf16.mxu1 %vm6224_vm2, %v7717_v3 }
 0x314   :  { %5320 = vmatmul.mubr.bf16.gmra.mrb[60].mxu1 %v6833_v12  ;;  %v5559_v12 = vld [vmem:[#allocation11 + $0x80] ss:$8 sps:$4 sm:$0xff]  }
 0x315   :  { %5323 = vmatprep.mubr.msk.bf16.mxu1 %vm6224_vm2, %v7717_v3  ;;  %2266 = vmatpush1.bf16.msra.mxu1 %v5559_v12 }
 0x316   :  { %2267 = vmatprep.subr.bf16.mxu1 %v5564_v26 }
 0x319   :  { %2268 = vmatpush1.bf16.msra.mxu1 %v5562_v25 }
 0x31a   :  { %2269 = vmatprep.subr.bf16.mxu1 %v5567_v28 }
 0x31c   :  { %5324 = vmatmul.mubr.bf16.gmra.mrb[64].mxu1 %v6843_v31  ;;  %v5571_v31 = vld [vmem:[#allocation11 + $0xc0] ss:$8 sps:$4 sm:$0xff]  }
 0x31d   :  { %5327 = vmatprep.mubr.msk.bf16.mxu1 %vm6224_vm2, %v7717_v3  ;;  %2270 = vmatpush1.bf16.msra.mxu1 %v5565_v27 }
 0x31e   :  { %2271 = vmatprep.subr.bf16.mxu1 %v5570_v30  ;;  %v5631_v30 = vld [vmem:[%s7701_s7] ss:$16 sps:$4 sm:$0xff]  }
 0x321   :  { %2272 = vmatpush1.bf16.msra.mxu1 %v5568_v29 }
 0x322   :  { %2273 = vmatprep.subr.bf16.mxu1 %v5573_v33  ;;  %v5639_v33 = vld [vmem:[%s7701_s7 + $0x24] ss:$16 sps:$4 sm:$0xff]  }
 0x324   :  { %5328 = vmatmul.mubr.bf16.gmra.mrb[68].mxu1 %v6853_v49  ;;  %v7719_v49 = vmov 0  }
 0x325   :  { %5331 = vmatprep.mubr.msk.bf16.mxu1 %vm6224_vm2, %v7717_v3  ;;  %2274 = vmatpush1.bf16.msra.mxu1 %v5571_v31  ;;  %v5633_v31 = vld [vmem:[%s7701_s7 + $0x4] ss:$16 sps:$4 sm:$0xff]  }
 0x326   :  { %2275 = vmatprep.subr.bf16.mxu1 %v5576_v35  ;;  %3064 = vmatprep.subr.bf16.mxu0 %v5633_v31  ;;  %v5637_v35 = vld [vmem:[%s7701_s7 + $0x20] ss:$16 sps:$4 sm:$0xff]  }
 0x327   :  { %3065 = vmatpush1.bf16.msra.mxu0 %v5631_v30  ;;  %v5691_v30 = vld [vmem:[%s7701_s7 + $0x140] ss:$16 sps:$4 sm:$0xff]  }
 0x328   :  { %3066 = vmatprep.subr.bf16.mxu0 %v5639_v33 }
 0x329   :  { %2276 = vmatpush1.bf16.msra.mxu1 %v5574_v34 }
 0x32a   :  { %2277 = vmatprep.subr.bf16.mxu1 %v5579_v39 }
 0x32b   :  { %3067 = vmatpush1.bf16.msra.mxu0 %v5637_v35 }
 0x32c   :  { %5332 = vmatmul.mubr.bf16.gmra.mrb[72].mxu1 %v1570_v2 }
 0x32d   :  { %5335 = vmatprep.mubr.msk.bf16.mxu1 %vm6224_vm2, %v7717_v3  ;;  %2278 = vmatpush1.bf16.msra.mxu1 %v5577_v41 }
 0x32e   :  { %2279 = vmatprep.subr.bf16.mxu1 %v5582_v42  ;;  %v5643_v42 = vld [vmem:[%s7701_s7 + $0x40] ss:$16 sps:$4 sm:$0xff]  }
 0x331   :  { %2280 = vmatpush1.bf16.msra.mxu1 %v5580_v43  ;;  %v5651_v43 = vld [vmem:[%s7701_s7 + $0x64] ss:$16 sps:$4 sm:$0xff]  }
 0x332   :  { %2398 = vmatprep.subr.bf16.mxu1 %v5585_v47 }
 0x334   :  { %5336 = vmatmul.mubr.bf16.gmra.mrb[76].mxu1 %v1571_v15 }
 0x335   :  { %5339 = vmatprep.mubr.msk.bf16.mxu1 %vm6224_vm2, %v7717_v3  ;;  %v7368_v3 = vld [vmem:[#allocation16 + $0xc8] ss:$16 sps:$4 sm:$0xff]  }
 0x336   :  { %7812 = vst [vmem:[#allocation51_spill] sm:$0xff] %v7368_v3 }
 0x33c   :  { %5340 = vmatmul.mubr.bf16.gmra.mrb[80].mxu1 %v1921_v57 }
 0x33d   :  { %2297 = vmatprep.mubr.bf16.mxu1 %v7719_v49 }
 0x36f   :  { %v1708_v36 = vpop.f32.mrb[0].mxu1 }
 0x370   :  { %v5229_v37 = vpop.f32.mrb[1].mxu1 }
 0x371   :  { %v1711_v38 = vpop.f32.mrb[2].mxu1 }
 0x372   :  { %v5230_v40 = vpop.f32.mrb[3].mxu1 }
 0x377   :  { %v1716_v44 = vpop.f32.mrb[4].mxu1 }
 0x378   :  { %v5233_v45 = vpop.f32.mrb[5].mxu1 }
 0x379   :  { %v1719_v46 = vpop.f32.mrb[6].mxu1  ;;  %v5649_v45 = vld [vmem:[%s7701_s7 + $0x60] ss:$16 sps:$4 sm:$0xff]  }
 0x37a   :  { %v5234_v48 = vpop.f32.mrb[7].mxu1 }
 0x37b   :  { %v5657_v48 = vld [vmem:[%s7701_s7 + $0x84] ss:$16 sps:$4 sm:$0xff]  }
 0x37f   :  { %v1724_v50 = vpop.f32.mrb[8].mxu1 }
 0x380   :  { %v5237_v51 = vpop.f32.mrb[9].mxu1 }
 0x381   :  { %v1727_v52 = vpop.f32.mrb[10].mxu1 }
 0x382   :  { %v5238_v53 = vpop.f32.mrb[11].mxu1 }
 0x383   :  { %v5655_v53 = vld [vmem:[%s7701_s7 + $0x80] ss:$16 sps:$4 sm:$0xff]  }
 0x387   :  { %v1732_v54 = vpop.f32.mrb[12].mxu1 }
 0x388   :  { %v5241_v55 = vpop.f32.mrb[13].mxu1 }
 0x389   :  { %v1735_v56 = vpop.f32.mrb[14].mxu1 }
 0x38a   :  { %v5242_v58 = vpop.f32.mrb[15].mxu1 }
 0x38f   :  { %v1740_v59 = vpop.f32.mrb[16].mxu1 }
 0x390   :  { %v5245_v60 = vpop.f32.mrb[17].mxu1 }
 0x391   :  { %v1743_v61 = vpop.f32.mrb[18].mxu1 }
 0x392   :  { %v5246_v62 = vpop.f32.mrb[19].mxu1 }
 0x393   :  { %v5667_v62 = vld [vmem:[%s7701_s7 + $0xc0] ss:$16 sps:$4 sm:$0xff]  }
 0x397   :  { %v1748_v63 = vpop.f32.mrb[20].mxu1 }
 0x398   :  { %v5249_v0 = vpop.f32.mrb[21].mxu1 }
 0x399   :  { %v1751_v1 = vpop.f32.mrb[22].mxu1 }
 0x39a   :  { %v5250_v2 = vpop.f32.mrb[23].mxu1 }
 0x39b   :  { %v5673_v2 = vld [vmem:[%s7701_s7 + $0xe0] ss:$16 sps:$4 sm:$0xff]  }
 0x39f   :  { %v1756_v4 = vpop.f32.mrb[24].mxu1 }
 0x3a0   :  { %v5253_v5 = vpop.f32.mrb[25].mxu1 }
 0x3a1   :  { %v1759_v6 = vpop.f32.mrb[26].mxu1 }
 0x3a2   :  { %v5254_v7 = vpop.f32.mrb[27].mxu1  ;;  %v5681_v6 = vld [vmem:[%s7701_s7 + $0x104] ss:$16 sps:$4 sm:$0xff]  }
 0x3a7   :  { %v1845_v9 = vpop.f32.mrb[28].mxu1 }
 0x3a8   :  { %v6912_v10 = vadd.f32 %v1845_v9, %v1708_v36  ;;  %v5273_v11 = vpop.f32.mrb[29].mxu1 }
 0x3a9   :  { %v1848_v8 = vpop.f32.mrb[30].mxu1 }
 0x3aa   :  { %v6914_v13 = vadd.f32 %v1848_v8, %v1711_v38  ;;  %v5274_v14 = vpop.f32.mrb[31].mxu1  ;;  %v5645_v38 = vld [vmem:[%s7701_s7 + $0x44] ss:$16 sps:$4 sm:$0xff]  }
 0x3ab   :  { %3068 = vmatprep.subr.bf16.mxu0 %v5645_v38  ;;  %v5679_v14 = vld [vmem:[%s7701_s7 + $0x100] ss:$16 sps:$4 sm:$0xff]  }
 0x3ac   :  { %3069 = vmatpush1.bf16.msra.mxu0 %v5643_v42 }
 0x3ad   :  { %3070 = vmatprep.subr.bf16.mxu0 %v5651_v43 }
 0x3af   :  { %v1853_v15 = vpop.f32.mrb[32].mxu1 }
 0x3b0   :  { %v6916_v16 = vadd.f32 %v1853_v15, %v1716_v44  ;;  %v5277_v18 = vpop.f32.mrb[33].mxu1  ;;  %3071 = vmatpush1.bf16.msra.mxu0 %v5649_v45 }
 0x3b1   :  { %v1856_v17 = vpop.f32.mrb[34].mxu1  ;;  %3072 = vmatprep.subr.bf16.mxu0 %v5657_v48 }
 0x3b2   :  { %v6918_v19 = vadd.f32 %v1856_v17, %v1719_v46  ;;  %v5278_v20 = vpop.f32.mrb[35].mxu1 }
 0x3b4   :  { %3073 = vmatpush1.bf16.msra.mxu0 %v5655_v53 }
 0x3b7   :  { %v1861_v32 = vpop.f32.mrb[36].mxu1 }
 0x3b8   :  { %v6920_v21 = vadd.f32 %v1861_v32, %v1724_v50  ;;  %v5281_v22 = vpop.f32.mrb[37].mxu1 }
 0x3b9   :  { %v1864_v23 = vpop.f32.mrb[38].mxu1 }
 0x3ba   :  { %v6922_v57 = vadd.f32 %v1864_v23, %v1727_v52  ;;  %v5282_v12 = vpop.f32.mrb[39].mxu1 }
 0x3bb   :  { %v5693_v12 = vld [vmem:[%s7701_s7 + $0x144] ss:$16 sps:$4 sm:$0xff]  }
 0x3bf   :  { %v1869_v24 = vpop.f32.mrb[40].mxu1 }
 0x3c0   :  { %v6924_v25 = vadd.f32 %v1869_v24, %v1732_v54  ;;  %v5285_v26 = vpop.f32.mrb[41].mxu1  ;;  %v5663_v54 = vld [vmem:[%s7701_s7 + $0xa4] ss:$16 sps:$4 sm:$0xff]  }
 0x3c1   :  { %v1872_v27 = vpop.f32.mrb[42].mxu1  ;;  %3074 = vmatprep.subr.bf16.mxu0 %v5663_v54  ;;  %v5583_v54 = vld [vmem:[#allocation11] ss:$8 sps:$4 sm:$0xff]  }
 0x3c2   :  { %v6926_v28 = vadd.f32 %v1872_v27, %v1735_v56  ;;  %v5286_v29 = vpop.f32.mrb[43].mxu1  ;;  %v5661_v56 = vld [vmem:[%s7701_s7 + $0xa0] ss:$16 sps:$4 sm:$0xff]  }
 0x3c3   :  { %3075 = vmatpush1.bf16.msra.mxu0 %v5661_v56 }
 0x3c7   :  { %v1877_v34 = vpop.f32.mrb[44].mxu1 }
 0x3c8   :  { %v6940_v36 = vadd.f32 %v1877_v34, %v1740_v59  ;;  %v5289_v37 = vpop.f32.mrb[45].mxu1  ;;  %v5669_v59 = vld [vmem:[%s7701_s7 + $0xc4] ss:$16 sps:$4 sm:$0xff]  }
 0x3c9   :  { %v1880_v39 = vpop.f32.mrb[46].mxu1  ;;  %3076 = vmatprep.subr.bf16.mxu0 %v5669_v59 }
 0x3ca   :  { %v6945_v40 = vadd.f32 %v1880_v39, %v1743_v61  ;;  %v5290_v41 = vpop.f32.mrb[47].mxu1  ;;  %3077 = vmatpush1.bf16.msra.mxu0 %v5667_v62 }
 0x3cf   :  { %v1885_v44 = vpop.f32.mrb[48].mxu1 }
 0x3d0   :  { %v6956_v46 = vadd.f32 %v1885_v44, %v1748_v63  ;;  %v5293_v47 = vpop.f32.mrb[49].mxu1  ;;  %v5675_v63 = vld [vmem:[%s7701_s7 + $0xe4] ss:$16 sps:$4 sm:$0xff]  }
 0x3d1   :  { %v1888_v50 = vpop.f32.mrb[50].mxu1  ;;  %3078 = vmatprep.subr.bf16.mxu0 %v5675_v63  ;;  %v5591_v63 = vld [vmem:[#allocation11 + $0x24] ss:$8 sps:$4 sm:$0xff]  }
 0x3d2   :  { %v6961_v51 = vadd.f32 %v1888_v50, %v1751_v1  ;;  %v5294_v52 = vpop.f32.mrb[51].mxu1  ;;  %v6981_v1 = vld [vmem:[#allocation10] ss:$0 sm:$0xff]  ;;  %3079 = vmatpush1.bf16.msra.mxu0 %v5673_v2 }
 0x3d3   :  { %3080 = vmatprep.subr.bf16.mxu0 %v5681_v6  ;;  %v5589_v6 = vld [vmem:[#allocation11 + $0x20] ss:$8 sps:$4 sm:$0xff]  }
 0x3d6   :  { %3081 = vmatpush1.bf16.msra.mxu0 %v5679_v14 }
 0x3d7   :  { %v1893_v55 = vpop.f32.mrb[52].mxu1 }
 0x3d8   :  { %v5297_v58 = vpop.f32.mrb[53].mxu1 }
 0x3d9   :  { %v1896_v60 = vpop.f32.mrb[54].mxu1 }
 0x3da   :  { %v5298_v61 = vpop.f32.mrb[55].mxu1 }
 0x3db   :  { %v5586_v61 = vld [vmem:[#allocation11 + $0x10] ss:$8 sps:$4 sm:$0xff]  }
 0x3df   :  { %v2021_v0 = vpop.f32.mrb[56].mxu1 }
 0x3e0   :  { %v2076_v4 = vadd.f32 %v2021_v0, %v6912_v10  ;;  %v5317_v5 = vpop.f32.mrb[57].mxu1  ;;  %v5687_v10 = vld [vmem:[%s7701_s7 + $0x124] ss:$16 sps:$4 sm:$0xff]  }
 0x3e1   :  { %v2024_v7 = vpop.f32.mrb[58].mxu1  ;;  %3082 = vmatprep.subr.bf16.mxu0 %v5687_v10  ;;  %v5592_v10 = vld [vmem:[#allocation11 + $0x30] ss:$8 sps:$4 sm:$0xff]  }
 0x3e2   :  { %v2097_v9 = vadd.f32 %v6981_v1, %v2076_v4  ;;  %v2077_v11 = vadd.f32 %v2024_v7, %v6914_v13  ;;  %v5318_v8 = vpop.f32.mrb[59].mxu1  ;;  %v5685_v13 = vld [vmem:[%s7701_s7 + $0x120] ss:$16 sps:$4 sm:$0xff]  }
 0x3e3   :  { %3083 = vmatpush1.bf16.msra.mxu0 %v5685_v13  ;;  %v5594_v8 = vld [vmem:[#allocation11 + $0x34] ss:$8 sps:$4 sm:$0xff]  }
 0x3e4   :  { %v2098_v15 = vadd.f32 %v6981_v1, %v2077_v11  ;;  %v2111_v18 = vmax.f32 %v2097_v9, 0.0  ;;  %3084 = vmatprep.subr.bf16.mxu0 %v5693_v12  ;;  %v5595_v12 = vld [vmem:[#allocation11 + $0x40] ss:$8 sps:$4 sm:$0xff]  }
 0x3e6   :  { %v2112_v17 = vmax.f32 %v2098_v15, 0.0 }
 0x3e7   :  { %v2029_v20 = vpop.f32.mrb[60].mxu1  ;;  %3085 = vmatpush1.bf16.msra.mxu0 %v5691_v30  ;;  %v5600_v30 = vld [vmem:[#allocation11 + $0x54] ss:$8 sps:$4 sm:$0xff]  }
 0x3e8   :  { %v7002_v32 = vmax.f32 %v2111_v18, %v2112_v17  ;;  %v2078_v22 = vadd.f32 %v2029_v20, %v6916_v16  ;;  %v5321_v23 = vpop.f32.mrb[61].mxu1 }
 0x3e9   :  { %v2032_v24 = vpop.f32.mrb[62].mxu1 }
 0x3ea   :  { %v2099_v26 = vadd.f32 %v6981_v1, %v2078_v22  ;;  %v2079_v27 = vadd.f32 %v2032_v24, %v6918_v19  ;;  %v5322_v29 = vpop.f32.mrb[63].mxu1 }
 0x3ec   :  { %v2100_v31 = vadd.f32 %v6981_v1, %v2079_v27  ;;  %v2113_v16 = vmax.f32 %v2099_v26, 0.0 }
 0x3ee   :  { %v2114_v33 = vmax.f32 %v2100_v31, 0.0 }
 0x3ef   :  { %v2037_v34 = vpop.f32.mrb[64].mxu1 }
 0x3f0   :  { %v7014_v35 = vmax.f32 %v2113_v16, %v2114_v33  ;;  %v2080_v37 = vadd.f32 %v2037_v34, %v6920_v21  ;;  %v5325_v38 = vpop.f32.mrb[65].mxu1  ;;  %v5598_v16 = vld [vmem:[#allocation11 + $0x50] ss:$8 sps:$4 sm:$0xff]   ;;  %v5603_v34 = vld [vmem:[#allocation11 + $0x64] ss:$8 sps:$4 sm:$0xff]  }
 0x3f1   :  { %v2040_v39 = vpop.f32.mrb[66].mxu1 }
 0x3f2   :  { %v2143_v19 = vpack.c.bf16 %v7014_v35, %v7002_v32  ;;  %v2101_v41 = vadd.f32 %v6981_v1, %v2080_v37  ;;  %v2081_v42 = vadd.f32 %v2040_v39, %v6922_v57  ;;  %v5326_v43 = vpop.f32.mrb[67].mxu1  ;;  %v5588_v57 = vld [vmem:[#allocation11 + $0x14] ss:$8 sps:$4 sm:$0xff]   ;;  %v5619_v32 = vld [vmem:[#allocation11 + $0x140] ss:$8 sps:$4 sm:$0xff]  }
 0x3f3   :  { %v5606_v43 = vld [vmem:[#allocation11 + $0x74] ss:$8 sps:$4 sm:$0xff]  }
 0x3f4   :  { %v2102_v44 = vadd.f32 %v6981_v1, %v2081_v42  ;;  %v2115_v45 = vmax.f32 %v2101_v41, 0.0  ;;  %v5601_v41 = vld [vmem:[#allocation11 + $0x60] ss:$8 sps:$4 sm:$0xff]  }
 0x3f6   :  { %v2116_v47 = vmax.f32 %v2102_v44, 0.0  ;;  %v5604_v44 = vld [vmem:[#allocation11 + $0x70] ss:$8 sps:$4 sm:$0xff]  }
 0x3f7   :  { %v2045_v48 = vpop.f32.mrb[68].mxu1 }
 0x3f8   :  { %v2127_v50 = vmax.f32 %v2115_v45, %v2116_v47  ;;  %v2082_v52 = vadd.f32 %v2045_v48, %v6924_v25  ;;  %v5329_v53 = vpop.f32.mrb[69].mxu1  ;;  %v5609_v45 = vld [vmem:[#allocation11 + $0x104] ss:$8 sps:$4 sm:$0xff]   ;;  %v5607_v47 = vld [vmem:[#allocation11 + $0x100] ss:$8 sps:$4 sm:$0xff]  }
 0x3f9   :  { %v2048_v21 = vpop.f32.mrb[70].mxu1  ;;  %v5612_v48 = vld [vmem:[#allocation11 + $0x114] ss:$8 sps:$4 sm:$0xff]   ;;  %v5613_v53 = vld [vmem:[#allocation11 + $0x120] ss:$8 sps:$4 sm:$0xff]  }
 0x3fa   :  { %v2166_v55 = vpack.c.bf16 %v2127_v50, %v7014_v35  ;;  %v2103_v56 = vadd.f32 %v6981_v1, %v2082_v52  ;;  %v2083_v58 = vadd.f32 %v2048_v21, %v6926_v28  ;;  %v5330_v59 = vpop.f32.mrb[71].mxu1  ;;  %v5615_v52 = vld [vmem:[#allocation11 + $0x124] ss:$8 sps:$4 sm:$0xff]   ;;  %v5618_v21 = vld [vmem:[#allocation11 + $0x134] ss:$8 sps:$4 sm:$0xff]  }
 0x3fb   :  { %v5624_v35 = vld [vmem:[#allocation11 + $0x154] ss:$8 sps:$4 sm:$0xff]  }
 0x3fc   :  { %v2104_v60 = vadd.f32 %v6981_v1, %v2083_v58  ;;  %2298 = vmatmul.mubr.bf16.vlgmr.msra.gmra.mrb[84].mxu1 %v2166_v55  ;;  %v2117_v62 = vmax.f32 %v2103_v56, 0.0  ;;  %v5621_v55 = vld [vmem:[#allocation11 + $0x144] ss:$8 sps:$4 sm:$0xff]   ;;  %v5625_v58 = vld [vmem:[#allocation11 + $0x160] ss:$8 sps:$4 sm:$0xff]  }
 0x3fd   :  { %2399 = vmatpush1.bf16.msra.mxu1 %v5583_v54  ;;  %2307 = vmatprep.mubr.bf16.mxu1 %v7719_v49  ;;  %v5616_v54 = vld [vmem:[#allocation11 + $0x130] ss:$8 sps:$4 sm:$0xff]   ;;  %v5627_v56 = vld [vmem:[#allocation11 + $0x164] ss:$8 sps:$4 sm:$0xff]   ;;  %v5630_v59 = vld [vmem:[#allocation11 + $0x174] ss:$8 sps:$4 sm:$0xff]  }
 0x3fe   :  { %v2118_v25 = vmax.f32 %v2104_v60, 0.0  ;;  %2400 = vmatprep.subr.bf16.mxu1 %v5588_v57  ;;  %v5628_v57 = vld [vmem:[#allocation11 + $0x170] ss:$8 sps:$4 sm:$0xff]  }
 0x3ff   :  { %v2053_v0 = vpop.f32.mrb[72].mxu1  ;;  %v5636_v60 = vld [vmem:[%s7701_s7 + $0xc] ss:$16 sps:$4 sm:$0xff]  }
 0x400   :  { %v2128_v2 = vmax.f32 %v2117_v62, %v2118_v25  ;;  %v2084_v4 = vadd.f32 %v2053_v0, %v6940_v36  ;;  %v5333_v5 = vpop.f32.mrb[73].mxu1  ;;  %v5597_v36 = vld [vmem:[#allocation11 + $0x44] ss:$8 sps:$4 sm:$0xff]   ;;  %v5642_v62 = vld [vmem:[%s7701_s7 + $0x2c] ss:$16 sps:$4 sm:$0xff]  }
 0x401   :  { %2401 = vmatpush1.bf16.msra.mxu1 %v5586_v61  ;;  %v2056_v28 = vpop.f32.mrb[74].mxu1  ;;  %v5634_v61 = vld [vmem:[%s7701_s7 + $0x8] ss:$16 sps:$4 sm:$0xff]   ;;  %v5660_v5 = vld [vmem:[%s7701_s7 + $0x8c] ss:$16 sps:$4 sm:$0xff]  }
 0x402   :  { %v2105_v7 = vadd.f32 %v6981_v1, %v2084_v4  ;;  %v2085_v9 = vadd.f32 %v2056_v28, %v6945_v40  ;;  %v5334_v11 = vpop.f32.mrb[75].mxu1  ;;  %2402 = vmatprep.subr.bf16.mxu1 %v5591_v63  ;;  %v7031_v14 = vpack.c.bf16 %v2128_v2, %v2127_v50  ;;  %v5610_v50 = vld [vmem:[#allocation11 + $0x110] ss:$8 sps:$4 sm:$0xff]   ;;  %v5640_v25 = vld [vmem:[%s7701_s7 + $0x28] ss:$16 sps:$4 sm:$0xff]  }
 0x403   :  { %v5648_v63 = vld [vmem:[%s7701_s7 + $0x4c] ss:$16 sps:$4 sm:$0xff]   ;;  %v5646_v0 = vld [vmem:[%s7701_s7 + $0x48] ss:$16 sps:$4 sm:$0xff]  }
 0x404   :  { %v2106_v15 = vadd.f32 %v6981_v1, %v2085_v9  ;;  %v2119_v18 = vmax.f32 %v2105_v7, 0.0  ;;  %v5652_v4 = vld [vmem:[%s7701_s7 + $0x68] ss:$16 sps:$4 sm:$0xff]   ;;  %v5672_v9 = vld [vmem:[%s7701_s7 + $0xcc] ss:$16 sps:$4 sm:$0xff]  }
 0x405   :  { %2403 = vmatpush1.bf16.msra.mxu1 %v5589_v6  ;;  %v5658_v28 = vld [vmem:[%s7701_s7 + $0x88] ss:$16 sps:$4 sm:$0xff]   ;;  %v5666_v6 = vld [vmem:[%s7701_s7 + $0xac] ss:$16 sps:$4 sm:$0xff]  }
 0x406   :  { %v2120_v17 = vmax.f32 %v2106_v15, 0.0  ;;  %2404 = vmatprep.subr.bf16.mxu1 %v5594_v8  ;;  %v5664_v7 = vld [vmem:[%s7701_s7 + $0xa8] ss:$16 sps:$4 sm:$0xff]   ;;  %v5678_v8 = vld [vmem:[%s7701_s7 + $0xec] ss:$16 sps:$4 sm:$0xff]  }
 0x407   :  { %v2061_v20 = vpop.f32.mrb[76].mxu1  ;;  %v5670_v11 = vld [vmem:[%s7701_s7 + $0xc8] ss:$16 sps:$4 sm:$0xff]   ;;  %v5684_v15 = vld [vmem:[%s7701_s7 + $0x10c] ss:$16 sps:$4 sm:$0xff]  }
 0x408   :  { %v7034_v13 = vmax.f32 %v2119_v18, %v2120_v17  ;;  %v2086_v22 = vadd.f32 %v2061_v20, %v6956_v46  ;;  %v5337_v23 = vpop.f32.mrb[77].mxu1  ;;  %v5690_v18 = vld [vmem:[%s7701_s7 + $0x12c] ss:$16 sps:$4 sm:$0xff]   ;;  %v5688_v17 = vld [vmem:[%s7701_s7 + $0x128] ss:$16 sps:$4 sm:$0xff]  }
 0x409   :  { %2405 = vmatpush1.bf16.msra.mxu1 %v5592_v10  ;;  %v2064_v40 = vpop.f32.mrb[78].mxu1  ;;  %v5682_v10 = vld [vmem:[%s7701_s7 + $0x108] ss:$16 sps:$4 sm:$0xff]   ;;  %v5702_v23 = vld [vmem:[%s7701_s7 + $0x16c] ss:$16 sps:$4 sm:$0xff]  }
 0x40a   :  { %v2107_v24 = vadd.f32 %v6981_v1, %v2086_v22  ;;  %v2087_v26 = vadd.f32 %v2064_v40, %v6961_v51  ;;  %v5338_v27 = vpop.f32.mrb[79].mxu1  ;;  %2406 = vmatprep.subr.bf16.mxu1 %v5597_v36  ;;  %v2167_v29 = vpack.c.bf16 %v7034_v13, %v2128_v2  ;;  %v5654_v2 = vld [vmem:[%s7701_s7 + $0x6c] ss:$16 sps:$4 sm:$0xff]   ;;  %v5694_v20 = vld [vmem:[%s7701_s7 + $0x148] ss:$16 sps:$4 sm:$0xff]  }
 0x40b   :  { %v5696_v36 = vld [vmem:[%s7701_s7 + $0x14c] ss:$16 sps:$4 sm:$0xff]   ;;  %v5697_v22 = vld [vmem:[%s7701_s7 + $0x160] ss:$16 sps:$4 sm:$0xff]   ;;  %v5700_v40 = vld [vmem:[%s7701_s7 + $0x168] ss:$16 sps:$4 sm:$0xff]  }
 0x40c   :  { %v2108_v31 = vadd.f32 %v6981_v1, %v2087_v26  ;;  %2308 = vmatmul.mubr.bf16.gmra.mrb[88].mxu1 %v2167_v29  ;;  %v2121_v46 = vmax.f32 %v2107_v24, 0.0  ;;  %v5703_v24 = vld [vmem:[%s7701_s7 + $0x180] ss:$16 sps:$4 sm:$0xff]   ;;  %v5708_v26 = vld [vmem:[%s7701_s7 + $0x18c] ss:$16 sps:$4 sm:$0xff]  }
 0x40d   :  { %2407 = vmatpush1.bf16.msra.mxu1 %v5595_v12  ;;  %2430 = vmatprep.mubr.bf16.mxu1 %v7719_v49  ;;  %v5705_v12 = vld [vmem:[%s7701_s7 + $0x184] ss:$16 sps:$4 sm:$0xff]   ;;  %v5706_v27 = vld [vmem:[%s7701_s7 + $0x188] ss:$16 sps:$4 sm:$0xff]  }
 0x40e   :  { %v2122_v33 = vmax.f32 %v2108_v31, 0.0  ;;  %2408 = vmatprep.subr.bf16.mxu1 %v5600_v30  ;;  %v5711_v29 = vld [vmem:[%s7701_s7 + $0x1a4] ss:$16 sps:$4 sm:$0xff]   ;;  %v5709_v30 = vld [vmem:[%s7701_s7 + $0x1a0] ss:$16 sps:$4 sm:$0xff]  }
 0x40f   :  { %v2069_v37 = vpop.f32.mrb[80].mxu1  ;;  %v5714_v31 = vld [vmem:[%s7701_s7 + $0x1ac] ss:$16 sps:$4 sm:$0xff]  }
 0x410   :  { %v7042_v38 = vmax.f32 %v2121_v46, %v2122_v33  ;;  %v5341_v51 = vpop.f32.mrb[81].mxu1  ;;  %v5717_v46 = vld [vmem:[%s7701_s7 + $0x1c4] ss:$16 sps:$4 sm:$0xff]   ;;  %v5715_v33 = vld [vmem:[%s7701_s7 + $0x1c0] ss:$16 sps:$4 sm:$0xff]  }
 0x411   :  { %2409 = vmatpush1.bf16.msra.mxu1 %v5598_v16  ;;  %v2072_v39 = vpop.f32.mrb[82].mxu1  ;;  %v5712_v16 = vld [vmem:[%s7701_s7 + $0x1a8] ss:$16 sps:$4 sm:$0xff]   ;;  %v5721_v51 = vld [vmem:[%s7701_s7 + $0x1e0] ss:$16 sps:$4 sm:$0xff]  }
 0x412   :  { %v5342_v42 = vpop.f32.mrb[83].mxu1  ;;  %2410 = vmatprep.subr.bf16.mxu1 %v5603_v34  ;;  %v2457_v1 = vpack.c.bf16 %v7042_v38, %v7034_v13  ;;  %v5699_v13 = vld [vmem:[%s7701_s7 + $0x164] ss:$16 sps:$4 sm:$0xff]   ;;  %v5720_v34 = vld [vmem:[%s7701_s7 + $0x1cc] ss:$16 sps:$4 sm:$0xff]  }
 0x413   :  { %3086 = vmatprep.subr.bf16.mxu0 %v5699_v13  ;;  %v5718_v37 = vld [vmem:[%s7701_s7 + $0x1c8] ss:$16 sps:$4 sm:$0xff]   ;;  %v5723_v38 = vld [vmem:[%s7701_s7 + $0x1e4] ss:$16 sps:$4 sm:$0xff]   ;;  %v5726_v39 = vld [vmem:[%s7701_s7 + $0x1ec] ss:$16 sps:$4 sm:$0xff]  }
 0x414   :  { %3087 = vmatpush1.bf16.msra.mxu0 %v5697_v22  ;;  %v7180_v42 = vld [vmem:[#allocation14 + $0x4] ss:$16 sps:$4 sm:$0xff]   ;;  %v7205_v13 = vld [vmem:[#allocation14 + $0x40] ss:$16 sps:$4 sm:$0xff]  }
 0x415   :  { %2411 = vmatpush1.bf16.msra.mxu1 %v5601_v41  ;;  %3088 = vmatprep.subr.bf16.mxu0 %v5705_v12  ;;  %v5724_v41 = vld [vmem:[%s7701_s7 + $0x1e8] ss:$16 sps:$4 sm:$0xff]  }
 0x416   :  { %2412 = vmatprep.subr.bf16.mxu1 %v5606_v43  ;;  %v2618_v43 = vlaneseq  ;;  %v7208_v22 = vld [vmem:[#allocation14 + $0x64] ss:$16 sps:$4 sm:$0xff]   ;;  %v7217_v12 = vld [vmem:[#allocation14 + $0x80] ss:$16 sps:$4 sm:$0xff]  }
 0x418   :  { %3089 = vmatpush1.bf16.msra.mxu0 %v5703_v24  ;;  %v7220_v24 = vld [vmem:[#allocation14 + $0xa4] ss:$16 sps:$4 sm:$0xff]  }
 0x419   :  { %2413 = vmatpush1.bf16.msra.mxu1 %v5604_v44  ;;  %3090 = vmatprep.subr.bf16.mxu0 %v5711_v29  ;;  %v7229_v29 = vld [vmem:[#allocation14 + $0xc0] ss:$16 sps:$4 sm:$0xff]  }
 0x41a   :  { %2555 = vmatprep.subr.bf16.mxu1 %v5609_v45  ;;  %v2616_v45 = vld [vmem:[#allocation13] sm:$0x3] }
 0x41c   :  { %2431 = vmatmul.mubr.bf16.vlgmr.msra.gmra.mrb[84].mxu1 %v2143_v19  ;;  %v5622_v19 = vld [vmem:[#allocation11 + $0x150] ss:$8 sps:$4 sm:$0xff]   ;;  %3091 = vmatpush1.bf16.msra.mxu0 %v5709_v30 }
 0x41d   :  { %2556 = vmatpush1.bf16.msra.mxu1 %v5607_v47  ;;  %2440 = vmatprep.mubr.bf16.mxu1 %v7719_v49  ;;  %v7232_v30 = vld [vmem:[#allocation14 + $0xe4] ss:$16 sps:$4 sm:$0xff]  }
 0x41e   :  { %2557 = vmatprep.subr.bf16.mxu1 %v5612_v48  ;;  %3092 = vmatprep.subr.bf16.mxu0 %v5717_v46  ;;  %v7241_v46 = vld [vmem:[#allocation14 + $0x8] ss:$16 sps:$4 sm:$0xff]  }
 0x420   :  { %3093 = vmatpush1.bf16.msra.mxu0 %v5715_v33  ;;  %v7244_v33 = vld [vmem:[#allocation14 + $0x2c] ss:$16 sps:$4 sm:$0xff]  }
 0x421   :  { %2558 = vmatpush1.bf16.msra.mxu1 %v5610_v50  ;;  %3094 = vmatprep.subr.bf16.mxu0 %v5723_v38  ;;  %v7255_v38 = vld [vmem:[#allocation14 + $0x48] ss:$16 sps:$4 sm:$0xff]  }
 0x422   :  { %2559 = vmatprep.subr.bf16.mxu1 %v5615_v52 }
 0x424   :  { %2441 = vmatmul.mubr.bf16.gmra.mrb[88].mxu1 %v7031_v14  ;;  %3095 = vmatpush1.bf16.msra.mxu0 %v5721_v51  ;;  %v7258_v51 = vld [vmem:[#allocation14 + $0x6c] ss:$16 sps:$4 sm:$0xff]  }
 0x425   :  { %2560 = vmatpush1.bf16.msra.mxu1 %v5613_v53  ;;  %2587 = vmatprep.mubr.bf16.mxu1 %v7719_v49 }
 0x426   :  { %2561 = vmatprep.subr.bf16.mxu1 %v5618_v21  ;;  %3440 = vmatprep.subr.bf16.mxu0 %v7180_v42 }
 0x429   :  { %2562 = vmatpush1.bf16.msra.mxu1 %v5616_v54 }
 0x42a   :  { %2563 = vmatprep.subr.bf16.mxu1 %v5621_v55 }
 0x42d   :  { %2564 = vmatpush1.bf16.msra.mxu1 %v5619_v32 }
 0x42e   :  { %2565 = vmatprep.subr.bf16.mxu1 %v5624_v35 }
 0x431   :  { %2566 = vmatpush1.bf16.msra.mxu1 %v5622_v19 }
 0x432   :  { %2567 = vmatprep.subr.bf16.mxu1 %v5627_v56 }
 0x435   :  { %2568 = vmatpush1.bf16.msra.mxu1 %v5625_v58 }
 0x436   :  { %2569 = vmatprep.subr.bf16.mxu1 %v5630_v59 }
 0x439   :  { %2570 = vmatpush1.bf16.msra.mxu1 %v5628_v57 }
 0x43a   :  { %3107 = vmatprep.subr.bf16.mxu1 %v5636_v60 }
 0x43c   :  { %2588 = vmatmul.mubr.bf16.vlgmr.msra.gmra.mrb[84].mxu1 %v7031_v14  ;;  %v5676_v14 = vld [vmem:[%s7701_s7 + $0xe8] ss:$16 sps:$4 sm:$0xff]  }
 0x43d   :  { %2597 = vmatprep.mubr.bf16.mxu1 %v7719_v49  ;;  %3108 = vmatpush1.bf16.msra.mxu1 %v5634_v61 }
 0x43e   :  { %3109 = vmatprep.subr.bf16.mxu1 %v5642_v62 }
 0x441   :  { %3110 = vmatpush1.bf16.msra.mxu1 %v5640_v25 }
 0x442   :  { %3111 = vmatprep.subr.bf16.mxu1 %v5648_v63 }
 0x444   :  { %2598 = vmatmul.mubr.bf16.gmra.mrb[88].mxu1 %v2457_v1  ;;  %v7183_v1 = vshrl.u32 %v2618_v43, 7  ;;  %v7267_v43 = vld [vmem:[#allocation14 + $0x88] ss:$16 sps:$4 sm:$0xff]  }
 0x445   :  { %3112 = vmatpush1.bf16.msra.mxu1 %v5646_v0 }
 0x446   :  { %3113 = vmatprep.subr.bf16.mxu1 %v5654_v2  ;;  %7790 = vst [vmem:[#allocation29_spill] sm:$0xff] %v7183_v1  ;;  %v7186_v44 = vsub.s32 0, %v7183_v1  ;;  %v7189_v47 = vsub.s32 1, %v7183_v1 }
 0x448   :  { %7791 = vst [vmem:[#allocation30_spill] sm:$0xff] %v7186_v44  ;;  %7792 = vst [vmem:[#allocation31_spill] sm:$0xff] %v7189_v47  ;;  %v2621_v48 = vrot.slane %v2616_v45, %v7186_v44  ;;  %v2625_v50 = vrot.slane %v2616_v45, %v7189_v47  ;;  %v7270_v45 = vld [vmem:[#allocation14 + $0xac] ss:$16 sps:$4 sm:$0xff]  }
 0x449   :  { %3114 = vmatpush1.bf16.msra.mxu1 %v5652_v4 }
 0x44a   :  { %3115 = vmatprep.subr.bf16.mxu1 %v5660_v5 }
 0x44d   :  { %3116 = vmatpush1.bf16.msra.mxu1 %v5658_v28 }
 0x44e   :  { %3117 = vmatprep.subr.bf16.mxu1 %v5666_v6 }
 0x451   :  { %3118 = vmatpush1.bf16.msra.mxu1 %v5664_v7 }
 0x452   :  { %3119 = vmatprep.subr.bf16.mxu1 %v5672_v9 }
 0x455   :  { %3120 = vmatpush1.bf16.msra.mxu1 %v5670_v11 }
 0x456   :  { %3121 = vmatprep.subr.bf16.mxu1 %v5678_v8 }
 0x459   :  { %3122 = vmatpush1.bf16.msra.mxu1 %v5676_v14 }
 0x45a   :  { %3123 = vmatprep.subr.bf16.mxu1 %v5684_v15 }
 0x45d   :  { %3124 = vmatpush1.bf16.msra.mxu1 %v5682_v10 }
 0x45e   :  { %3125 = vmatprep.subr.bf16.mxu1 %v5690_v18  ;;  %v7193_v18 = vld [vmem:[#allocation14] ss:$16 sps:$4 sm:$0xff]  }
 0x461   :  { %3126 = vmatpush1.bf16.msra.mxu1 %v5688_v17  ;;  %v7195_v17 = vld [vmem:[#allocation14 + $0x24] ss:$16 sps:$4 sm:$0xff]  }
 0x462   :  { %3127 = vmatprep.subr.bf16.mxu1 %v5696_v36  ;;  %v7198_v36 = vld [vmem:[#allocation14 + $0x20] ss:$16 sps:$4 sm:$0xff]  }
 0x465   :  { %3128 = vmatpush1.bf16.msra.mxu1 %v5694_v20  ;;  %v7202_v20 = vld [vmem:[#allocation14 + $0x44] ss:$16 sps:$4 sm:$0xff]  }
 0x466   :  { %3129 = vmatprep.subr.bf16.mxu1 %v5702_v23  ;;  %v7211_v23 = vld [vmem:[#allocation14 + $0x60] ss:$16 sps:$4 sm:$0xff]  }
 0x469   :  { %3130 = vmatpush1.bf16.msra.mxu1 %v5700_v40  ;;  %v7214_v40 = vld [vmem:[#allocation14 + $0x84] ss:$16 sps:$4 sm:$0xff]  }
 0x46a   :  { %3131 = vmatprep.subr.bf16.mxu1 %v5708_v26  ;;  %v7223_v26 = vld [vmem:[#allocation14 + $0xa0] ss:$16 sps:$4 sm:$0xff]  }
 0x46d   :  { %3132 = vmatpush1.bf16.msra.mxu1 %v5706_v27  ;;  %v7226_v27 = vld [vmem:[#allocation14 + $0xc4] ss:$16 sps:$4 sm:$0xff]  }
 0x46e   :  { %3133 = vmatprep.subr.bf16.mxu1 %v5714_v31  ;;  %v7235_v31 = vld [vmem:[#allocation14 + $0xe0] ss:$16 sps:$4 sm:$0xff]  }
 0x471   :  { %3134 = vmatpush1.bf16.msra.mxu1 %v5712_v16  ;;  %v7238_v16 = vld [vmem:[#allocation14 + $0xc] ss:$16 sps:$4 sm:$0xff]  }
 0x472   :  { %3135 = vmatprep.subr.bf16.mxu1 %v5720_v34  ;;  %v7248_v34 = vld [vmem:[#allocation14 + $0x28] ss:$16 sps:$4 sm:$0xff]  }
 0x475   :  { %3136 = vmatpush1.bf16.msra.mxu1 %v5718_v37  ;;  %v7252_v37 = vld [vmem:[#allocation14 + $0x4c] ss:$16 sps:$4 sm:$0xff]  }
 0x476   :  { %3137 = vmatprep.subr.bf16.mxu1 %v5726_v39  ;;  %v7261_v39 = vld [vmem:[#allocation14 + $0x68] ss:$16 sps:$4 sm:$0xff]  }
 0x479   :  { %3138 = vmatpush1.bf16.msra.mxu1 %v5724_v41  ;;  %v7264_v41 = vld [vmem:[#allocation14 + $0x8c] ss:$16 sps:$4 sm:$0xff]  }
 0x50f   :  { %v2589_v52 = vpop.f32.mrb[84].mxu1 }
 0x510   :  { %v2628_v53 = vadd.f32 %v2621_v48, %v2589_v52  ;;  %v2591_v21 = vpop.f32.mrb[85].mxu1  ;;  %v7279_v52 = vld [vmem:[#allocation14 + $0xc8] ss:$16 sps:$4 sm:$0xff]  }
 0x511   :  { %v2629_v54 = vadd.f32 %v2625_v50, %v2591_v21  ;;  %v2593_v55 = vpop.f32.mrb[86].mxu1  ;;  %v7285_v21 = vld [vmem:[#allocation14 + $0xe8] ss:$16 sps:$4 sm:$0xff]  }
 0x512   :  { %v2630_v32 = vadd.f32 %v2621_v48, %v2593_v55  ;;  %v2595_v35 = vpop.f32.mrb[87].mxu1  ;;  %v2636_v56 = vmax.f32 %v2628_v53, 0.0  ;;  %v7282_v53 = vld [vmem:[#allocation14 + $0xec] ss:$16 sps:$4 sm:$0xff]  }
 0x513   :  { %v2631_v19 = vadd.f32 %v2625_v50, %v2595_v35  ;;  %v2637_v59 = vmax.f32 %v2629_v54, 0.0  ;;  %v7290_v54 = vld [vmem:[#allocation16 + $0x4] ss:$16 sps:$4 sm:$0xff]   ;;  %v7292_v55 = vld [vmem:[#allocation16 + $0xc] ss:$16 sps:$4 sm:$0xff]  }
 0x514   :  { %v2638_v58 = vmax.f32 %v2630_v32, 0.0  ;;  %v7294_v32 = vld [vmem:[#allocation16] ss:$16 sps:$4 sm:$0xff]   ;;  %v7296_v35 = vld [vmem:[#allocation16 + $0x8] ss:$16 sps:$4 sm:$0xff]   ;;  %3872 = vmatprep.subr.bf16.mxu1 %v7290_v54 }
 0x515   :  { %v2639_v57 = vmax.f32 %v2631_v19, 0.0  ;;  %v7302_v19 = vld [vmem:[#allocation16 + $0x24] ss:$16 sps:$4 sm:$0xff]  }
 0x516   :  { %v2644_v60 = vmax.f32 %v2636_v56, %v2638_v58  ;;  %v7304_v56 = vld [vmem:[#allocation16 + $0x2c] ss:$16 sps:$4 sm:$0xff]   ;;  %v7306_v58 = vld [vmem:[#allocation16 + $0x20] ss:$16 sps:$4 sm:$0xff]  }
 0x517   :  { %v2645_v61 = vmax.f32 %v2637_v59, %v2639_v57  ;;  %v2599_v62 = vpop.f32.mrb[88].mxu1  ;;  %v7308_v59 = vld [vmem:[#allocation16 + $0x28] ss:$16 sps:$4 sm:$0xff]   ;;  %v7314_v57 = vld [vmem:[#allocation16 + $0x44] ss:$16 sps:$4 sm:$0xff]  }
 0x518   :  { %v2632_v25 = vadd.f32 %v2621_v48, %v2599_v62  ;;  %v2601_v63 = vpop.f32.mrb[89].mxu1  ;;  %7793 = vst [vmem:[#allocation32_spill] sm:$0xff] %v7314_v57  ;;  %v7320_v62 = vld [vmem:[#allocation16 + $0x48] ss:$16 sps:$4 sm:$0xff]  }
 0x519   :  { %v2633_v0 = vadd.f32 %v2625_v50, %v2601_v63  ;;  %v2603_v2 = vpop.f32.mrb[90].mxu1  ;;  %7796 = vst [vmem:[#allocation35_spill] sm:$0xff] %v7320_v62  ;;  %v7328_v63 = vld [vmem:[#allocation16 + $0x6c] ss:$16 sps:$4 sm:$0xff]  }
 0x51a   :  { %v2634_v4 = vadd.f32 %v2621_v48, %v2603_v2  ;;  %v2605_v5 = vpop.f32.mrb[91].mxu1  ;;  %v2640_v6 = vmax.f32 %v2632_v25, 0.0  ;;  %v7273_v48 = vld [vmem:[#allocation14 + $0xa8] ss:$16 sps:$4 sm:$0xff]   ;;  %v7326_v25 = vld [vmem:[#allocation16 + $0x64] ss:$16 sps:$4 sm:$0xff]  }
 0x51b   :  { %v2635_v28 = vadd.f32 %v2625_v50, %v2605_v5  ;;  %v2641_v9 = vmax.f32 %v2633_v0, 0.0  ;;  %v7276_v50 = vld [vmem:[#allocation14 + $0xcc] ss:$16 sps:$4 sm:$0xff]   ;;  %7797 = vst [vmem:[#allocation36_spill] sm:$0xff] %v7326_v25  ;;  %7798 = vst [vmem:[#allocation37_spill] sm:$0xff] %v7328_v63 }
 0x51c   :  { %v2642_v7 = vmax.f32 %v2634_v4, 0.0  ;;  %v7330_v0 = vld [vmem:[#allocation16 + $0x60] ss:$16 sps:$4 sm:$0xff]   ;;  %v7332_v2 = vld [vmem:[#allocation16 + $0x68] ss:$16 sps:$4 sm:$0xff]  }
 0x51d   :  { %v2643_v11 = vmax.f32 %v2635_v28, 0.0  ;;  %7799 = vst [vmem:[#allocation38_spill] sm:$0xff] %v7330_v0  ;;  %7800 = vst [vmem:[#allocation39_spill] sm:$0xff] %v7332_v2  ;;  %v7338_v4 = vld [vmem:[#allocation16 + $0x84] ss:$16 sps:$4 sm:$0xff]  }
 0x51e   :  { %v2646_v8 = vmax.f32 %v2640_v6, %v2642_v7  ;;  %7801 = vst [vmem:[#allocation40_spill] sm:$0xff] %v7338_v4  ;;  %v7340_v5 = vld [vmem:[#allocation16 + $0x8c] ss:$16 sps:$4 sm:$0xff]   ;;  %v7342_v28 = vld [vmem:[#allocation16 + $0x80] ss:$16 sps:$4 sm:$0xff]  }
 0x51f   :  { %v2647_v14 = vmax.f32 %v2641_v9, %v2643_v11  ;;  %7802 = vst [vmem:[#allocation41_spill] sm:$0xff] %v7340_v5  ;;  %7803 = vst [vmem:[#allocation42_spill] sm:$0xff] %v7342_v28  ;;  %v7344_v6 = vld [vmem:[#allocation16 + $0x88] ss:$16 sps:$4 sm:$0xff]   ;;  %v7350_v7 = vld [vmem:[#allocation16 + $0xa4] ss:$16 sps:$4 sm:$0xff]  }
 0x520   :  { %v2656_v15 = vpack.c.bf16 %v2646_v8, %v2644_v60  ;;  %v7316_v60 = vld [vmem:[#allocation16 + $0x4c] ss:$16 sps:$4 sm:$0xff]   ;;  %7804 = vst [vmem:[#allocation43_spill] sm:$0xff] %v7344_v6  ;;  %7805 = vst [vmem:[#allocation44_spill] sm:$0xff] %v7350_v7  ;;  %v7354_v11 = vld [vmem:[#allocation16 + $0xa0] ss:$16 sps:$4 sm:$0xff]  }
 0x521   :  { %v2657_v10 = vpack.c.bf16 %v2647_v14, %v2645_v61  ;;  %7794 = vst [vmem:[#allocation33_spill] sm:$0xff] %v7316_v60  ;;  %v7318_v61 = vld [vmem:[#allocation16 + $0x40] ss:$16 sps:$4 sm:$0xff]   ;;  %v7352_v9 = vld [vmem:[#allocation16 + $0xac] ss:$16 sps:$4 sm:$0xff]   ;;  %7807 = vst [vmem:[#allocation46_spill] sm:$0xff] %v7354_v11 }
 0x522   :  { %7795 = vst [vmem:[#allocation34_spill] sm:$0xff] %v7318_v61  ;;  %7806 = vst [vmem:[#allocation45_spill] sm:$0xff] %v7352_v9  ;;  %v7356_v8 = vld [vmem:[#allocation16 + $0xa8] ss:$16 sps:$4 sm:$0xff]   ;;  %v7362_v14 = vld [vmem:[#allocation16 + $0xc4] ss:$16 sps:$4 sm:$0xff]  }
 0x523   :  { %3096 = vmatprep.mubr.bf16.mxu0 %v2657_v10  ;;  %3139 = vmatprep.mubr.bf16.mxu1 %v2657_v10  ;;  %7808 = vst [vmem:[#allocation47_spill] sm:$0xff] %v7356_v8  ;;  %7809 = vst [vmem:[#allocation48_spill] sm:$0xff] %v7362_v14  ;;  %v7366_v10 = vld [vmem:[#allocation16 + $0xc0] ss:$16 sps:$4 sm:$0xff]  }
 0x524   :  { %3097 = vmatmul.mubr.bf16.vlgmr.msra.gmra.mrb[28].mxu0 %v2656_v15  ;;  %3140 = vmatmul.mubr.bf16.vlgmr.msra.gmra.mrb[92].mxu1 %v2656_v15  ;;  %v7364_v15 = vld [vmem:[#allocation16 + $0xcc] ss:$16 sps:$4 sm:$0xff]   ;;  %7811 = vst [vmem:[#allocation50_spill] sm:$0xff] %v7366_v10 }
 0x525   :  { %3441 = vmatpush1.bf16.msra.mxu0 %v7193_v18  ;;  %3472 = vmatprep.mubr.bf16.mxu0 %v7719_v49  ;;  %7810 = vst [vmem:[#allocation49_spill] sm:$0xff] %v7364_v15 }
 0x526   :  { %3442 = vmatprep.subr.bf16.mxu0 %v7195_v17  ;;  %3873 = vmatpush1.bf16.msra.mxu1 %v7294_v32 }
 0x527   :  { %3874 = vmatprep.subr.bf16.mxu1 %v7302_v19 }
 0x529   :  { %3443 = vmatpush1.bf16.msra.mxu0 %v7198_v36 }
 0x52a   :  { %3444 = vmatprep.subr.bf16.mxu0 %v7202_v20  ;;  %3875 = vmatpush1.bf16.msra.mxu1 %v7306_v58 }
 0x52b   :  { %3876 = vmatprep.subr.bf16.mxu1 %v7314_v57 }
 0x52d   :  { %3445 = vmatpush1.bf16.msra.mxu0 %v7205_v13 }
 0x52e   :  { %3446 = vmatprep.subr.bf16.mxu0 %v7208_v22  ;;  %3877 = vmatpush1.bf16.msra.mxu1 %v7318_v61 }
 0x52f   :  { %3878 = vmatprep.subr.bf16.mxu1 %v7326_v25 }
 0x531   :  { %3447 = vmatpush1.bf16.msra.mxu0 %v7211_v23 }
 0x532   :  { %3448 = vmatprep.subr.bf16.mxu0 %v7214_v40  ;;  %3879 = vmatpush1.bf16.msra.mxu1 %v7330_v0 }
 0x533   :  { %3880 = vmatprep.subr.bf16.mxu1 %v7338_v4 }
 0x535   :  { %3449 = vmatpush1.bf16.msra.mxu0 %v7217_v12 }
 0x536   :  { %3450 = vmatprep.subr.bf16.mxu0 %v7220_v24  ;;  %3881 = vmatpush1.bf16.msra.mxu1 %v7342_v28 }
 0x537   :  { %3882 = vmatprep.subr.bf16.mxu1 %v7350_v7  ;;  %v7454_v7 = vld [vmem:[#allocation16 + $0x1c4] ss:$16 sps:$4 sm:$0xff]  }
 0x538   :  { %7841 = vst [vmem:[#allocation80_spill] sm:$0xff] %v7454_v7 }
 0x539   :  { %3451 = vmatpush1.bf16.msra.mxu0 %v7223_v26 }
 0x53a   :  { %3452 = vmatprep.subr.bf16.mxu0 %v7226_v27  ;;  %3883 = vmatpush1.bf16.msra.mxu1 %v7354_v11  ;;  %v7376_v11 = vld [vmem:[#allocation16 + $0xec] ss:$16 sps:$4 sm:$0xff]  }
 0x53b   :  { %3884 = vmatprep.subr.bf16.mxu1 %v7362_v14  ;;  %7814 = vst [vmem:[#allocation53_spill] sm:$0xff] %v7376_v11  ;;  %v7392_v14 = vld [vmem:[#allocation16 + $0x108] ss:$16 sps:$4 sm:$0xff]  }
 0x53c   :  { %7820 = vst [vmem:[#allocation59_spill] sm:$0xff] %v7392_v14 }
 0x53d   :  { %3453 = vmatpush1.bf16.msra.mxu0 %v7229_v29 }
 0x53e   :  { %3454 = vmatprep.subr.bf16.mxu0 %v7232_v30  ;;  %3885 = vmatpush1.bf16.msra.mxu1 %v7366_v10  ;;  %v7388_v10 = vld [vmem:[#allocation16 + $0x10c] ss:$16 sps:$4 sm:$0xff]  }
 0x53f   :  { %7818 = vst [vmem:[#allocation57_spill] sm:$0xff] %v7388_v10 }
 0x541   :  { %3455 = vmatpush1.bf16.msra.mxu0 %v7235_v31 }
 0x542   :  { %3481 = vmatprep.subr.bf16.mxu0 %v7238_v16 }
 0x544   :  { %3473 = vmatmul.mubr.bf16.vlgmr.msra.gmra.mrb[32].mxu0 %v7719_v49 }
 0x545   :  { %3482 = vmatpush1.bf16.msra.mxu0 %v7241_v46  ;;  %3513 = vmatprep.mubr.bf16.mxu0 %v7719_v49 }
 0x546   :  { %3483 = vmatprep.subr.bf16.mxu0 %v7244_v33 }
 0x549   :  { %3484 = vmatpush1.bf16.msra.mxu0 %v7248_v34 }
 0x54a   :  { %3485 = vmatprep.subr.bf16.mxu0 %v7252_v37 }
 0x54d   :  { %3486 = vmatpush1.bf16.msra.mxu0 %v7255_v38 }
 0x54e   :  { %3487 = vmatprep.subr.bf16.mxu0 %v7258_v51 }
 0x551   :  { %3488 = vmatpush1.bf16.msra.mxu0 %v7261_v39 }
 0x552   :  { %3489 = vmatprep.subr.bf16.mxu0 %v7264_v41 }
 0x555   :  { %3490 = vmatpush1.bf16.msra.mxu0 %v7267_v43 }
 0x556   :  { %3491 = vmatprep.subr.bf16.mxu0 %v7270_v45 }
 0x559   :  { %3492 = vmatpush1.bf16.msra.mxu0 %v7273_v48 }
 0x55a   :  { %3493 = vmatprep.subr.bf16.mxu0 %v7276_v50 }
 0x55d   :  { %3494 = vmatpush1.bf16.msra.mxu0 %v7279_v52 }
 0x55e   :  { %3495 = vmatprep.subr.bf16.mxu0 %v7282_v53 }
 0x561   :  { %3496 = vmatpush1.bf16.msra.mxu0 %v7285_v21 }
 0x562   :  { %3913 = vmatprep.subr.bf16.mxu0 %v7292_v55 }
 0x564   :  { %3514 = vmatmul.mubr.bf16.vlgmr.msra.gmra.mrb[36].mxu0 %v7719_v49  ;;  %v7374_v49 = vld [vmem:[#allocation16 + $0xe4] ss:$16 sps:$4 sm:$0xff]  }
 0x565   :  { %3914 = vmatpush1.bf16.msra.mxu0 %v7296_v35  ;;  %7813 = vst [vmem:[#allocation52_spill] sm:$0xff] %v7374_v49  ;;  %3886 = vmatprep.subr.bf16.mxu1 %v7374_v49  ;;  %v7404_v49 = vld [vmem:[#allocation16 + $0x128] ss:$16 sps:$4 sm:$0xff]  }
 0x566   :  { %3915 = vmatprep.subr.bf16.mxu0 %v7304_v56  ;;  %7824 = vst [vmem:[#allocation63_spill] sm:$0xff] %v7404_v49 }
 0x569   :  { %3916 = vmatpush1.bf16.msra.mxu0 %v7308_v59 }
 0x56a   :  { %3917 = vmatprep.subr.bf16.mxu0 %v7316_v60 }
 0x56d   :  { %3918 = vmatpush1.bf16.msra.mxu0 %v7320_v62 }
 0x56e   :  { %3919 = vmatprep.subr.bf16.mxu0 %v7328_v63 }
 0x571   :  { %3920 = vmatpush1.bf16.msra.mxu0 %v7332_v2 }
 0x572   :  { %3921 = vmatprep.subr.bf16.mxu0 %v7340_v5 }
 0x575   :  { %3922 = vmatpush1.bf16.msra.mxu0 %v7344_v6  ;;  %v7457_v6 = vld [vmem:[#allocation16 + $0x1cc] ss:$16 sps:$4 sm:$0xff]  }
 0x576   :  { %3923 = vmatprep.subr.bf16.mxu0 %v7352_v9  ;;  %v7380_v9 = vld [vmem:[#allocation16 + $0xe8] ss:$16 sps:$4 sm:$0xff]   ;;  %7842 = vst [vmem:[#allocation81_spill] sm:$0xff] %v7457_v6 }
 0x577   :  { %7816 = vst [vmem:[#allocation55_spill] sm:$0xff] %v7380_v9 }
 0x579   :  { %3924 = vmatpush1.bf16.msra.mxu0 %v7356_v8  ;;  %v7378_v8 = vld [vmem:[#allocation16 + $0xe0] ss:$16 sps:$4 sm:$0xff]  }
 0x57a   :  { %3925 = vmatprep.subr.bf16.mxu0 %v7364_v15  ;;  %7815 = vst [vmem:[#allocation54_spill] sm:$0xff] %v7378_v8  ;;  %3887 = vmatpush1.bf16.msra.mxu1 %v7378_v8  ;;  %v7386_v15 = vld [vmem:[#allocation16 + $0x104] ss:$16 sps:$4 sm:$0xff]   ;;  %v7400_v8 = vld [vmem:[#allocation16 + $0x12c] ss:$16 sps:$4 sm:$0xff]  }
 0x57b   :  { %7817 = vst [vmem:[#allocation56_spill] sm:$0xff] %v7386_v15  ;;  %3888 = vmatprep.subr.bf16.mxu1 %v7386_v15  ;;  %7822 = vst [vmem:[#allocation61_spill] sm:$0xff] %v7400_v8  ;;  %v7416_v15 = vld [vmem:[#allocation16 + $0x148] ss:$16 sps:$4 sm:$0xff]  }
 0x57c   :  { %7828 = vst [vmem:[#allocation67_spill] sm:$0xff] %v7416_v15 }
 0x57d   :  { %3926 = vmatpush1.bf16.msra.mxu0 %v7368_v3  ;;  %v7390_v3 = vld [vmem:[#allocation16 + $0x100] ss:$16 sps:$4 sm:$0xff]  }
 0x57e   :  { %3927 = vmatprep.subr.bf16.mxu0 %v7376_v11  ;;  %7819 = vst [vmem:[#allocation58_spill] sm:$0xff] %v7390_v3  ;;  %3889 = vmatpush1.bf16.msra.mxu1 %v7390_v3  ;;  %v7398_v11 = vld [vmem:[#allocation16 + $0x124] ss:$16 sps:$4 sm:$0xff]   ;;  %v7412_v3 = vld [vmem:[#allocation16 + $0x14c] ss:$16 sps:$4 sm:$0xff]  }
 0x57f   :  { %7821 = vst [vmem:[#allocation60_spill] sm:$0xff] %v7398_v11  ;;  %3890 = vmatprep.subr.bf16.mxu1 %v7398_v11  ;;  %7826 = vst [vmem:[#allocation65_spill] sm:$0xff] %v7412_v3  ;;  %v7428_v11 = vld [vmem:[#allocation16 + $0x168] ss:$16 sps:$4 sm:$0xff]  }
 0x580   :  { %7832 = vst [vmem:[#allocation71_spill] sm:$0xff] %v7428_v11 }
 0x581   :  { %3928 = vmatpush1.bf16.msra.mxu0 %v7380_v9  ;;  %v7402_v9 = vld [vmem:[#allocation16 + $0x120] ss:$16 sps:$4 sm:$0xff]  }
 0x582   :  { %3929 = vmatprep.subr.bf16.mxu0 %v7388_v10  ;;  %7823 = vst [vmem:[#allocation62_spill] sm:$0xff] %v7402_v9  ;;  %3891 = vmatpush1.bf16.msra.mxu1 %v7402_v9  ;;  %v7410_v10 = vld [vmem:[#allocation16 + $0x144] ss:$16 sps:$4 sm:$0xff]   ;;  %v7424_v9 = vld [vmem:[#allocation16 + $0x16c] ss:$16 sps:$4 sm:$0xff]  }
 0x583   :  { %7825 = vst [vmem:[#allocation64_spill] sm:$0xff] %v7410_v10  ;;  %3892 = vmatprep.subr.bf16.mxu1 %v7410_v10  ;;  %7830 = vst [vmem:[#allocation69_spill] sm:$0xff] %v7424_v9  ;;  %v7440_v10 = vld [vmem:[#allocation16 + $0x188] ss:$16 sps:$4 sm:$0xff]  }
 0x584   :  { %7836 = vst [vmem:[#allocation75_spill] sm:$0xff] %v7440_v10 }
 0x585   :  { %3930 = vmatpush1.bf16.msra.mxu0 %v7392_v14  ;;  %v7414_v14 = vld [vmem:[#allocation16 + $0x140] ss:$16 sps:$4 sm:$0xff]  }
 0x586   :  { %3931 = vmatprep.subr.bf16.mxu0 %v7400_v8  ;;  %7827 = vst [vmem:[#allocation66_spill] sm:$0xff] %v7414_v14  ;;  %3893 = vmatpush1.bf16.msra.mxu1 %v7414_v14  ;;  %v7422_v8 = vld [vmem:[#allocation16 + $0x164] ss:$16 sps:$4 sm:$0xff]   ;;  %v7436_v14 = vld [vmem:[#allocation16 + $0x18c] ss:$16 sps:$4 sm:$0xff]  }
 0x587   :  { %7829 = vst [vmem:[#allocation68_spill] sm:$0xff] %v7422_v8  ;;  %3894 = vmatprep.subr.bf16.mxu1 %v7422_v8  ;;  %7834 = vst [vmem:[#allocation73_spill] sm:$0xff] %v7436_v14  ;;  %v7452_v8 = vld [vmem:[#allocation16 + $0x1ac] ss:$16 sps:$4 sm:$0xff]  }
 0x588   :  { %7840 = vst [vmem:[#allocation79_spill] sm:$0xff] %v7452_v8 }
 0x589   :  { %3932 = vmatpush1.bf16.msra.mxu0 %v7404_v49  ;;  %v7426_v49 = vld [vmem:[#allocation16 + $0x160] ss:$16 sps:$4 sm:$0xff]  }
 0x58a   :  { %3933 = vmatprep.subr.bf16.mxu0 %v7412_v3  ;;  %7831 = vst [vmem:[#allocation70_spill] sm:$0xff] %v7426_v49  ;;  %3895 = vmatpush1.bf16.msra.mxu1 %v7426_v49  ;;  %v7434_v3 = vld [vmem:[#allocation16 + $0x184] ss:$16 sps:$4 sm:$0xff]  }
 0x58b   :  { %7833 = vst [vmem:[#allocation72_spill] sm:$0xff] %v7434_v3  ;;  %3896 = vmatprep.subr.bf16.mxu1 %v7434_v3  ;;  %v7448_v49 = vld [vmem:[#allocation16 + $0x1a4] ss:$16 sps:$4 sm:$0xff]   ;;  %v7470_v3 = vld [vmem:[#allocation16 + $0x1ec] ss:$16 sps:$4 sm:$0xff]  }
 0x58c   :  { %7838 = vst [vmem:[#allocation77_spill] sm:$0xff] %v7448_v49  ;;  %7846 = vst [vmem:[#allocation85_spill] sm:$0xff] %v7470_v3 }
 0x58d   :  { %3934 = vmatpush1.bf16.msra.mxu0 %v7416_v15  ;;  %v7438_v15 = vld [vmem:[#allocation16 + $0x180] ss:$16 sps:$4 sm:$0xff]  }
 0x58e   :  { %3935 = vmatprep.subr.bf16.mxu0 %v7424_v9  ;;  %7835 = vst [vmem:[#allocation74_spill] sm:$0xff] %v7438_v15  ;;  %3897 = vmatpush1.bf16.msra.mxu1 %v7438_v15  ;;  %v7446_v9 = vld [vmem:[#allocation16 + $0x1a0] ss:$16 sps:$4 sm:$0xff]  }
 0x58f   :  { %7837 = vst [vmem:[#allocation76_spill] sm:$0xff] %v7446_v9  ;;  %3898 = vmatprep.subr.bf16.mxu1 %v7448_v49  ;;  %v7461_v15 = vld [vmem:[#allocation16 + $0x1c0] ss:$16 sps:$4 sm:$0xff]   ;;  %v6226_v49 = vmov 0.0|0.0  }
 0x590   :  { %7843 = vst [vmem:[#allocation82_spill] sm:$0xff] %v7461_v15  ;;  %3904 = vmatprep.mubr.bf16.mxu1 %v6226_v49  ;;  %3945 = vmatprep.mubr.bf16.mxu0 %v6226_v49  ;;  %v7773_v49 = vsub.s32 2, %v7183_v1 }
 0x591   :  { %3936 = vmatpush1.bf16.msra.mxu0 %v7428_v11  ;;  %v7450_v11 = vld [vmem:[#allocation16 + $0x1a8] ss:$16 sps:$4 sm:$0xff]  }
 0x592   :  { %3937 = vmatprep.subr.bf16.mxu0 %v7436_v14  ;;  %7839 = vst [vmem:[#allocation78_spill] sm:$0xff] %v7450_v11  ;;  %3899 = vmatpush1.bf16.msra.mxu1 %v7446_v9  ;;  %v7467_v14 = vld [vmem:[#allocation16 + $0x1e4] ss:$16 sps:$4 sm:$0xff]   ;;  %v7473_v9 = vld [vmem:[#allocation16 + $0x1e0] ss:$16 sps:$4 sm:$0xff]  }
 0x593   :  { %3900 = vmatprep.subr.bf16.mxu1 %v7454_v7  ;;  %7845 = vst [vmem:[#allocation84_spill] sm:$0xff] %v7467_v14  ;;  %7847 = vst [vmem:[#allocation86_spill] sm:$0xff] %v7473_v9  ;;  %v7477_v7 = vld [vmem:[#allocation16 + $0x1e8] ss:$16 sps:$4 sm:$0xff]  }
 0x594   :  { %7848 = vst [vmem:[#allocation87_spill] sm:$0xff] %v7477_v7 }
 0x595   :  { %3938 = vmatpush1.bf16.msra.mxu0 %v7440_v10  ;;  %v7465_v10 = vld [vmem:[#allocation16 + $0x1c8] ss:$16 sps:$4 sm:$0xff]  }
 0x596   :  { %3939 = vmatprep.subr.bf16.mxu0 %v7452_v8  ;;  %7844 = vst [vmem:[#allocation83_spill] sm:$0xff] %v7465_v10  ;;  %3901 = vmatpush1.bf16.msra.mxu1 %v7461_v15 }
 0x597   :  { %3902 = vmatprep.subr.bf16.mxu1 %v7467_v14  ;;  %v7781_v14 = vsub.s32 3, %v7183_v1 }
 0x599   :  { %3940 = vmatpush1.bf16.msra.mxu0 %v7450_v11 }
 0x59a   :  { %3941 = vmatprep.subr.bf16.mxu0 %v7457_v6  ;;  %3903 = vmatpush1.bf16.msra.mxu1 %v7473_v9 }
 0x59b   :  { %3987 = vmatprep.subr.bf16.mxu1 %v7180_v42 }
 0x59d   :  { %3942 = vmatpush1.bf16.msra.mxu0 %v7465_v10  ;;  %v2722_v10 = vld [vmem:[%s7703_s9] sm:$0xf] }
 0x59e   :  { %3943 = vmatprep.subr.bf16.mxu0 %v7470_v3  ;;  %v2727_v3 = vrot.slane %v2722_v10, %v7186_v44  ;;  %v2735_v9 = vrot.slane %v2722_v10, %v7773_v49  ;;  %v2731_v42 = vrot.slane %v2722_v10, %v7189_v47 }
 0x5a1   :  { %3944 = vmatpush1.bf16.msra.mxu0 %v7477_v7 }
 0x5a2   :  { %4028 = vmatprep.subr.bf16.mxu0 %v7238_v16  ;;  %v2739_v16 = vrot.slane %v2722_v10, %v7781_v14 }
 0x5f7   :  { %v3098_v15 = vpop.f32.mrb[28].mxu0  ;;  %v3141_v6 = vpop.f32.mrb[92].mxu1 }
 0x5f8   :  { %v3100_v7 = vpop.f32.mrb[29].mxu0  ;;  %v3143_v11 = vpop.f32.mrb[93].mxu1  ;;  %v3099_v49 = vadd.f32 %v3098_v15, %v2727_v3 }
 0x5f9   :  { %v3102_v8 = vpop.f32.mrb[30].mxu0  ;;  %v3145_v28 = vpop.f32.mrb[94].mxu1  ;;  %v3101_v25 = vadd.f32 %v3100_v7, %v2731_v42 }
 0x5fa   :  { %v7495_v5 = vadd.f32 %v3102_v8, %v2727_v3  ;;  %v7497_v4 = vadd.f32 %v3145_v28, %v2735_v9  ;;  %v3104_v2 = vpop.f32.mrb[31].mxu0  ;;  %v3147_v0 = vpop.f32.mrb[95].mxu1 }
 0x5fb   :  { %v7499_v63 = vadd.f32 %v3104_v2, %v2731_v42  ;;  %v7501_v44 = vadd.f32 %v3147_v0, %v2739_v16  ;;  %v3142_v0 = vadd.f32 %v3141_v6, %v2735_v9 }
 0x5fc   :  { %7849 = vst [vmem:[#allocation88_spill] sm:$0xff] %v7495_v5  ;;  %7850 = vst [vmem:[#allocation89_spill] sm:$0xff] %v7497_v4 }
 0x5fd   :  { %7851 = vst [vmem:[#allocation90_spill] sm:$0xff] %v7499_v63  ;;  %7852 = vst [vmem:[#allocation91_spill] sm:$0xff] %v7501_v44  ;;  %v3144_v44 = vadd.f32 %v3143_v11, %v2739_v16  ;;  %v7853_v16 = vmov 0  }
 0x617   :  { %v3474_v62 = vpop.f32.mrb[32].mxu0 }
 0x618   :  { %v3522_v61 = vadd.f32 %v3474_v62, %v3099_v49  ;;  %v3476_v47 = vpop.f32.mrb[33].mxu0 }
 0x619   :  { %v3523_v60 = vadd.f32 %v3476_v47, %v3101_v25  ;;  %v3478_v1 = vpop.f32.mrb[34].mxu0 }
 0x61a   :  { %v3479_v10 = vpop.f32.mrb[35].mxu0  ;;  %v3526_v57 = vsub.f32 0.0, %v3522_v61 }
 0x61b   :  { %v3532_v14 = vsub.f32 0.0, %v3523_v60  ;;  %v7892_v10 = vld [vmem:[#allocation70_spill] sm:$0xff] }
 0x61c   :  { %v3527_v5 = vmul.f32 1.442695, %v3526_v57 }
 0x61d   :  { %v3533_v8 = vmul.f32 1.442695, %v3532_v14 }
 0x61f   :  { %5884 = vpow2.f32 %v3533_v8  ;;  %v7893_v8 = vld [vmem:[#allocation71_spill] sm:$0xff] }
 0x620   :  { %5886 = vpow2.f32 %v3527_v5 }
 0x629   :  { %v5885_v28 = vpop.eup %5884 }
 0x62a   :  { %v5887_v4 = vpop.eup %5886  ;;  %v3535_v2 = vadd.f32 1.0, %v5885_v28  ;;  %v7894_v28 = vld [vmem:[#allocation72_spill] sm:$0xff] }
 0x62b   :  { %v3529_v63 = vadd.f32 1.0, %v5887_v4 }
 0x62c   :  { %5888 = vrcp.f32 %v3535_v2  ;;  %v7895_v2 = vld [vmem:[#allocation73_spill] sm:$0xff] }
 0x62d   :  { %5890 = vrcp.f32 %v3529_v63 }
 0x636   :  { %v5889_v57 = vpop.eup %5888 }
 0x637   :  { %v3515_v3 = vpop.f32.mrb[36].mxu0  ;;  %v5891_v5 = vpop.eup %5890  ;;  %v3545_v15 = vmul.f32 0.0, %v5889_v57  ;;  %v7905_v57 = vld [vmem:[#allocation83_spill] sm:$0xff] }
 0x638   :  { %v3524_v7 = vadd.f32 %v3515_v3, %v3142_v0  ;;  %v3517_v62 = vpop.f32.mrb[37].mxu0  ;;  %v7896_v0 = vld [vmem:[#allocation74_spill] sm:$0xff]  ;;  %v7897_v3 = vld [vmem:[#allocation75_spill] sm:$0xff] }
 0x639   :  { %v3525_v47 = vadd.f32 %v3517_v62, %v3144_v44  ;;  %v3519_v1 = vpop.f32.mrb[38].mxu0  ;;  %v7899_v62 = vld [vmem:[#allocation79_spill] sm:$0xff] }
 0x63a   :  { %5892 = vtanh.f32 %v3524_v7  ;;  %v3520_v60 = vpop.f32.mrb[39].mxu0  ;;  %v7898_v7 = vld [vmem:[#allocation77_spill] sm:$0xff]  ;;  %v7901_v1 = vld [vmem:[#allocation78_spill] sm:$0xff] }
 0x63b   :  { %v3539_v61 = vsub.f32 0.0, %v3525_v47  ;;  %v7900_v47 = vld [vmem:[#allocation76_spill] sm:$0xff] }
 0x63c   :  { %v7902_v60 = vld [vmem:[#allocation80_spill] sm:$0xff] }
 0x63d   :  { %v3540_v25 = vmul.f32 1.442695, %v3539_v61  ;;  %v7903_v61 = vld [vmem:[#allocation81_spill] sm:$0xff] }
 0x63f   :  { %5894 = vpow2.f32 %v3540_v25  ;;  %v7904_v25 = vld [vmem:[#allocation82_spill] sm:$0xff] }
 0x644   :  { %v5893_v14 = vpop.eup %5892 }
 0x645   :  { %v3546_v49 = vmul.f32 %v5893_v14, %v5891_v5  ;;  %v7906_v5 = vld [vmem:[#allocation84_spill] sm:$0xff]  ;;  %v7907_v14 = vld [vmem:[#allocation85_spill] sm:$0xff] }
 0x647   :  { %v7503_v4 = vadd.f32 %v3546_v49, %v3545_v15  ;;  %v7908_v15 = vld [vmem:[#allocation86_spill] sm:$0xff]  ;;  %v7909_v49 = vld [vmem:[#allocation87_spill] sm:$0xff] }
 0x649   :  { %v5895_v6 = vpop.eup %5894  ;;  %5896 = vtanh.f32 %v7503_v4 }
 0x64a   :  { %v3542_v9 = vadd.f32 1.0, %v5895_v6  ;;  %v7910_v6 = vmov 0.0  }
 0x64c   :  { %5898 = vrcp.f32 %v3542_v9  ;;  %v3254_v9 = vld [vmem:[%s7705_s11] sm:$0xf] }
 0x653   :  { %v5897_v63 = vpop.eup %5896 }
 0x656   :  { %v5899_v44 = vpop.eup %5898 }
 0x657   :  { %v3549_v11 = vmul.f32 %v5899_v44, %v5897_v63  ;;  %v7911_v63 = vld [vmem:[#allocation30_spill] sm:$0xff] }
 0x658   :  { %v7608_v44 = vrot.slane %v3254_v9, %v7911_v63 }
 0x659   :  { %v3550_v42 = vpack.c.bf16 %v3549_v11, %v3549_v11  ;;  %v7912_v11 = vld [vmem:[#allocation31_spill] sm:$0xff] }
 0x65b   :  { %3905 = vmatmul.mubr.bf16.vlgmr.msra.gmra.mrb[96].mxu1 %v3550_v42  ;;  %3946 = vmatmul.mubr.bf16.vlgmr.msra.gmra.mrb[40].mxu0 %v3550_v42 }
 0x65c   :  { %3988 = vmatpush1.bf16.msra.mxu1 %v7193_v18  ;;  %4029 = vmatpush1.bf16.msra.mxu0 %v7241_v46  ;;  %v7854_v18 = vld [vmem:[#allocation32_spill] sm:$0xff]  ;;  %v7869_v46 = vld [vmem:[#allocation47_spill] sm:$0xff] }
 0x65d   :  { %3989 = vmatprep.subr.bf16.mxu1 %v7195_v17  ;;  %4030 = vmatprep.subr.bf16.mxu0 %v7244_v33  ;;  %v7855_v17 = vld [vmem:[#allocation33_spill] sm:$0xff]  ;;  %v7870_v33 = vld [vmem:[#allocation48_spill] sm:$0xff] }
 0x65e   :  { %4019 = vmatprep.mubr.bf16.mxu1 %v7853_v16  ;;  %4060 = vmatprep.mubr.bf16.mxu0 %v7853_v16 }
 0x660   :  { %3990 = vmatpush1.bf16.msra.mxu1 %v7198_v36  ;;  %4031 = vmatpush1.bf16.msra.mxu0 %v7248_v34  ;;  %v7856_v36 = vld [vmem:[#allocation34_spill] sm:$0xff]  ;;  %v7871_v34 = vld [vmem:[#allocation49_spill] sm:$0xff] }
 0x661   :  { %3991 = vmatprep.subr.bf16.mxu1 %v7202_v20  ;;  %4032 = vmatprep.subr.bf16.mxu0 %v7252_v37  ;;  %v7857_v20 = vld [vmem:[#allocation35_spill] sm:$0xff]  ;;  %v7872_v37 = vld [vmem:[#allocation50_spill] sm:$0xff] }
 0x664   :  { %3992 = vmatpush1.bf16.msra.mxu1 %v7205_v13  ;;  %4033 = vmatpush1.bf16.msra.mxu0 %v7255_v38  ;;  %v7858_v13 = vld [vmem:[#allocation36_spill] sm:$0xff]  ;;  %v7873_v38 = vld [vmem:[#allocation51_spill] sm:$0xff] }
 0x665   :  { %3993 = vmatprep.subr.bf16.mxu1 %v7208_v22  ;;  %4034 = vmatprep.subr.bf16.mxu0 %v7258_v51  ;;  %v7859_v22 = vld [vmem:[#allocation37_spill] sm:$0xff]  ;;  %v7874_v51 = vld [vmem:[#allocation52_spill] sm:$0xff] }
 0x668   :  { %3994 = vmatpush1.bf16.msra.mxu1 %v7211_v23  ;;  %4035 = vmatpush1.bf16.msra.mxu0 %v7261_v39  ;;  %v7860_v23 = vld [vmem:[#allocation38_spill] sm:$0xff]  ;;  %v7875_v39 = vld [vmem:[#allocation53_spill] sm:$0xff] }
 0x669   :  { %3995 = vmatprep.subr.bf16.mxu1 %v7214_v40  ;;  %4036 = vmatprep.subr.bf16.mxu0 %v7264_v41  ;;  %v7861_v40 = vld [vmem:[#allocation39_spill] sm:$0xff]  ;;  %v7876_v41 = vld [vmem:[#allocation54_spill] sm:$0xff] }
 0x66c   :  { %3996 = vmatpush1.bf16.msra.mxu1 %v7217_v12  ;;  %4037 = vmatpush1.bf16.msra.mxu0 %v7267_v43  ;;  %v7862_v12 = vld [vmem:[#allocation40_spill] sm:$0xff]  ;;  %v7877_v43 = vld [vmem:[#allocation55_spill] sm:$0xff] }
 0x66d   :  { %3997 = vmatprep.subr.bf16.mxu1 %v7220_v24  ;;  %4038 = vmatprep.subr.bf16.mxu0 %v7270_v45  ;;  %v7863_v24 = vld [vmem:[#allocation41_spill] sm:$0xff]  ;;  %v7878_v45 = vld [vmem:[#allocation56_spill] sm:$0xff] }
 0x670   :  { %3998 = vmatpush1.bf16.msra.mxu1 %v7223_v26  ;;  %4039 = vmatpush1.bf16.msra.mxu0 %v7273_v48  ;;  %v7864_v26 = vld [vmem:[#allocation42_spill] sm:$0xff]  ;;  %v7879_v48 = vld [vmem:[#allocation57_spill] sm:$0xff] }
 0x671   :  { %3999 = vmatprep.subr.bf16.mxu1 %v7226_v27  ;;  %4040 = vmatprep.subr.bf16.mxu0 %v7276_v50  ;;  %v7865_v27 = vld [vmem:[#allocation43_spill] sm:$0xff]  ;;  %v7880_v50 = vld [vmem:[#allocation58_spill] sm:$0xff] }
 0x674   :  { %4000 = vmatpush1.bf16.msra.mxu1 %v7229_v29  ;;  %4041 = vmatpush1.bf16.msra.mxu0 %v7279_v52  ;;  %v7866_v29 = vld [vmem:[#allocation44_spill] sm:$0xff]  ;;  %v7881_v52 = vld [vmem:[#allocation59_spill] sm:$0xff] }
 0x675   :  { %4001 = vmatprep.subr.bf16.mxu1 %v7232_v30  ;;  %4042 = vmatprep.subr.bf16.mxu0 %v7282_v53  ;;  %v7867_v30 = vld [vmem:[#allocation45_spill] sm:$0xff]  ;;  %v7882_v53 = vld [vmem:[#allocation60_spill] sm:$0xff] }
 0x678   :  { %4002 = vmatpush1.bf16.msra.mxu1 %v7235_v31  ;;  %4043 = vmatpush1.bf16.msra.mxu0 %v7285_v21  ;;  %v7868_v31 = vld [vmem:[#allocation46_spill] sm:$0xff]  ;;  %v7883_v21 = vld [vmem:[#allocation61_spill] sm:$0xff] }
 0x679   :  { %4099 = vmatprep.subr.bf16.mxu1 %v7290_v54  ;;  %4140 = vmatprep.subr.bf16.mxu0 %v7292_v55  ;;  %v7884_v54 = vld [vmem:[#allocation62_spill] sm:$0xff]  ;;  %v7885_v55 = vld [vmem:[#allocation63_spill] sm:$0xff] }
 0x67b   :  { %4020 = vmatmul.mubr.bf16.vlgmr.msra.gmra.mrb[100].mxu1 %v3550_v42  ;;  %4061 = vmatmul.mubr.bf16.vlgmr.msra.gmra.mrb[44].mxu0 %v3550_v42  ;;  %v7611_v42 = vrot.slane %v3254_v9, %v7912_v11 }
 0x67c   :  { %4100 = vmatpush1.bf16.msra.mxu1 %v7294_v32  ;;  %4141 = vmatpush1.bf16.msra.mxu0 %v7296_v35  ;;  %v7886_v32 = vld [vmem:[#allocation64_spill] sm:$0xff]  ;;  %v7887_v35 = vld [vmem:[#allocation65_spill] sm:$0xff] }
 0x67d   :  { %4101 = vmatprep.subr.bf16.mxu1 %v7302_v19  ;;  %4142 = vmatprep.subr.bf16.mxu0 %v7304_v56  ;;  %v7888_v19 = vld [vmem:[#allocation66_spill] sm:$0xff]  ;;  %v7889_v56 = vld [vmem:[#allocation67_spill] sm:$0xff] }
 0x680   :  { %4102 = vmatpush1.bf16.msra.mxu1 %v7306_v58  ;;  %4143 = vmatpush1.bf16.msra.mxu0 %v7308_v59  ;;  %v7890_v58 = vld [vmem:[#allocation68_spill] sm:$0xff]  ;;  %v7891_v59 = vld [vmem:[#allocation69_spill] sm:$0xff] }
 0x681   :  { %4103 = vmatprep.subr.bf16.mxu1 %v7854_v18  ;;  %4144 = vmatprep.subr.bf16.mxu0 %v7855_v17 }
 0x684   :  { %4104 = vmatpush1.bf16.msra.mxu1 %v7856_v36  ;;  %4145 = vmatpush1.bf16.msra.mxu0 %v7857_v20 }
 0x685   :  { %4105 = vmatprep.subr.bf16.mxu1 %v7858_v13  ;;  %4146 = vmatprep.subr.bf16.mxu0 %v7859_v22  ;;  %v7913_v22 = vld [vmem:[#allocation29_spill] sm:$0xff] }
 0x688   :  { %4106 = vmatpush1.bf16.msra.mxu1 %v7860_v23  ;;  %4147 = vmatpush1.bf16.msra.mxu0 %v7861_v40  ;;  %v7914_v23 = vsub.s32 3, %v7913_v22 }
 0x689   :  { %4107 = vmatprep.subr.bf16.mxu1 %v7862_v12  ;;  %4148 = vmatprep.subr.bf16.mxu0 %v7863_v24 }
 0x68a   :  { %v7617_v40 = vrot.slane %v3254_v9, %v7914_v23 }
 0x68c   :  { %4108 = vmatpush1.bf16.msra.mxu1 %v7864_v26  ;;  %4149 = vmatpush1.bf16.msra.mxu0 %v7865_v27 }
 0x68d   :  { %4109 = vmatprep.subr.bf16.mxu1 %v7866_v29  ;;  %4150 = vmatprep.subr.bf16.mxu0 %v7867_v30 }
 0x690   :  { %4110 = vmatpush1.bf16.msra.mxu1 %v7868_v31  ;;  %4151 = vmatpush1.bf16.msra.mxu0 %v7869_v46 }
 0x691   :  { %4111 = vmatprep.subr.bf16.mxu1 %v7870_v33  ;;  %4152 = vmatprep.subr.bf16.mxu0 %v7871_v34 }
 0x694   :  { %4112 = vmatpush1.bf16.msra.mxu1 %v7872_v37  ;;  %4153 = vmatpush1.bf16.msra.mxu0 %v7873_v38  ;;  %v7915_v37 = vsub.s32 2, %v7913_v22 }
 0x695   :  { %4113 = vmatprep.subr.bf16.mxu1 %v7874_v51  ;;  %4154 = vmatprep.subr.bf16.mxu0 %v7875_v39 }
 0x696   :  { %v7622_v38 = vrot.slane %v3254_v9, %v7915_v37  ;;  %v5873_v37 = vld [vmem:[%s7706_s12 + $0x10] sm:$0xff]  }
 0x698   :  { %4114 = vmatpush1.bf16.msra.mxu1 %v7876_v41  ;;  %4155 = vmatpush1.bf16.msra.mxu0 %v7877_v43 }
 0x699   :  { %4115 = vmatprep.subr.bf16.mxu1 %v7878_v45  ;;  %4156 = vmatprep.subr.bf16.mxu0 %v7879_v48 }
 0x69c   :  { %4116 = vmatpush1.bf16.msra.mxu1 %v7880_v50  ;;  %4157 = vmatpush1.bf16.msra.mxu0 %v7881_v52 }
 0x69d   :  { %4117 = vmatprep.subr.bf16.mxu1 %v7882_v53  ;;  %4158 = vmatprep.subr.bf16.mxu0 %v7883_v21 }
 0x6a0   :  { %4118 = vmatpush1.bf16.msra.mxu1 %v7884_v54  ;;  %4159 = vmatpush1.bf16.msra.mxu0 %v7885_v55 }
 0x6a1   :  { %4119 = vmatprep.subr.bf16.mxu1 %v7886_v32  ;;  %4160 = vmatprep.subr.bf16.mxu0 %v7887_v35 }
 0x6a4   :  { %4120 = vmatpush1.bf16.msra.mxu1 %v7888_v19  ;;  %4161 = vmatpush1.bf16.msra.mxu0 %v7889_v56  ;;  %v7916_v56 = vld [vmem:[#allocation88_spill] sm:$0xff] }
 0x6a5   :  { %4121 = vmatprep.subr.bf16.mxu1 %v7890_v58  ;;  %4162 = vmatprep.subr.bf16.mxu0 %v7891_v59  ;;  %v7917_v59 = vld [vmem:[#allocation89_spill] sm:$0xff] }
 0x6a8   :  { %4122 = vmatpush1.bf16.msra.mxu1 %v7892_v10  ;;  %4163 = vmatpush1.bf16.msra.mxu0 %v7893_v8 }
 0x6a9   :  { %4123 = vmatprep.subr.bf16.mxu1 %v7894_v28  ;;  %4164 = vmatprep.subr.bf16.mxu0 %v7895_v2 }
 0x6ac   :  { %4124 = vmatpush1.bf16.msra.mxu1 %v7896_v0  ;;  %4165 = vmatpush1.bf16.msra.mxu0 %v7897_v3  ;;  %v7918_v0 = vld [vmem:[#allocation90_spill] sm:$0xff] }
 0x6ad   :  { %4125 = vmatprep.subr.bf16.mxu1 %v7898_v7  ;;  %4166 = vmatprep.subr.bf16.mxu0 %v7899_v62  ;;  %v7919_v7 = vld [vmem:[#allocation91_spill] sm:$0xff] }
 0x6b0   :  { %4126 = vmatpush1.bf16.msra.mxu1 %v7900_v47  ;;  %4167 = vmatpush1.bf16.msra.mxu0 %v7901_v1 }
 0x6b1   :  { %4127 = vmatprep.subr.bf16.mxu1 %v7902_v60  ;;  %4168 = vmatprep.subr.bf16.mxu0 %v7903_v61 }
 0x6b4   :  { %4128 = vmatpush1.bf16.msra.mxu1 %v7904_v25  ;;  %4169 = vmatpush1.bf16.msra.mxu0 %v7905_v57 }
 0x6b5   :  { %4129 = vmatprep.subr.bf16.mxu1 %v7906_v5  ;;  %4170 = vmatprep.subr.bf16.mxu0 %v7907_v14 }
 0x6b8   :  { %4130 = vmatpush1.bf16.msra.mxu1 %v7908_v15  ;;  %4171 = vmatpush1.bf16.msra.mxu0 %v7909_v49 }
 0x6b9   :  { %5343 = vmatprep.subr.bf16.mxu1 %v7910_v6  ;;  %5363 = vmatprep.subr.bf16.mxu0 %v7910_v6 }
 0x72e   :  { %v3906_v16 = vpop.f32.mrb[96].mxu1  ;;  %v3947_v18 = vpop.f32.mrb[40].mxu0 }
 0x72f   :  { %v3954_v17 = vadd.f32 %v3906_v16, %v7608_v44  ;;  %v3908_v36 = vpop.f32.mrb[97].mxu1  ;;  %v3949_v20 = vpop.f32.mrb[41].mxu0  ;;  %v3956_v39 = vadd.f32 %v3947_v18, %v7622_v38 }
 0x730   :  { %v3955_v13 = vadd.f32 %v3908_v36, %v7611_v42  ;;  %v3910_v12 = vpop.f32.mrb[98].mxu1  ;;  %v3951_v24 = vpop.f32.mrb[42].mxu0  ;;  %v3957_v33 = vadd.f32 %v3949_v20, %v7617_v40 }
 0x731   :  { %v3958_v26 = vsub.f32 0.0, %v3954_v17  ;;  %v3911_v27 = vpop.f32.mrb[99].mxu1  ;;  %v3952_v29 = vpop.f32.mrb[43].mxu0 }
 0x732   :  { %v3964_v30 = vsub.f32 0.0, %v3955_v13  ;;  %v3971_v34 = vsub.f32 0.0, %v3957_v33 }
 0x733   :  { %v3959_v31 = vmul.f32 1.442695, %v3958_v26 }
 0x734   :  { %v3965_v46 = vmul.f32 1.442695, %v3964_v30  ;;  %v3972_v51 = vmul.f32 1.442695, %v3971_v34  ;;  %v5871_v34 = vld [vmem:[%s7706_s12] sm:$0xff]  }
 0x735   :  { %5900 = vpow2.f32 %v3959_v31 }
 0x736   :  { %5902 = vpow2.f32 %v3965_v46 }
 0x737   :  { %5904 = vpow2.f32 %v3972_v51  ;;  %v5874_v51 = vld [vmem:[%s7706_s12 + $0x18] sm:$0xff]  }
 0x738   :  { %5906 = vtanh.f32 %v3956_v39  ;;  %v5875_v39 = vld [vmem:[%s7706_s12 + $0x20] sm:$0xff]  }
 0x73f   :  { %v5901_v41 = vpop.eup %5900 }
 0x740   :  { %v5903_v43 = vpop.eup %5902  ;;  %v3961_v45 = vadd.f32 1.0, %v5901_v41  ;;  %v5876_v41 = vld [vmem:[%s7706_s12 + $0x28] sm:$0xff]  }
 0x741   :  { %v3967_v48 = vadd.f32 1.0, %v5903_v43  ;;  %v5905_v50 = vpop.eup %5904  ;;  %v5877_v43 = vld [vmem:[%s7706_s12 + $0x30] sm:$0xff]  }
 0x742   :  { %5908 = vrcp.f32 %v3961_v45  ;;  %v5907_v52 = vpop.eup %5906  ;;  %v3974_v55 = vadd.f32 1.0, %v5905_v50  ;;  %v5878_v45 = vld [vmem:[%s7706_s12 + $0x38] sm:$0xff]   ;;  %v5880_v50 = vld [vmem:[%s7708_s14 + $0x8] sm:$0xff]  }
 0x743   :  { %5910 = vrcp.f32 %v3967_v48  ;;  %v5879_v48 = vld [vmem:[%s7708_s14] sm:$0xff]  }
 0x744   :  { %5912 = vrcp.f32 %v3974_v55 }
 0x74c   :  { %v5909_v53 = vpop.eup %5908 }
 0x74d   :  { %v5911_v21 = vpop.eup %5910  ;;  %v3978_v54 = vmul.f32 %v5909_v53, %v5907_v52 }
 0x74e   :  { %v3977_v32 = vmul.f32 0.0, %v5911_v21  ;;  %v4021_v35 = vpop.f32.mrb[100].mxu1  ;;  %v4062_v19 = vpop.f32.mrb[44].mxu0 }
 0x74f   :  { %v4069_v58 = vadd.f32 %v4021_v35, %v7916_v56  ;;  %v4071_v10 = vadd.f32 %v4062_v19, %v7917_v59  ;;  %v4023_v8 = vpop.f32.mrb[101].mxu1  ;;  %v4064_v28 = vpop.f32.mrb[45].mxu0 }
 0x750   :  { %v7627_v2 = vadd.f32 %v3978_v54, %v3977_v32  ;;  %v4070_v3 = vadd.f32 %v4023_v8, %v7918_v0  ;;  %v4072_v62 = vadd.f32 %v4064_v28, %v7919_v7  ;;  %v4025_v47 = vpop.f32.mrb[102].mxu1  ;;  %v4066_v1 = vpop.f32.mrb[46].mxu0 }
 0x751   :  { %v4073_v60 = vsub.f32 0.0, %v4069_v58  ;;  %v4026_v61 = vpop.f32.mrb[103].mxu1  ;;  %v4067_v25 = vpop.f32.mrb[47].mxu0 }
 0x752   :  { %5914 = vtanh.f32 %v7627_v2  ;;  %v4079_v57 = vsub.f32 0.0, %v4070_v3  ;;  %v4086_v15 = vsub.f32 0.0, %v4072_v62  ;;  %v5913_v49 = vpop.eup %5912 }
 0x753   :  { %v4074_v5 = vmul.f32 1.442695, %v4073_v60 }
 0x754   :  { %v4080_v14 = vmul.f32 1.442695, %v4079_v57  ;;  %v4087_v63 = vmul.f32 1.442695, %v4086_v15 }
 0x755   :  { %5916 = vpow2.f32 %v4074_v5 }
 0x756   :  { %5918 = vpow2.f32 %v4080_v14 }
 0x757   :  { %5920 = vpow2.f32 %v4087_v63 }
 0x758   :  { %5922 = vtanh.f32 %v4071_v10 }
 0x75c   :  { %v5915_v9 = vpop.eup %5914 }
 0x75d   :  { %v3981_v11 = vmul.f32 %v5915_v9, %v5913_v49 }
 0x75f   :  { %v5917_v16 = vpop.eup %5916  ;;  %v4098_v18 = vpack.c.bf16 %v3981_v11, %v3981_v11  ;;  %v5881_v11 = vld [vmem:[%s7708_s14 + $0x10] sm:$0xff]  }
 0x760   :  { %v5919_v17 = vpop.eup %5918  ;;  %v4076_v36 = vadd.f32 1.0, %v5917_v16  ;;  %v4907_v16 = vld [vmem:[#allocation17] ss:$0 sm:$0xff] }
 0x761   :  { %v4082_v20 = vadd.f32 1.0, %v5919_v17  ;;  %4131 = vmatprep.mubr.bf16.mxu1 %v4098_v18  ;;  %4172 = vmatprep.mubr.bf16.mxu0 %v4098_v18  ;;  %v5921_v13 = vpop.eup %5920 }
 0x762   :  { %5924 = vrcp.f32 %v4076_v36  ;;  %v5923_v22 = vpop.eup %5922  ;;  %v4089_v26 = vadd.f32 1.0, %v5921_v13 }
 0x763   :  { %5926 = vrcp.f32 %v4082_v20 }
 0x764   :  { %5928 = vrcp.f32 %v4089_v26 }
 0x76c   :  { %v5925_v23 = vpop.eup %5924 }
 0x76d   :  { %v5927_v12 = vpop.eup %5926  ;;  %v4093_v24 = vmul.f32 %v5925_v23, %v5923_v22 }
 0x76e   :  { %v4092_v27 = vmul.f32 %v5927_v12, %v7503_v4  ;;  %v5929_v30 = vpop.eup %5928  ;;  %v5872_v4 = vld [vmem:[%s7706_s12 + $0x8] sm:$0xff]  }
 0x76f   :  { %v5883_v12 = vld [vmem:[#allocation20] sm:$0x1f]  }
 0x770   :  { %v4094_v29 = vadd.f32 %v4093_v24, %v4092_v27  ;;  %v4428_v24 = vsel %vm4426_vm4, %v5883_v12, 0 }
 0x772   :  { %5930 = vtanh.f32 %v4094_v29 }
 0x77c   :  { %v5931_v31 = vpop.eup %5930 }
 0x77d   :  { %v4096_v46 = vmul.f32 %v5931_v31, %v5929_v30 }
 0x77f   :  { %v4097_v33 = vpack.c.bf16 %v4096_v46, %v4096_v46 }
 0x781   :  { %4132 = vmatmul.mubr.bf16.vlgmr.msra.gmra.mrb[104].mxu1 %v4097_v33  ;;  %4173 = vmatmul.mubr.bf16.vlgmr.msra.gmra.mrb[48].mxu0 %v4097_v33 }
 0x782   :  { %5359 = vmatprep.mubr.msk.bf16.mxu1 %vm6224_vm2, %v7910_v6  ;;  %5371 = vmatprep.mubr.msk.bf16.mxu0 %vm6224_vm2, %v7910_v6 }
 0x783   :  { %5344 = vmatpush3.bf16.msra.mxu1 %v5871_v34  ;;  %5364 = vmatpush3.bf16.msra.mxu0 %v5879_v48  ;;  %v4922_v34 = vld [vmem:[#allocation22] ss:$0 sm:$0xff] }
 0x784   :  { %5345 = vmatprep.subr.bf16.mxu1 %v7910_v6  ;;  %5365 = vmatprep.subr.bf16.mxu0 %v7910_v6 }
 0x787   :  { %5346 = vmatpush3.bf16.msra.mxu1 %v5872_v4  ;;  %5366 = vmatpush3.bf16.msra.mxu0 %v5880_v50 }
 0x788   :  { %5347 = vmatprep.subr.bf16.mxu1 %v7910_v6  ;;  %5367 = vmatprep.subr.bf16.mxu0 %v7910_v6 }
 0x78b   :  { %5348 = vmatpush3.bf16.msra.mxu1 %v5873_v37  ;;  %5368 = vmatpush3.bf16.msra.mxu0 %v5881_v11 }
 0x78c   :  { %5349 = vmatprep.subr.bf16.mxu1 %v7910_v6  ;;  %5369 = vmatprep.subr.bf16.mxu0 %v7910_v6 }
 0x78f   :  { %5350 = vmatpush3.bf16.msra.mxu1 %v5874_v51 }
 0x790   :  { %5351 = vmatprep.subr.bf16.mxu1 %v7910_v6 }
 0x793   :  { %5352 = vmatpush3.bf16.msra.mxu1 %v5875_v39 }
 0x794   :  { %5353 = vmatprep.subr.bf16.mxu1 %v7910_v6 }
 0x797   :  { %5354 = vmatpush3.bf16.msra.mxu1 %v5876_v41 }
 0x798   :  { %5355 = vmatprep.subr.bf16.mxu1 %v7910_v6 }
 0x79b   :  { %5356 = vmatpush3.bf16.msra.mxu1 %v5877_v43 }
 0x79c   :  { %5357 = vmatprep.subr.bf16.mxu1 %v7910_v6 }
 0x79f   :  { %5358 = vmatpush3.bf16.msra.mxu1 %v5878_v45 }
 0x7a0   :  { %5375 = vmatprep.subr.bf16.mxu1 %v7910_v6 }
 0x854   :  { %v4133_v52 = vpop.f32.mrb[104].mxu1  ;;  %v4174_v53 = vpop.f32.mrb[48].mxu0 }
 0x855   :  { %v4181_v21 = vadd.f32 %v4133_v52, %v7608_v44  ;;  %v4135_v54 = vpop.f32.mrb[105].mxu1  ;;  %v4176_v55 = vpop.f32.mrb[49].mxu0  ;;  %v4183_v44 = vadd.f32 %v4174_v53, %v7622_v38 }
 0x856   :  { %v4182_v32 = vadd.f32 %v4135_v54, %v7611_v42  ;;  %v4137_v35 = vpop.f32.mrb[106].mxu1  ;;  %v4178_v19 = vpop.f32.mrb[50].mxu0  ;;  %v4184_v0 = vadd.f32 %v4176_v55, %v7617_v40 }
 0x857   :  { %v4185_v56 = vsub.f32 0.0, %v4181_v21  ;;  %v4138_v58 = vpop.f32.mrb[107].mxu1  ;;  %v4179_v59 = vpop.f32.mrb[51].mxu0 }
 0x858   :  { %v4191_v10 = vsub.f32 0.0, %v4182_v32  ;;  %v4198_v3 = vsub.f32 0.0, %v4184_v0 }
 0x859   :  { %v4186_v8 = vmul.f32 1.442695, %v4185_v56 }
 0x85a   :  { %v4192_v28 = vmul.f32 1.442695, %v4191_v10  ;;  %v4199_v7 = vmul.f32 1.442695, %v4198_v3 }
 0x85b   :  { %5932 = vpow2.f32 %v4186_v8 }
 0x85c   :  { %5934 = vpow2.f32 %v4192_v28 }
 0x85d   :  { %5936 = vpow2.f32 %v4199_v7 }
 0x85e   :  { %5938 = vtanh.f32 %v4183_v44 }
 0x865   :  { %v5933_v62 = vpop.eup %5932 }
 0x866   :  { %v5935_v47 = vpop.eup %5934  ;;  %v4188_v1 = vadd.f32 1.0, %v5933_v62 }
 0x867   :  { %v4194_v42 = vadd.f32 1.0, %v5935_v47  ;;  %v5937_v60 = vpop.eup %5936 }
 0x868   :  { %5940 = vrcp.f32 %v4188_v1  ;;  %v5939_v61 = vpop.eup %5938  ;;  %v4201_v40 = vadd.f32 1.0, %v5937_v60 }
 0x869   :  { %5942 = vrcp.f32 %v4194_v42 }
 0x86a   :  { %5944 = vrcp.f32 %v4201_v40 }
 0x872   :  { %v5941_v25 = vpop.eup %5940 }
 0x873   :  { %v5943_v57 = vpop.eup %5942  ;;  %v4205_v5 = vmul.f32 %v5941_v25, %v5939_v61 }
 0x874   :  { %v4204_v14 = vmul.f32 %v5943_v57, %v7627_v2  ;;  %v5945_v38 = vpop.eup %5944  ;;  %v5882_v2 = vld [vmem:[%s7708_s14 + $0x18] sm:$0xff]  }
 0x875   :  { %5370 = vmatpush3.bf16.msra.mxu0 %v5882_v2 }
 0x876   :  { %v4206_v15 = vadd.f32 %v4205_v5, %v4204_v14 }
 0x878   :  { %5946 = vtanh.f32 %v4206_v15 }
 0x882   :  { %v5947_v49 = vpop.eup %5946 }
 0x883   :  { %v4208_v9 = vmul.f32 %v5947_v49, %v5945_v38 }
 0x885   :  { %v4209_v63 = vpack.c.bf16 %v4208_v9, %v4208_v9 }
 0x887   :  { %5360 = vmatmul.mubr.bf16.vlgmr.msra.gmra.mrb[108].mxu1 %v4209_v63 }
 0x888   :  { %5377 = vmatprep.mubr.msk.bf16.mxu1 %vm6224_vm2, %v7910_v6  ;;  %5376 = vmatpush3.bf16.msra.mxu1 %v4428_v24  ;;  %v4916_v6 = vld [vmem:[#allocation19] ss:$0 sm:$0xff] }
 0x95a   :  { %v4315_v18 = vpop.f32.mrb[108].mxu1 }
 0x95b   :  { %v4316_v17 = vadd.f32 %v4907_v16, %v4315_v18  ;;  %v5361_v36 = vpop.f32.mrb[109].mxu1 }
 0x95c   :  { %v4318_v20 = vpop.f32.mrb[110].mxu1 }
 0x95d   :  { %v4321_v13 = vmax.f32 %v4316_v17, 0.0  ;;  %v5362_v22 = vpop.f32.mrb[111].mxu1 }
 0x95f   :  { %v4322_v23 = vpack.c.bf16 %v4321_v13, %v4321_v13 }
 0x961   :  { %5372 = vmatmul.mubr.msk.bf16.vlgmr.msra.gmra.mrb[52].mxu0 %vm4362_vm3, %v4322_v23 }
 0xa34   :  { %v4400_v26 = vpop.f32.mrb[52].mxu0 }
 0xa35   :  { %v4401_v27 = vadd.f32 %v4916_v6, %v4400_v26  ;;  %v5373_v29 = vpop.f32.mrb[53].mxu0 }
 0xa36   :  { %v4403_v30 = vpop.f32.mrb[54].mxu0 }
 0xa37   :  { %v4406_v31 = vmax.f32 %v4401_v27, 0.0  ;;  %v5374_v46 = vpop.f32.mrb[55].mxu0 }
 0xa39   :  { %v4407_v33 = vpack.c.bf16 %v4406_v31, %v4406_v31 }
 0xa3b   :  { %5378 = vmatmul.mubr.msk.bf16.vlgmr.msra.gmra.mrb[112].mxu1 %vm4422_vm5, %v4407_v33 }
 0xb0e   :  { %v4464_v4 = vpop.f32.mrb[112].mxu1 }
 0xb0f   :  { %v4465_v37 = vadd.f32 %v4922_v34, %v4464_v4  ;;  %v5379_v51 = vpop.f32.mrb[113].mxu1 }
 0xb10   :  { %v4467_v39 = vpop.f32.mrb[114].mxu1 }
 0xb11   :  { %v4470_v41 = vsub.f32 0.0, %v4465_v37  ;;  %v5380_v43 = vpop.f32.mrb[115].mxu1 }
 0xb13   :  { %v4471_v45 = vmul.f32 1.442695, %v4470_v41 }
 0xb15   :  { %5948 = vpow2.f32 %v4471_v45 }
 0xb1f   :  { %v5949_v48 = vpop.eup %5948 }
 0xb20   :  { %v4473_v50 = vadd.f32 1.0, %v5949_v48 }
 0xb22   :  { %5950 = vrcp.f32 %v4473_v50 }
 0xb2c   :  { %v5951_v52 = vpop.eup %5950 }
 0xb2d   :  { %4476 = vst [vmem:[%s7712_s18] sm:$0xff] %v5951_v52 }
 0xb2e   :  { %4481 = vsyncpa [#allocation7], 1 }
 0xb2f   :  { %4482 = vsyncpa [#allocation9], 1 }
 0xb30   :  { %4483 = vsyncpa [#allocation12], 1 }
 0xb31   :  { %4484 = vsyncpa [#allocation15], 1 }
 0xb32   :  { %4485 = vsyncpa [#allocation18], 1 }
 0xb33   :  { %4486 = vsyncpa [#allocation21], 1 }

</bundles_post_ra>
